<compile_context>
chip_gen: v5e
topology: v5e:2x2
jax: 0.10.0
libtpu: 0.0.40
codegen_flags: <defaults>
</compile_context>

<pallas_src>
import functools

import jax
import jax.numpy as jnp
from jax import lax
from jax.experimental import pallas as pl
from jax.experimental.pallas import tpu as pltpu

_EPS = 1e-5
_LANE = 128
_VMEM_LIMIT = 32 * 1024 * 1024


def _round_up(x, m):
    return ((x + m - 1) // m) * m


# ---------------------------------------------------------------------------
# Pallas kernels
# ---------------------------------------------------------------------------
def _conv_stats_kernel(x_ref, w_ref, scale_ref, shift_ref,
                       out_ref, sum_ref, ssq_ref, *, apply_act):
    """3x3 conv (pad=1) on one image + per-image channel sum / sumsq.

    x_ref:     (1, H+2, W+2, Cin)  spatially zero-padded input tile
    w_ref:     (9, Cin, Cout)      bf16 weights, index = kh*3 + kw
    scale_ref: (1, Cin) f32        fused input BN scale  (used iff apply_act)
    shift_ref: (1, Cin) f32        fused input BN shift  (used iff apply_act)
    out_ref:   (1, H*W, Cout) f32  raw conv output (pre-BN)
    sum_ref:   (1, 1, Cout) f32    per-image channel sum of the conv output
    ssq_ref:   (1, 1, Cout) f32    per-image channel sum of squares
    """
    hp, wp, cin = x_ref.shape[1], x_ref.shape[2], x_ref.shape[3]
    h, w = hp - 2, wp - 2
    cout = w_ref.shape[2]

    x = x_ref[0]                                            # (H+2, W+2, Cin)
    if apply_act:
        # Fused BN + ReLU of the previous layer, then re-zero the halo border
        # (the halo holds the previous layer's raw zeros, not activated ones).
        xf = jnp.maximum(x.astype(jnp.float32) * scale_ref[...] + shift_ref[...], 0.0)
        rows = lax.broadcasted_iota(jnp.int32, (hp, wp, cin), 0)
        cols = lax.broadcasted_iota(jnp.int32, (hp, wp, cin), 1)
        interior = (rows >= 1) & (rows <= h) & (cols >= 1) & (cols <= w)
        x = jnp.where(interior, xf, 0.0)

    # 9 shifted matmuls, bf16 operands, f32 accumulation on the MXU.
    acc = jnp.zeros((h * w, cout), jnp.float32)
    for dh in range(3):
        for dw in range(3):
            lhs = x[dh:dh + h, dw:dw + w, :].reshape(h * w, cin).astype(jnp.bfloat16)
            acc = acc + jnp.dot(lhs, w_ref[dh * 3 + dw],
                                preferred_element_type=jnp.float32)

    out_ref[0] = acc
    sum_ref[0] = jnp.sum(acc, axis=0, keepdims=True)
    ssq_ref[0] = jnp.sum(acc * acc, axis=0, keepdims=True)


def _bn_relu_kernel(x_ref, scale_ref, shift_ref, out_ref):
    """Element-wise y = max(x*scale + shift, 0) with per-channel scale/shift."""
    out_ref[...] = jnp.maximum(x_ref[...] * scale_ref[...] + shift_ref[...], 0.0)


# ---------------------------------------------------------------------------
# pallas_call wrappers
# ---------------------------------------------------------------------------
def _conv_layer(x_pad, w_mat, scale_in, shift_in, *, apply_act):
    """x_pad: (N, H+2, W+2, Cin_p); returns (conv (N, H*W, Cout_p), sum, ssq)."""
    n, hp, wp, cin_p = x_pad.shape
    h, w = hp - 2, wp - 2
    cout_p = w_mat.shape[2]

    kernel = functools.partial(_conv_stats_kernel, apply_act=apply_act)
    return pl.pallas_call(
        kernel,
        out_shape=(
            jax.ShapeDtypeStruct((n, h * w, cout_p), jnp.float32),
            jax.ShapeDtypeStruct((n, 1, cout_p), jnp.float32),
            jax.ShapeDtypeStruct((n, 1, cout_p), jnp.float32),
        ),
        grid=(n,),
        in_specs=[
            pl.BlockSpec((1, hp, wp, cin_p), lambda i: (i, 0, 0, 0)),
            pl.BlockSpec((9, cin_p, cout_p), lambda i: (0, 0, 0)),
            pl.BlockSpec((1, cin_p), lambda i: (0, 0)),
            pl.BlockSpec((1, cin_p), lambda i: (0, 0)),
        ],
        out_specs=(
            pl.BlockSpec((1, h * w, cout_p), lambda i: (i, 0, 0)),
            pl.BlockSpec((1, 1, cout_p), lambda i: (i, 0, 0)),   # per-image partial stats
            pl.BlockSpec((1, 1, cout_p), lambda i: (i, 0, 0)),
        ),
        compiler_params=pltpu.CompilerParams(
            dimension_semantics=("parallel",),                   # megacore-shardable
            vmem_limit_bytes=_VMEM_LIMIT),
    )(x_pad, w_mat, scale_in, shift_in)


def _bn_relu(x2d, scale, shift, *, tm=1024):
    m, c = x2d.shape
    tm = min(tm, m)
    return pl.pallas_call(
        _bn_relu_kernel,
        out_shape=jax.ShapeDtypeStruct((m, c), jnp.float32),
        grid=(pl.cdiv(m, tm),),
        in_specs=[
            pl.BlockSpec((tm, c), lambda i: (i, 0)),
            pl.BlockSpec((1, c), lambda i: (0, 0)),
            pl.BlockSpec((1, c), lambda i: (0, 0)),
        ],
        out_specs=pl.BlockSpec((tm, c), lambda i: (i, 0)),
        compiler_params=pltpu.CompilerParams(
            dimension_semantics=("parallel",),
            vmem_limit_bytes=_VMEM_LIMIT),
    )(x2d, scale, shift)


# ---------------------------------------------------------------------------
# Parameter / activation prep and the DoubleConv forward
# ---------------------------------------------------------------------------
def _prep_weight(w_oihw, cin_p, cout_p):
    cout, cin = w_oihw.shape[0], w_oihw.shape[1]
    w = jnp.transpose(w_oihw, (2, 3, 1, 0)).reshape(9, cin, cout)   # (kh*3+kw, Cin, Cout)
    w = jnp.pad(w, ((0, 0), (0, cin_p - cin), (0, cout_p - cout)))
    return w.astype(jnp.bfloat16)


def _pad_vec(v, cp):
    return jnp.pad(v.astype(jnp.float32), (0, cp - v.shape[0]))


def _bn_affine(sum_parts, ssq_parts, gamma_p, beta_p, count):
    """Fold batch-stat BN into per-channel (scale, shift): y = x*scale + shift."""
    total = jnp.sum(sum_parts, axis=(0, 1))
    totsq = jnp.sum(ssq_parts, axis=(0, 1))
    mean = total / count
    var = jnp.maximum(totsq / count - mean * mean, 0.0)   # biased var (PyTorch training)
    inv = lax.rsqrt(var + _EPS)
    scale = gamma_p * inv
    shift = beta_p - mean * scale
    return scale.reshape(1, -1), shift.reshape(1, -1)


def double_conv(x_nchw, params):
    n, cin, h, w = x_nchw.shape
    cout = params["w1"].shape[0]
    cin_p = _round_up(cin, _LANE)
    cout_p = _round_up(cout, _LANE)
    count = n * h * w

    g1 = _pad_vec(params["g1"], cout_p)
    bt1 = _pad_vec(params["bt1"], cout_p)
    g2 = _pad_vec(params["g2"], cout_p)
    bt2 = _pad_vec(params["bt2"], cout_p)
    w1 = _prep_weight(params["w1"], cin_p, cout_p)
    w2 = _prep_weight(params["w2"], cout_p, cout_p)

    # NCHW -> NHWC, channel pad to 128 lanes, spatial zero halo, bf16 operands.
    # (Conv bias is intentionally dropped: batch-stat BN cancels it exactly.)
    x = jnp.transpose(x_nchw, (0, 2, 3, 1))
    x = jnp.pad(x, ((0, 0), (1, 1), (1, 1), (0, cin_p - cin))).astype(jnp.bfloat16)

    # ---- conv1 (+ stats) ----
    zeros = jnp.zeros((1, cin_p), jnp.float32)
    conv1, s1, q1 = _conv_layer(x, w1, zeros, zeros, apply_act=False)
    scale1, shift1 = _bn_affine(s1, q1, g1, bt1, count)

    # ---- conv2 with BN1+ReLU fused into its input load (+ stats) ----
    x2 = jnp.pad(conv1.reshape(n, h, w, cout_p), ((0, 0), (1, 1), (1, 1), (0, 0)))
    conv2, s2, q2 = _conv_layer(x2, w2, scale1, shift1, apply_act=True)
    scale2, shift2 = _bn_affine(s2, q2, g2, bt2, count)

    # ---- final BN2 + ReLU (element-wise, large lane-dense tiles) ----
    y = _bn_relu(conv2.reshape(count, cout_p), scale2, shift2)
    y = y.reshape(n, h, w, cout_p)[..., :cout]
    return jnp.transpose(y, (0, 3, 1, 2))                  # NHWC -> NCHW


# ---------------------------------------------------------------------------
# Pure-JAX reference (PyTorch semantics). compute_dtype selects the conv
# operand precision so we can check both exact kernel math (bf16-matched) and
# closeness to full f32 semantics.
# ---------------------------------------------------------------------------
def _reference(x_nchw, params, compute_dtype):
    def block(x, w, b, g, bt):
        y = lax.conv_general_dilated(
            x.astype(compute_dtype), w.astype(compute_dtype),
            window_strides=(1, 1), padding=((1, 1), (1, 1)),
            dimension_numbers=("NCHW", "OIHW", "NCHW"),
            preferred_element_type=jnp.float32)
        y = y + b[None, :, None, None]
        mean = jnp.mean(y, axis=(0, 2, 3), keepdims=True)
        var = jnp.var(y, axis=(0, 2, 3), keepdims=True)
        y = (y - mean) * lax.rsqrt(var + _EPS)
        y = y * g[None, :, None, None] + bt[None, :, None, None]
        return jnp.maximum(y, 0.0)

    x = block(x_nchw, params["w1"], params["b1"], params["g1"], params["bt1"])
    x = block(x, params["w2"], params["b2"], params["g2"], params["bt2"])
    return x


# ---------------------------------------------------------------------------
if __name__ == "__main__":
    N, CIN, COUT, H, W = 2, 4, 8, 16, 16

    key = jax.random.PRNGKey(0)
    k1, k2, k3, k4, k5, k6, k7, k8, kx = jax.random.split(key, 9)
    params = {
        "w1": 0.1 * jax.random.normal(k1, (COUT, CIN, 3, 3), jnp.float32),
        "b1": 0.1 * jax.random.normal(k2, (COUT,), jnp.float32),
        "g1": 1.0 + 0.1 * jax.random.normal(k3, (COUT,), jnp.float32),
        "bt1": 0.1 * jax.random.normal(k4, (COUT,), jnp.float32),
        "w2": 0.1 * jax.random.normal(k5, (COUT, COUT, 3, 3), jnp.float32),
        "b2": 0.1 * jax.random.normal(k6, (COUT,), jnp.float32),
        "g2": 1.0 + 0.1 * jax.random.normal(k7, (COUT,), jnp.float32),
        "bt2": 0.1 * jax.random.normal(k8, (COUT,), jnp.float32),
    }
    x = jax.random.normal(kx, (N, CIN, H, W), jnp.float32)

    out = jax.block_until_ready(jax.jit(double_conv)(x, params))
    assert out.shape == (N, COUT, H, W), out.shape

    # Tight check against a reference that uses the same bf16 conv operands
    # (validates the kernel math itself).
    ref_matched = _reference(x, params, jnp.bfloat16)
    err_matched = float(jnp.max(jnp.abs(out - ref_matched)))
    assert err_matched < 1e-2, f"bf16-matched reference mismatch: {err_matched}"

    # Looser check against the full-f32 PyTorch-semantics reference
    # (tolerance set by the bf16 MXU operands with f32 accumulation).
    ref_f32 = _reference(x, params, jnp.float32)
    err_f32 = float(jnp.max(jnp.abs(out - ref_f32)))
    assert err_f32 < 1e-1, f"f32 reference mismatch: {err_f32}"

    print("KERNEL_OK")
</pallas_src>

<mosaic_0001>
module attributes {stable_mosaic.version = 11 : i64} {
  func.func @_conv_stats_kernel(%arg0: i32, %arg1: memref<1x18x18x128xbf16, #tpu.memory_space<vmem>>, %arg2: memref<9x128x128xbf16, #tpu.memory_space<vmem>>, %arg3: memref<1x128xf32, #tpu.memory_space<vmem>>, %arg4: memref<1x128xf32, #tpu.memory_space<vmem>>, %arg5: memref<1x256x128xf32, #tpu.memory_space<vmem>>, %arg6: memref<1x1x128xf32, #tpu.memory_space<vmem>>, %arg7: memref<1x1x128xf32, #tpu.memory_space<vmem>>) attributes {dimension_semantics = [#tpu.dimension_semantics<parallel>], iteration_bounds = array<i64: 2>, scalar_prefetch = 0 : i64, scratch_operands = 0 : i64, tpu.core_type = #tpu.core_type<tc>, window_params = [{transform_indices = @transform_0, window_bounds = array<i64: 1, 18, 18, 128>}, {pipeline_mode = #tpu.pipeline_mode<synchronous>, transform_indices = @transform_1, window_bounds = array<i64: 9, 128, 128>}, {pipeline_mode = #tpu.pipeline_mode<synchronous>, transform_indices = @transform_2, window_bounds = array<i64: 1, 128>}, {pipeline_mode = #tpu.pipeline_mode<synchronous>, transform_indices = @transform_3, window_bounds = array<i64: 1, 128>}, {transform_indices = @transform_4, window_bounds = array<i64: 1, 256, 128>}, {transform_indices = @transform_5, window_bounds = array<i64: 1, 1, 128>}, {transform_indices = @transform_6, window_bounds = array<i64: 1, 1, 128>}]} {
    %c0 = arith.constant 0 : index
    %c0_0 = arith.constant 0 : index
    %c0_1 = arith.constant 0 : index
    %c0_2 = arith.constant 0 : index
    %0 = vector.load %arg1[%c0, %c0_0, %c0_1, %c0_2] : memref<1x18x18x128xbf16, #tpu.memory_space<vmem>>, vector<1x18x18x128xbf16>
    %1 = vector.shape_cast %0 : vector<1x18x18x128xbf16> to vector<18x18x128xbf16>
    %cst = arith.constant 0.000000e+00 : f32
    %2 = vector.broadcast %cst : f32 to vector<256x128xf32>
    %3 = vector.extract_strided_slice %1 {offsets = [0, 0, 0], sizes = [16, 16, 128], strides = [1, 1, 1]} : vector<18x18x128xbf16> to vector<16x16x128xbf16>
    %4 = vector.shape_cast %3 : vector<16x16x128xbf16> to vector<256x128xbf16>
    %c0_3 = arith.constant 0 : index
    %c0_4 = arith.constant 0 : index
    %c0_5 = arith.constant 0 : index
    %5 = vector.load %arg2[%c0_3, %c0_4, %c0_5] : memref<9x128x128xbf16, #tpu.memory_space<vmem>>, vector<1x128x128xbf16>
    %6 = vector.shape_cast %5 : vector<1x128x128xbf16> to vector<128x128xbf16>
    %cst_6 = arith.constant dense<0.000000e+00> : vector<256x128xf32>
    %7 = tpu.matmul %4, %6, %cst_6 {dimension_numbers = #tpu.dot_dimension_numbers<[1], [0], [0], [1], [0, 0, 1, 1], [], []>} : vector<256x128xbf16>, vector<128x128xbf16>, vector<256x128xf32> -> vector<256x128xf32>
    %8 = arith.addf %2, %7 : vector<256x128xf32>
    %9 = vector.extract_strided_slice %1 {offsets = [0, 1, 0], sizes = [16, 16, 128], strides = [1, 1, 1]} : vector<18x18x128xbf16> to vector<16x16x128xbf16>
    %10 = vector.shape_cast %9 : vector<16x16x128xbf16> to vector<256x128xbf16>
    %c1 = arith.constant 1 : index
    %c0_7 = arith.constant 0 : index
    %c0_8 = arith.constant 0 : index
    %11 = vector.load %arg2[%c1, %c0_7, %c0_8] : memref<9x128x128xbf16, #tpu.memory_space<vmem>>, vector<1x128x128xbf16>
    %12 = vector.shape_cast %11 : vector<1x128x128xbf16> to vector<128x128xbf16>
    %cst_9 = arith.constant dense<0.000000e+00> : vector<256x128xf32>
    %13 = tpu.matmul %10, %12, %cst_9 {dimension_numbers = #tpu.dot_dimension_numbers<[1], [0], [0], [1], [0, 0, 1, 1], [], []>} : vector<256x128xbf16>, vector<128x128xbf16>, vector<256x128xf32> -> vector<256x128xf32>
    %14 = arith.addf %8, %13 : vector<256x128xf32>
    %15 = vector.extract_strided_slice %1 {offsets = [0, 2, 0], sizes = [16, 16, 128], strides = [1, 1, 1]} : vector<18x18x128xbf16> to vector<16x16x128xbf16>
    %16 = vector.shape_cast %15 : vector<16x16x128xbf16> to vector<256x128xbf16>
    %c2 = arith.constant 2 : index
    %c0_10 = arith.constant 0 : index
    %c0_11 = arith.constant 0 : index
    %17 = vector.load %arg2[%c2, %c0_10, %c0_11] : memref<9x128x128xbf16, #tpu.memory_space<vmem>>, vector<1x128x128xbf16>
    %18 = vector.shape_cast %17 : vector<1x128x128xbf16> to vector<128x128xbf16>
    %cst_12 = arith.constant dense<0.000000e+00> : vector<256x128xf32>
    %19 = tpu.matmul %16, %18, %cst_12 {dimension_numbers = #tpu.dot_dimension_numbers<[1], [0], [0], [1], [0, 0, 1, 1], [], []>} : vector<256x128xbf16>, vector<128x128xbf16>, vector<256x128xf32> -> vector<256x128xf32>
    %20 = arith.addf %14, %19 : vector<256x128xf32>
    %21 = vector.extract_strided_slice %1 {offsets = [1, 0, 0], sizes = [16, 16, 128], strides = [1, 1, 1]} : vector<18x18x128xbf16> to vector<16x16x128xbf16>
    %22 = vector.shape_cast %21 : vector<16x16x128xbf16> to vector<256x128xbf16>
    %c3 = arith.constant 3 : index
    %c0_13 = arith.constant 0 : index
    %c0_14 = arith.constant 0 : index
    %23 = vector.load %arg2[%c3, %c0_13, %c0_14] : memref<9x128x128xbf16, #tpu.memory_space<vmem>>, vector<1x128x128xbf16>
    %24 = vector.shape_cast %23 : vector<1x128x128xbf16> to vector<128x128xbf16>
    %cst_15 = arith.constant dense<0.000000e+00> : vector<256x128xf32>
    %25 = tpu.matmul %22, %24, %cst_15 {dimension_numbers = #tpu.dot_dimension_numbers<[1], [0], [0], [1], [0, 0, 1, 1], [], []>} : vector<256x128xbf16>, vector<128x128xbf16>, vector<256x128xf32> -> vector<256x128xf32>
    %26 = arith.addf %20, %25 : vector<256x128xf32>
    %27 = vector.extract_strided_slice %1 {offsets = [1, 1, 0], sizes = [16, 16, 128], strides = [1, 1, 1]} : vector<18x18x128xbf16> to vector<16x16x128xbf16>
    %28 = vector.shape_cast %27 : vector<16x16x128xbf16> to vector<256x128xbf16>
    %c4 = arith.constant 4 : index
    %c0_16 = arith.constant 0 : index
    %c0_17 = arith.constant 0 : index
    %29 = vector.load %arg2[%c4, %c0_16, %c0_17] : memref<9x128x128xbf16, #tpu.memory_space<vmem>>, vector<1x128x128xbf16>
    %30 = vector.shape_cast %29 : vector<1x128x128xbf16> to vector<128x128xbf16>
    %cst_18 = arith.constant dense<0.000000e+00> : vector<256x128xf32>
    %31 = tpu.matmul %28, %30, %cst_18 {dimension_numbers = #tpu.dot_dimension_numbers<[1], [0], [0], [1], [0, 0, 1, 1], [], []>} : vector<256x128xbf16>, vector<128x128xbf16>, vector<256x128xf32> -> vector<256x128xf32>
    %32 = arith.addf %26, %31 : vector<256x128xf32>
    %33 = vector.extract_strided_slice %1 {offsets = [1, 2, 0], sizes = [16, 16, 128], strides = [1, 1, 1]} : vector<18x18x128xbf16> to vector<16x16x128xbf16>
    %34 = vector.shape_cast %33 : vector<16x16x128xbf16> to vector<256x128xbf16>
    %c5 = arith.constant 5 : index
    %c0_19 = arith.constant 0 : index
    %c0_20 = arith.constant 0 : index
    %35 = vector.load %arg2[%c5, %c0_19, %c0_20] : memref<9x128x128xbf16, #tpu.memory_space<vmem>>, vector<1x128x128xbf16>
    %36 = vector.shape_cast %35 : vector<1x128x128xbf16> to vector<128x128xbf16>
    %cst_21 = arith.constant dense<0.000000e+00> : vector<256x128xf32>
    %37 = tpu.matmul %34, %36, %cst_21 {dimension_numbers = #tpu.dot_dimension_numbers<[1], [0], [0], [1], [0, 0, 1, 1], [], []>} : vector<256x128xbf16>, vector<128x128xbf16>, vector<256x128xf32> -> vector<256x128xf32>
    %38 = arith.addf %32, %37 : vector<256x128xf32>
    %39 = vector.extract_strided_slice %1 {offsets = [2, 0, 0], sizes = [16, 16, 128], strides = [1, 1, 1]} : vector<18x18x128xbf16> to vector<16x16x128xbf16>
    %40 = vector.shape_cast %39 : vector<16x16x128xbf16> to vector<256x128xbf16>
    %c6 = arith.constant 6 : index
    %c0_22 = arith.constant 0 : index
    %c0_23 = arith.constant 0 : index
    %41 = vector.load %arg2[%c6, %c0_22, %c0_23] : memref<9x128x128xbf16, #tpu.memory_space<vmem>>, vector<1x128x128xbf16>
    %42 = vector.shape_cast %41 : vector<1x128x128xbf16> to vector<128x128xbf16>
    %cst_24 = arith.constant dense<0.000000e+00> : vector<256x128xf32>
    %43 = tpu.matmul %40, %42, %cst_24 {dimension_numbers = #tpu.dot_dimension_numbers<[1], [0], [0], [1], [0, 0, 1, 1], [], []>} : vector<256x128xbf16>, vector<128x128xbf16>, vector<256x128xf32> -> vector<256x128xf32>
    %44 = arith.addf %38, %43 : vector<256x128xf32>
    %45 = vector.extract_strided_slice %1 {offsets = [2, 1, 0], sizes = [16, 16, 128], strides = [1, 1, 1]} : vector<18x18x128xbf16> to vector<16x16x128xbf16>
    %46 = vector.shape_cast %45 : vector<16x16x128xbf16> to vector<256x128xbf16>
    %c7 = arith.constant 7 : index
    %c0_25 = arith.constant 0 : index
    %c0_26 = arith.constant 0 : index
    %47 = vector.load %arg2[%c7, %c0_25, %c0_26] : memref<9x128x128xbf16, #tpu.memory_space<vmem>>, vector<1x128x128xbf16>
    %48 = vector.shape_cast %47 : vector<1x128x128xbf16> to vector<128x128xbf16>
    %cst_27 = arith.constant dense<0.000000e+00> : vector<256x128xf32>
    %49 = tpu.matmul %46, %48, %cst_27 {dimension_numbers = #tpu.dot_dimension_numbers<[1], [0], [0], [1], [0, 0, 1, 1], [], []>} : vector<256x128xbf16>, vector<128x128xbf16>, vector<256x128xf32> -> vector<256x128xf32>
    %50 = arith.addf %44, %49 : vector<256x128xf32>
    %51 = vector.extract_strided_slice %1 {offsets = [2, 2, 0], sizes = [16, 16, 128], strides = [1, 1, 1]} : vector<18x18x128xbf16> to vector<16x16x128xbf16>
    %52 = vector.shape_cast %51 : vector<16x16x128xbf16> to vector<256x128xbf16>
    %c8 = arith.constant 8 : index
    %c0_28 = arith.constant 0 : index
    %c0_29 = arith.constant 0 : index
    %53 = vector.load %arg2[%c8, %c0_28, %c0_29] : memref<9x128x128xbf16, #tpu.memory_space<vmem>>, vector<1x128x128xbf16>
    %54 = vector.shape_cast %53 : vector<1x128x128xbf16> to vector<128x128xbf16>
    %cst_30 = arith.constant dense<0.000000e+00> : vector<256x128xf32>
    %55 = tpu.matmul %52, %54, %cst_30 {dimension_numbers = #tpu.dot_dimension_numbers<[1], [0], [0], [1], [0, 0, 1, 1], [], []>} : vector<256x128xbf16>, vector<128x128xbf16>, vector<256x128xf32> -> vector<256x128xf32>
    %56 = arith.addf %50, %55 : vector<256x128xf32>
    %c0_31 = arith.constant 0 : index
    %c0_32 = arith.constant 0 : index
    %c0_33 = arith.constant 0 : index
    %57 = vector.load %arg5[%c0_31, %c0_32, %c0_33] : memref<1x256x128xf32, #tpu.memory_space<vmem>>, vector<1x256x128xf32>
    %58 = vector.shape_cast %57 : vector<1x256x128xf32> to vector<256x128xf32>
    %59 = vector.shape_cast %56 : vector<256x128xf32> to vector<1x256x128xf32>
    tpu.vector_store %arg5[%c0_31, %c0_32, %c0_33], %59 {strides = array<i32>} : memref<1x256x128xf32, #tpu.memory_space<vmem>>, vector<1x256x128xf32>,
    %cst_34 = arith.constant dense<0.000000e+00> : vector<128xf32>
    %60 = vector.multi_reduction <add>, %56, %cst_34 [0] : vector<256x128xf32> to vector<128xf32>
    %61 = vector.shape_cast %60 : vector<128xf32> to vector<1x128xf32>
    %c0_35 = arith.constant 0 : index
    %c0_36 = arith.constant 0 : index
    %c0_37 = arith.constant 0 : index
    %62 = vector.load %arg6[%c0_35, %c0_36, %c0_37] : memref<1x1x128xf32, #tpu.memory_space<vmem>>, vector<1x1x128xf32>
    %63 = vector.shape_cast %62 : vector<1x1x128xf32> to vector<1x128xf32>
    %64 = vector.shape_cast %61 : vector<1x128xf32> to vector<1x1x128xf32>
    tpu.vector_store %arg6[%c0_35, %c0_36, %c0_37], %64 {strides = array<i32>} : memref<1x1x128xf32, #tpu.memory_space<vmem>>, vector<1x1x128xf32>,
    %65 = arith.mulf %56, %56 : vector<256x128xf32>
    %cst_38 = arith.constant dense<0.000000e+00> : vector<128xf32>
    %66 = vector.multi_reduction <add>, %65, %cst_38 [0] : vector<256x128xf32> to vector<128xf32>
    %67 = vector.shape_cast %66 : vector<128xf32> to vector<1x128xf32>
    %c0_39 = arith.constant 0 : index
    %c0_40 = arith.constant 0 : index
    %c0_41 = arith.constant 0 : index
    %68 = vector.load %arg7[%c0_39, %c0_40, %c0_41] : memref<1x1x128xf32, #tpu.memory_space<vmem>>, vector<1x1x128xf32>
    %69 = vector.shape_cast %68 : vector<1x1x128xf32> to vector<1x128xf32>
    %70 = vector.shape_cast %67 : vector<1x128xf32> to vector<1x1x128xf32>
    tpu.vector_store %arg7[%c0_39, %c0_40, %c0_41], %70 {strides = array<i32>} : memref<1x1x128xf32, #tpu.memory_space<vmem>>, vector<1x1x128xf32>,
    return
  }
  func.func @transform_0(%arg0: i32) -> (i32, i32, i32, i32) {
    %c0_i32 = arith.constant 0 : i32
    %c0_i32_0 = arith.constant 0 : i32
    %c0_i32_1 = arith.constant 0 : i32
    %c0_i32_2 = arith.constant 0 : i32
    return %arg0, %c0_i32, %c0_i32_0, %c0_i32_1 : i32, i32, i32, i32
  }
  func.func @transform_1(%arg0: i32) -> (i32, i32, i32) {
    %c0_i32 = arith.constant 0 : i32
    %c0_i32_0 = arith.constant 0 : i32
    %c0_i32_1 = arith.constant 0 : i32
    %c0_i32_2 = arith.constant 0 : i32
    return %c0_i32, %c0_i32_0, %c0_i32_1 : i32, i32, i32
  }
  func.func @transform_2(%arg0: i32) -> (i32, i32) {
    %c0_i32 = arith.constant 0 : i32
    %c0_i32_0 = arith.constant 0 : i32
    %c0_i32_1 = arith.constant 0 : i32
    return %c0_i32, %c0_i32_0 : i32, i32
  }
  func.func @transform_3(%arg0: i32) -> (i32, i32) {
    %c0_i32 = arith.constant 0 : i32
    %c0_i32_0 = arith.constant 0 : i32
    %c0_i32_1 = arith.constant 0 : i32
    return %c0_i32, %c0_i32_0 : i32, i32
  }
  func.func @transform_4(%arg0: i32) -> (i32, i32, i32) {
    %c0_i32 = arith.constant 0 : i32
    %c0_i32_0 = arith.constant 0 : i32
    %c0_i32_1 = arith.constant 0 : i32
    return %arg0, %c0_i32, %c0_i32_0 : i32, i32, i32
  }
  func.func @transform_5(%arg0: i32) -> (i32, i32, i32) {
    %c0_i32 = arith.constant 0 : i32
    %c0_i32_0 = arith.constant 0 : i32
    %c0_i32_1 = arith.constant 0 : i32
    return %arg0, %c0_i32, %c0_i32_0 : i32, i32, i32
  }
  func.func @transform_6(%arg0: i32) -> (i32, i32, i32) {
    %c0_i32 = arith.constant 0 : i32
    %c0_i32_0 = arith.constant 0 : i32
    %c0_i32_1 = arith.constant 0 : i32
    return %arg0, %c0_i32, %c0_i32_0 : i32, i32, i32
  }
}

module attributes {stable_mosaic.version = 11 : i64} {
  func.func @_bn_relu_kernel(%arg0: i32, %arg1: memref<512x128xf32, #tpu.memory_space<vmem>>, %arg2: memref<1x128xf32, #tpu.memory_space<vmem>>, %arg3: memref<1x128xf32, #tpu.memory_space<vmem>>, %arg4: memref<512x128xf32, #tpu.memory_space<vmem>>) attributes {dimension_semantics = [#tpu.dimension_semantics<parallel>], iteration_bounds = array<i64: 1>, scalar_prefetch = 0 : i64, scratch_operands = 0 : i64, tpu.core_type = #tpu.core_type<tc>, window_params = [{transform_indices = @transform_0, window_bounds = array<i64: 512, 128>}, {pipeline_mode = #tpu.pipeline_mode<synchronous>, transform_indices = @transform_1, window_bounds = array<i64: 1, 128>}, {pipeline_mode = #tpu.pipeline_mode<synchronous>, transform_indices = @transform_2, window_bounds = array<i64: 1, 128>}, {transform_indices = @transform_3, window_bounds = array<i64: 512, 128>}]} {
    %c0 = arith.constant 0 : index
    %c0_0 = arith.constant 0 : index
    %0 = vector.load %arg1[%c0, %c0_0] : memref<512x128xf32, #tpu.memory_space<vmem>>, vector<512x128xf32>
    %c0_1 = arith.constant 0 : index
    %c0_2 = arith.constant 0 : index
    %1 = vector.load %arg2[%c0_1, %c0_2] : memref<1x128xf32, #tpu.memory_space<vmem>>, vector<1x128xf32>
    %2 = vector.broadcast %1 : vector<1x128xf32> to vector<512x128xf32>
    %3 = arith.mulf %0, %2 : vector<512x128xf32>
    %c0_3 = arith.constant 0 : index
    %c0_4 = arith.constant 0 : index
    %4 = vector.load %arg3[%c0_3, %c0_4] : memref<1x128xf32, #tpu.memory_space<vmem>>, vector<1x128xf32>
    %5 = vector.broadcast %4 : vector<1x128xf32> to vector<512x128xf32>
    %6 = arith.addf %3, %5 : vector<512x128xf32>
    %cst = arith.constant 0.000000e+00 : f32
    %7 = vector.broadcast %cst : f32 to vector<512x128xf32>
    %8 = arith.maximumf %6, %7 : vector<512x128xf32>
    %c0_5 = arith.constant 0 : index
    %c0_6 = arith.constant 0 : index
    %9 = vector.load %arg4[%c0_5, %c0_6] : memref<512x128xf32, #tpu.memory_space<vmem>>, vector<512x128xf32>
    tpu.vector_store %arg4[%c0_5, %c0_6], %8 {strides = array<i32>} : memref<512x128xf32, #tpu.memory_space<vmem>>, vector<512x128xf32>,
    return
  }
  func.func @transform_0(%arg0: i32) -> (i32, i32) {
    %c0_i32 = arith.constant 0 : i32
    %c0_i32_0 = arith.constant 0 : i32
    return %arg0, %c0_i32 : i32, i32
  }
  func.func @transform_1(%arg0: i32) -> (i32, i32) {
    %c0_i32 = arith.constant 0 : i32
    %c0_i32_0 = arith.constant 0 : i32
    %c0_i32_1 = arith.constant 0 : i32
    return %c0_i32, %c0_i32_0 : i32, i32
  }
  func.func @transform_2(%arg0: i32) -> (i32, i32) {
    %c0_i32 = arith.constant 0 : i32
    %c0_i32_0 = arith.constant 0 : i32
    %c0_i32_1 = arith.constant 0 : i32
    return %c0_i32, %c0_i32_0 : i32, i32
  }
  func.func @transform_3(%arg0: i32) -> (i32, i32) {
    %c0_i32 = arith.constant 0 : i32
    %c0_i32_0 = arith.constant 0 : i32
    return %arg0, %c0_i32 : i32, i32
  }
}

module attributes {stable_mosaic.version = 11 : i64} {
  func.func @_conv_stats_kernel(%arg0: i32, %arg1: memref<1x18x18x128xf32, #tpu.memory_space<vmem>>, %arg2: memref<9x128x128xbf16, #tpu.memory_space<vmem>>, %arg3: memref<1x128xf32, #tpu.memory_space<vmem>>, %arg4: memref<1x128xf32, #tpu.memory_space<vmem>>, %arg5: memref<1x256x128xf32, #tpu.memory_space<vmem>>, %arg6: memref<1x1x128xf32, #tpu.memory_space<vmem>>, %arg7: memref<1x1x128xf32, #tpu.memory_space<vmem>>) attributes {dimension_semantics = [#tpu.dimension_semantics<parallel>], iteration_bounds = array<i64: 2>, scalar_prefetch = 0 : i64, scratch_operands = 0 : i64, tpu.core_type = #tpu.core_type<tc>, window_params = [{transform_indices = @transform_0, window_bounds = array<i64: 1, 18, 18, 128>}, {pipeline_mode = #tpu.pipeline_mode<synchronous>, transform_indices = @transform_1, window_bounds = array<i64: 9, 128, 128>}, {pipeline_mode = #tpu.pipeline_mode<synchronous>, transform_indices = @transform_2, window_bounds = array<i64: 1, 128>}, {pipeline_mode = #tpu.pipeline_mode<synchronous>, transform_indices = @transform_3, window_bounds = array<i64: 1, 128>}, {transform_indices = @transform_4, window_bounds = array<i64: 1, 256, 128>}, {transform_indices = @transform_5, window_bounds = array<i64: 1, 1, 128>}, {transform_indices = @transform_6, window_bounds = array<i64: 1, 1, 128>}]} {
    %c0 = arith.constant 0 : index
    %c0_0 = arith.constant 0 : index
    %c0_1 = arith.constant 0 : index
    %c0_2 = arith.constant 0 : index
    %0 = vector.load %arg1[%c0, %c0_0, %c0_1, %c0_2] : memref<1x18x18x128xf32, #tpu.memory_space<vmem>>, vector<1x18x18x128xf32>
    %1 = vector.shape_cast %0 : vector<1x18x18x128xf32> to vector<18x18x128xf32>
    %c0_3 = arith.constant 0 : index
    %c0_4 = arith.constant 0 : index
    %2 = vector.load %arg3[%c0_3, %c0_4] : memref<1x128xf32, #tpu.memory_space<vmem>>, vector<1x128xf32>
    %3 = vector.shape_cast %2 : vector<1x128xf32> to vector<1x1x128xf32>
    %4 = vector.broadcast %3 : vector<1x1x128xf32> to vector<18x18x128xf32>
    %5 = arith.mulf %1, %4 : vector<18x18x128xf32>
    %c0_5 = arith.constant 0 : index
    %c0_6 = arith.constant 0 : index
    %6 = vector.load %arg4[%c0_5, %c0_6] : memref<1x128xf32, #tpu.memory_space<vmem>>, vector<1x128xf32>
    %7 = vector.shape_cast %6 : vector<1x128xf32> to vector<1x1x128xf32>
    %8 = vector.broadcast %7 : vector<1x1x128xf32> to vector<18x18x128xf32>
    %9 = arith.addf %5, %8 : vector<18x18x128xf32>
    %cst = arith.constant 0.000000e+00 : f32
    %10 = vector.broadcast %cst : f32 to vector<18x18x128xf32>
    %11 = arith.maximumf %9, %10 : vector<18x18x128xf32>
    %12 = tpu.iota {dimensions = array<i32: 0>} : vector<18x18x128xi32>
    %13 = tpu.iota {dimensions = array<i32: 1>} : vector<18x18x128xi32>
    %c1_i32 = arith.constant 1 : i32
    %14 = vector.broadcast %c1_i32 : i32 to vector<18x18x128xi32>
    %15 = arith.cmpi sge, %12, %14 : vector<18x18x128xi32>
    %c16_i32 = arith.constant 16 : i32
    %16 = vector.broadcast %c16_i32 : i32 to vector<18x18x128xi32>
    %17 = arith.cmpi sle, %12, %16 : vector<18x18x128xi32>
    %18 = arith.andi %15, %17 : vector<18x18x128xi1>
    %c1_i32_7 = arith.constant 1 : i32
    %19 = vector.broadcast %c1_i32_7 : i32 to vector<18x18x128xi32>
    %20 = arith.cmpi sge, %13, %19 : vector<18x18x128xi32>
    %21 = arith.andi %18, %20 : vector<18x18x128xi1>
    %c16_i32_8 = arith.constant 16 : i32
    %22 = vector.broadcast %c16_i32_8 : i32 to vector<18x18x128xi32>
    %23 = arith.cmpi sle, %13, %22 : vector<18x18x128xi32>
    %24 = arith.andi %21, %23 : vector<18x18x128xi1>
    %cst_9 = arith.constant 0.000000e+00 : f32
    %25 = vector.broadcast %cst_9 : f32 to vector<18x18x128xf32>
    %26 = arith.select %24, %11, %25 : vector<18x18x128xi1>, vector<18x18x128xf32>
    %cst_10 = arith.constant 0.000000e+00 : f32
    %27 = vector.broadcast %cst_10 : f32 to vector<256x128xf32>
    %28 = vector.extract_strided_slice %26 {offsets = [0, 0, 0], sizes = [16, 16, 128], strides = [1, 1, 1]} : vector<18x18x128xf32> to vector<16x16x128xf32>
    %29 = vector.shape_cast %28 : vector<16x16x128xf32> to vector<256x128xf32>
    %30 = arith.truncf %29 : vector<256x128xf32> to vector<256x128xbf16>
    %c0_11 = arith.constant 0 : index
    %c0_12 = arith.constant 0 : index
    %c0_13 = arith.constant 0 : index
    %31 = vector.load %arg2[%c0_11, %c0_12, %c0_13] : memref<9x128x128xbf16, #tpu.memory_space<vmem>>, vector<1x128x128xbf16>
    %32 = vector.shape_cast %31 : vector<1x128x128xbf16> to vector<128x128xbf16>
    %cst_14 = arith.constant dense<0.000000e+00> : vector<256x128xf32>
    %33 = tpu.matmul %30, %32, %cst_14 {dimension_numbers = #tpu.dot_dimension_numbers<[1], [0], [0], [1], [0, 0, 1, 1], [], []>} : vector<256x128xbf16>, vector<128x128xbf16>, vector<256x128xf32> -> vector<256x128xf32>
    %34 = arith.addf %27, %33 : vector<256x128xf32>
    %35 = vector.extract_strided_slice %26 {offsets = [0, 1, 0], sizes = [16, 16, 128], strides = [1, 1, 1]} : vector<18x18x128xf32> to vector<16x16x128xf32>
    %36 = vector.shape_cast %35 : vector<16x16x128xf32> to vector<256x128xf32>
    %37 = arith.truncf %36 : vector<256x128xf32> to vector<256x128xbf16>
    %c1 = arith.constant 1 : index
    %c0_15 = arith.constant 0 : index
    %c0_16 = arith.constant 0 : index
    %38 = vector.load %arg2[%c1, %c0_15, %c0_16] : memref<9x128x128xbf16, #tpu.memory_space<vmem>>, vector<1x128x128xbf16>
    %39 = vector.shape_cast %38 : vector<1x128x128xbf16> to vector<128x128xbf16>
    %cst_17 = arith.constant dense<0.000000e+00> : vector<256x128xf32>
    %40 = tpu.matmul %37, %39, %cst_17 {dimension_numbers = #tpu.dot_dimension_numbers<[1], [0], [0], [1], [0, 0, 1, 1], [], []>} : vector<256x128xbf16>, vector<128x128xbf16>, vector<256x128xf32> -> vector<256x128xf32>
    %41 = arith.addf %34, %40 : vector<256x128xf32>
    %42 = vector.extract_strided_slice %26 {offsets = [0, 2, 0], sizes = [16, 16, 128], strides = [1, 1, 1]} : vector<18x18x128xf32> to vector<16x16x128xf32>
    %43 = vector.shape_cast %42 : vector<16x16x128xf32> to vector<256x128xf32>
    %44 = arith.truncf %43 : vector<256x128xf32> to vector<256x128xbf16>
    %c2 = arith.constant 2 : index
    %c0_18 = arith.constant 0 : index
    %c0_19 = arith.constant 0 : index
    %45 = vector.load %arg2[%c2, %c0_18, %c0_19] : memref<9x128x128xbf16, #tpu.memory_space<vmem>>, vector<1x128x128xbf16>
    %46 = vector.shape_cast %45 : vector<1x128x128xbf16> to vector<128x128xbf16>
    %cst_20 = arith.constant dense<0.000000e+00> : vector<256x128xf32>
    %47 = tpu.matmul %44, %46, %cst_20 {dimension_numbers = #tpu.dot_dimension_numbers<[1], [0], [0], [1], [0, 0, 1, 1], [], []>} : vector<256x128xbf16>, vector<128x128xbf16>, vector<256x128xf32> -> vector<256x128xf32>
    %48 = arith.addf %41, %47 : vector<256x128xf32>
    %49 = vector.extract_strided_slice %26 {offsets = [1, 0, 0], sizes = [16, 16, 128], strides = [1, 1, 1]} : vector<18x18x128xf32> to vector<16x16x128xf32>
    %50 = vector.shape_cast %49 : vector<16x16x128xf32> to vector<256x128xf32>
    %51 = arith.truncf %50 : vector<256x128xf32> to vector<256x128xbf16>
    %c3 = arith.constant 3 : index
    %c0_21 = arith.constant 0 : index
    %c0_22 = arith.constant 0 : index
    %52 = vector.load %arg2[%c3, %c0_21, %c0_22] : memref<9x128x128xbf16, #tpu.memory_space<vmem>>, vector<1x128x128xbf16>
    %53 = vector.shape_cast %52 : vector<1x128x128xbf16> to vector<128x128xbf16>
    %cst_23 = arith.constant dense<0.000000e+00> : vector<256x128xf32>
    %54 = tpu.matmul %51, %53, %cst_23 {dimension_numbers = #tpu.dot_dimension_numbers<[1], [0], [0], [1], [0, 0, 1, 1], [], []>} : vector<256x128xbf16>, vector<128x128xbf16>, vector<256x128xf32> -> vector<256x128xf32>
    %55 = arith.addf %48, %54 : vector<256x128xf32>
    %56 = vector.extract_strided_slice %26 {offsets = [1, 1, 0], sizes = [16, 16, 128], strides = [1, 1, 1]} : vector<18x18x128xf32> to vector<16x16x128xf32>
    %57 = vector.shape_cast %56 : vector<16x16x128xf32> to vector<256x128xf32>
    %58 = arith.truncf %57 : vector<256x128xf32> to vector<256x128xbf16>
    %c4 = arith.constant 4 : index
    %c0_24 = arith.constant 0 : index
    %c0_25 = arith.constant 0 : index
    %59 = vector.load %arg2[%c4, %c0_24, %c0_25] : memref<9x128x128xbf16, #tpu.memory_space<vmem>>, vector<1x128x128xbf16>
    %60 = vector.shape_cast %59 : vector<1x128x128xbf16> to vector<128x128xbf16>
    %cst_26 = arith.constant dense<0.000000e+00> : vector<256x128xf32>
    %61 = tpu.matmul %58, %60, %cst_26 {dimension_numbers = #tpu.dot_dimension_numbers<[1], [0], [0], [1], [0, 0, 1, 1], [], []>} : vector<256x128xbf16>, vector<128x128xbf16>, vector<256x128xf32> -> vector<256x128xf32>
    %62 = arith.addf %55, %61 : vector<256x128xf32>
    %63 = vector.extract_strided_slice %26 {offsets = [1, 2, 0], sizes = [16, 16, 128], strides = [1, 1, 1]} : vector<18x18x128xf32> to vector<16x16x128xf32>
    %64 = vector.shape_cast %63 : vector<16x16x128xf32> to vector<256x128xf32>
    %65 = arith.truncf %64 : vector<256x128xf32> to vector<256x128xbf16>
    %c5 = arith.constant 5 : index
    %c0_27 = arith.constant 0 : index
    %c0_28 = arith.constant 0 : index
    %66 = vector.load %arg2[%c5, %c0_27, %c0_28] : memref<9x128x128xbf16, #tpu.memory_space<vmem>>, vector<1x128x128xbf16>
    %67 = vector.shape_cast %66 : vector<1x128x128xbf16> to vector<128x128xbf16>
    %cst_29 = arith.constant dense<0.000000e+00> : vector<256x128xf32>
    %68 = tpu.matmul %65, %67, %cst_29 {dimension_numbers = #tpu.dot_dimension_numbers<[1], [0], [0], [1], [0, 0, 1, 1], [], []>} : vector<256x128xbf16>, vector<128x128xbf16>, vector<256x128xf32> -> vector<256x128xf32>
    %69 = arith.addf %62, %68 : vector<256x128xf32>
    %70 = vector.extract_strided_slice %26 {offsets = [2, 0, 0], sizes = [16, 16, 128], strides = [1, 1, 1]} : vector<18x18x128xf32> to vector<16x16x128xf32>
    %71 = vector.shape_cast %70 : vector<16x16x128xf32> to vector<256x128xf32>
    %72 = arith.truncf %71 : vector<256x128xf32> to vector<256x128xbf16>
    %c6 = arith.constant 6 : index
    %c0_30 = arith.constant 0 : index
    %c0_31 = arith.constant 0 : index
    %73 = vector.load %arg2[%c6, %c0_30, %c0_31] : memref<9x128x128xbf16, #tpu.memory_space<vmem>>, vector<1x128x128xbf16>
    %74 = vector.shape_cast %73 : vector<1x128x128xbf16> to vector<128x128xbf16>
    %cst_32 = arith.constant dense<0.000000e+00> : vector<256x128xf32>
    %75 = tpu.matmul %72, %74, %cst_32 {dimension_numbers = #tpu.dot_dimension_numbers<[1], [0], [0], [1], [0, 0, 1, 1], [], []>} : vector<256x128xbf16>, vector<128x128xbf16>, vector<256x128xf32> -> vector<256x128xf32>
    %76 = arith.addf %69, %75 : vector<256x128xf32>
    %77 = vector.extract_strided_slice %26 {offsets = [2, 1, 0], sizes = [16, 16, 128], strides = [1, 1, 1]} : vector<18x18x128xf32> to vector<16x16x128xf32>
    %78 = vector.shape_cast %77 : vector<16x16x128xf32> to vector<256x128xf32>
    %79 = arith.truncf %78 : vector<256x128xf32> to vector<256x128xbf16>
    %c7 = arith.constant 7 : index
    %c0_33 = arith.constant 0 : index
    %c0_34 = arith.constant 0 : index
    %80 = vector.load %arg2[%c7, %c0_33, %c0_34] : memref<9x128x128xbf16, #tpu.memory_space<vmem>>, vector<1x128x128xbf16>
    %81 = vector.shape_cast %80 : vector<1x128x128xbf16> to vector<128x128xbf16>
    %cst_35 = arith.constant dense<0.000000e+00> : vector<256x128xf32>
    %82 = tpu.matmul %79, %81, %cst_35 {dimension_numbers = #tpu.dot_dimension_numbers<[1], [0], [0], [1], [0, 0, 1, 1], [], []>} : vector<256x128xbf16>, vector<128x128xbf16>, vector<256x128xf32> -> vector<256x128xf32>
    %83 = arith.addf %76, %82 : vector<256x128xf32>
    %84 = vector.extract_strided_slice %26 {offsets = [2, 2, 0], sizes = [16, 16, 128], strides = [1, 1, 1]} : vector<18x18x128xf32> to vector<16x16x128xf32>
    %85 = vector.shape_cast %84 : vector<16x16x128xf32> to vector<256x128xf32>
    %86 = arith.truncf %85 : vector<256x128xf32> to vector<256x128xbf16>
    %c8 = arith.constant 8 : index
    %c0_36 = arith.constant 0 : index
    %c0_37 = arith.constant 0 : index
    %87 = vector.load %arg2[%c8, %c0_36, %c0_37] : memref<9x128x128xbf16, #tpu.memory_space<vmem>>, vector<1x128x128xbf16>
    %88 = vector.shape_cast %87 : vector<1x128x128xbf16> to vector<128x128xbf16>
    %cst_38 = arith.constant dense<0.000000e+00> : vector<256x128xf32>
    %89 = tpu.matmul %86, %88, %cst_38 {dimension_numbers = #tpu.dot_dimension_numbers<[1], [0], [0], [1], [0, 0, 1, 1], [], []>} : vector<256x128xbf16>, vector<128x128xbf16>, vector<256x128xf32> -> vector<256x128xf32>
    %90 = arith.addf %83, %89 : vector<256x128xf32>
    %c0_39 = arith.constant 0 : index
    %c0_40 = arith.constant 0 : index
    %c0_41 = arith.constant 0 : index
    %91 = vector.load %arg5[%c0_39, %c0_40, %c0_41] : memref<1x256x128xf32, #tpu.memory_space<vmem>>, vector<1x256x128xf32>
    %92 = vector.shape_cast %91 : vector<1x256x128xf32> to vector<256x128xf32>
    %93 = vector.shape_cast %90 : vector<256x128xf32> to vector<1x256x128xf32>
    tpu.vector_store %arg5[%c0_39, %c0_40, %c0_41], %93 {strides = array<i32>} : memref<1x256x128xf32, #tpu.memory_space<vmem>>, vector<1x256x128xf32>,
    %cst_42 = arith.constant dense<0.000000e+00> : vector<128xf32>
    %94 = vector.multi_reduction <add>, %90, %cst_42 [0] : vector<256x128xf32> to vector<128xf32>
    %95 = vector.shape_cast %94 : vector<128xf32> to vector<1x128xf32>
    %c0_43 = arith.constant 0 : index
    %c0_44 = arith.constant 0 : index
    %c0_45 = arith.constant 0 : index
    %96 = vector.load %arg6[%c0_43, %c0_44, %c0_45] : memref<1x1x128xf32, #tpu.memory_space<vmem>>, vector<1x1x128xf32>
    %97 = vector.shape_cast %96 : vector<1x1x128xf32> to vector<1x128xf32>
    %98 = vector.shape_cast %95 : vector<1x128xf32> to vector<1x1x128xf32>
    tpu.vector_store %arg6[%c0_43, %c0_44, %c0_45], %98 {strides = array<i32>} : memref<1x1x128xf32, #tpu.memory_space<vmem>>, vector<1x1x128xf32>,
    %99 = arith.mulf %90, %90 : vector<256x128xf32>
    %cst_46 = arith.constant dense<0.000000e+00> : vector<128xf32>
    %100 = vector.multi_reduction <add>, %99, %cst_46 [0] : vector<256x128xf32> to vector<128xf32>
    %101 = vector.shape_cast %100 : vector<128xf32> to vector<1x128xf32>
    %c0_47 = arith.constant 0 : index
    %c0_48 = arith.constant 0 : index
    %c0_49 = arith.constant 0 : index
    %102 = vector.load %arg7[%c0_47, %c0_48, %c0_49] : memref<1x1x128xf32, #tpu.memory_space<vmem>>, vector<1x1x128xf32>
    %103 = vector.shape_cast %102 : vector<1x1x128xf32> to vector<1x128xf32>
    %104 = vector.shape_cast %101 : vector<1x128xf32> to vector<1x1x128xf32>
    tpu.vector_store %arg7[%c0_47, %c0_48, %c0_49], %104 {strides = array<i32>} : memref<1x1x128xf32, #tpu.memory_space<vmem>>, vector<1x1x128xf32>,
    return
  }
  func.func @transform_0(%arg0: i32) -> (i32, i32, i32, i32) {
    %c0_i32 = arith.constant 0 : i32
    %c0_i32_0 = arith.constant 0 : i32
    %c0_i32_1 = arith.constant 0 : i32
    %c0_i32_2 = arith.constant 0 : i32
    return %arg0, %c0_i32, %c0_i32_0, %c0_i32_1 : i32, i32, i32, i32
  }
  func.func @transform_1(%arg0: i32) -> (i32, i32, i32) {
    %c0_i32 = arith.constant 0 : i32
    %c0_i32_0 = arith.constant 0 : i32
    %c0_i32_1 = arith.constant 0 : i32
    %c0_i32_2 = arith.constant 0 : i32
    return %c0_i32, %c0_i32_0, %c0_i32_1 : i32, i32, i32
  }
  func.func @transform_2(%arg0: i32) -> (i32, i32) {
    %c0_i32 = arith.constant 0 : i32
    %c0_i32_0 = arith.constant 0 : i32
    %c0_i32_1 = arith.constant 0 : i32
    return %c0_i32, %c0_i32_0 : i32, i32
  }
  func.func @transform_3(%arg0: i32) -> (i32, i32) {
    %c0_i32 = arith.constant 0 : i32
    %c0_i32_0 = arith.constant 0 : i32
    %c0_i32_1 = arith.constant 0 : i32
    return %c0_i32, %c0_i32_0 : i32, i32
  }
  func.func @transform_4(%arg0: i32) -> (i32, i32, i32) {
    %c0_i32 = arith.constant 0 : i32
    %c0_i32_0 = arith.constant 0 : i32
    %c0_i32_1 = arith.constant 0 : i32
    return %arg0, %c0_i32, %c0_i32_0 : i32, i32, i32
  }
  func.func @transform_5(%arg0: i32) -> (i32, i32, i32) {
    %c0_i32 = arith.constant 0 : i32
    %c0_i32_0 = arith.constant 0 : i32
    %c0_i32_1 = arith.constant 0 : i32
    return %arg0, %c0_i32, %c0_i32_0 : i32, i32, i32
  }
  func.func @transform_6(%arg0: i32) -> (i32, i32, i32) {
    %c0_i32 = arith.constant 0 : i32
    %c0_i32_0 = arith.constant 0 : i32
    %c0_i32_1 = arith.constant 0 : i32
    return %arg0, %c0_i32, %c0_i32_0 : i32, i32, i32
  }
}

</mosaic_0001>

<bundles_post_ra>
// kernel: double_conv.5
= control target key start
LH: loop header
LB: loop body
LE: loop exit
PB: predicated region body
PF: predicated region fallthrough
CT: control target
= control target key end

     0   :  { %s893_s0 = inlined_call_operand.vmem [shape: f32[512,128], index: 0, kind: input, shape index: {}]   ;;  %s894_s1 = inlined_call_operand.vmem [shape: f32[1,128], index: 1, kind: input, shape index: {}]   ;;  %s895_s2 = inlined_call_operand.vmem [shape: f32[1,128], index: 2, kind: input, shape index: {}]   ;;  %s896_s3 = inlined_call_operand.vmem [shape: f32[512,128], index: 3, kind: output, shape index: {}]  }
   0x1   :  { %v14_v0 = vld [vmem:[%s893_s0] sm:$0xff]  ;;  %v15_v3 = vld [vmem:[%s893_s0 + $0x8] sm:$0xff]  ;;  %v16_v6 = vld [vmem:[%s893_s0 + $0x10] sm:$0xff] }
   0x2   :  { %v374_v1 = vld [vmem:[%s894_s1] ss:$0 sm:$0xff]  ;;  %v17_v7 = vld [vmem:[%s893_s0 + $0x18] sm:$0xff]  ;;  %v19_v12 = vld [vmem:[%s893_s0 + $0x28] sm:$0xff] }
   0x3   :  { %v379_v2 = vld [vmem:[%s895_s2] ss:$0 sm:$0xff]  ;;  %v82_v4 = vmul.f32 %v374_v1, %v14_v0  ;;  %v83_v5 = vmul.f32 %v374_v1, %v15_v3  ;;  %v84_v9 = vmul.f32 %v374_v1, %v16_v6  ;;  %v85_v10 = vmul.f32 %v374_v1, %v17_v7  ;;  %v20_v13 = vld [vmem:[%s893_s0 + $0x30] sm:$0xff]  ;;  %v21_v14 = vld [vmem:[%s893_s0 + $0x38] sm:$0xff] }
   0x4   :  { %v18_v8 = vld [vmem:[%s893_s0 + $0x20] sm:$0xff]  ;;  %v87_v17 = vmul.f32 %v374_v1, %v19_v12  ;;  %v88_v18 = vmul.f32 %v374_v1, %v20_v13  ;;  %v89_v22 = vmul.f32 %v374_v1, %v21_v14  ;;  %v23_v24 = vld [vmem:[%s893_s0 + $0x48] sm:$0xff]  ;;  %v24_v29 = vld [vmem:[%s893_s0 + $0x50] sm:$0xff] }
   0x5   :  { %v86_v11 = vmul.f32 %v374_v1, %v18_v8  ;;  %v150_v15 = vadd.f32 %v379_v2, %v82_v4  ;;  %v151_v16 = vadd.f32 %v379_v2, %v83_v5  ;;  %v152_v19 = vadd.f32 %v379_v2, %v84_v9  ;;  %v22_v23 = vld [vmem:[%s893_s0 + $0x40] sm:$0xff]  ;;  %v25_v30 = vld [vmem:[%s893_s0 + $0x58] sm:$0xff]  ;;  %v27_v35 = vld [vmem:[%s893_s0 + $0x68] sm:$0xff] }
   0x6   :  { %v153_v20 = vadd.f32 %v379_v2, %v85_v10  ;;  %v155_v27 = vadd.f32 %v379_v2, %v87_v17  ;;  %v156_v28 = vadd.f32 %v379_v2, %v88_v18  ;;  %v26_v31 = vld [vmem:[%s893_s0 + $0x60] sm:$0xff]  ;;  %v157_v34 = vadd.f32 %v379_v2, %v89_v22  ;;  %v28_v36 = vld [vmem:[%s893_s0 + $0x70] sm:$0xff]  ;;  %v29_v41 = vld [vmem:[%s893_s0 + $0x78] sm:$0xff] }
   0x7   :  { %v154_v21 = vadd.f32 %v379_v2, %v86_v11  ;;  %v214_v25 = vmax.f32 %v150_v15, 0.0  ;;  %v215_v26 = vmax.f32 %v151_v16, 0.0  ;;  %v216_v32 = vmax.f32 %v152_v19, 0.0  ;;  %v30_v54 = vld [vmem:[%s893_s0 + $0x80] sm:$0xff]  ;;  %v31_v55 = vld [vmem:[%s893_s0 + $0x88] sm:$0xff]  ;;  %v32_v58 = vld [vmem:[%s893_s0 + $0x90] sm:$0xff] }
   0x8   :  { %v217_v33 = vmax.f32 %v153_v20, 0.0  ;;  %v219_v38 = vmax.f32 %v155_v27, 0.0  ;;  %v90_v39 = vmul.f32 %v374_v1, %v22_v23  ;;  %v91_v40 = vmul.f32 %v374_v1, %v23_v24  ;;  %v33_v59 = vld [vmem:[%s893_s0 + $0x98] sm:$0xff]  ;;  %v34_v62 = vld [vmem:[%s893_s0 + $0xa0] sm:$0xff]  ;;  %v35_v5 = vld [vmem:[%s893_s0 + $0xa8] sm:$0xff] }
   0x9   :  { %278 = vst [vmem:[%s896_s3] sm:$0xff] %v214_v25  ;;  %v218_v37 = vmax.f32 %v154_v21, 0.0  ;;  %v220_v42 = vmax.f32 %v156_v28, 0.0  ;;  %v92_v43 = vmul.f32 %v374_v1, %v24_v29  ;;  %v93_v44 = vmul.f32 %v374_v1, %v25_v30  ;;  %v36_v10 = vld [vmem:[%s893_s0 + $0xb0] sm:$0xff]  ;;  %v37_v14 = vld [vmem:[%s893_s0 + $0xb8] sm:$0xff]  ;;  %v38_v18 = vld [vmem:[%s893_s0 + $0xc0] sm:$0xff] }
   0xa   :  { %279 = vst [vmem:[%s896_s3 + $0x8] sm:$0xff] %v215_v26  ;;  %v94_v45 = vmul.f32 %v374_v1, %v26_v31  ;;  %v158_v46 = vadd.f32 %v379_v2, %v90_v39  ;;  %v159_v47 = vadd.f32 %v379_v2, %v91_v40  ;;  %v95_v48 = vmul.f32 %v374_v1, %v27_v35  ;;  %v39_v22 = vld [vmem:[%s893_s0 + $0xc8] sm:$0xff]  ;;  %v40_v26 = vld [vmem:[%s893_s0 + $0xd0] sm:$0xff]  ;;  %v41_v30 = vld [vmem:[%s893_s0 + $0xd8] sm:$0xff] }
   0xb   :  { %280 = vst [vmem:[%s896_s3 + $0x10] sm:$0xff] %v216_v32  ;;  %v96_v49 = vmul.f32 %v374_v1, %v28_v36  ;;  %v221_v50 = vmax.f32 %v157_v34, 0.0  ;;  %v160_v51 = vadd.f32 %v379_v2, %v92_v43  ;;  %v161_v52 = vadd.f32 %v379_v2, %v93_v44  ;;  %v42_v34 = vld [vmem:[%s893_s0 + $0xe0] sm:$0xff] }
   0xc   :  { %281 = vst [vmem:[%s896_s3 + $0x18] sm:$0xff] %v217_v33  ;;  %v97_v53 = vmul.f32 %v374_v1, %v29_v41  ;;  %v222_v56 = vmax.f32 %v158_v46, 0.0  ;;  %v162_v57 = vadd.f32 %v379_v2, %v94_v45  ;;  %v223_v60 = vmax.f32 %v159_v47, 0.0  ;;  %v45_v46 = vld [vmem:[%s893_s0 + $0xf8] sm:$0xff] }
   0xd   :  { %282 = vst [vmem:[%s896_s3 + $0x20] sm:$0xff] %v218_v37  ;;  %v163_v61 = vadd.f32 %v379_v2, %v95_v48  ;;  %v224_v63 = vmax.f32 %v160_v51, 0.0  ;;  %v164_v0 = vadd.f32 %v379_v2, %v96_v49  ;;  %v98_v3 = vmul.f32 %v374_v1, %v30_v54  ;;  %v47_v54 = vld [vmem:[%s893_s0 + $0x108] sm:$0xff] }
   0xe   :  { %283 = vst [vmem:[%s896_s3 + $0x28] sm:$0xff] %v219_v38  ;;  %v99_v4 = vmul.f32 %v374_v1, %v31_v55  ;;  %v225_v6 = vmax.f32 %v161_v52, 0.0  ;;  %v165_v7 = vadd.f32 %v379_v2, %v97_v53  ;;  %v100_v8 = vmul.f32 %v374_v1, %v32_v58  ;;  %v43_v38 = vld [vmem:[%s893_s0 + $0xe8] sm:$0xff]  ;;  %v48_v58 = vld [vmem:[%s893_s0 + $0x110] sm:$0xff] }
   0xf   :  { %284 = vst [vmem:[%s896_s3 + $0x30] sm:$0xff] %v220_v42  ;;  %v101_v9 = vmul.f32 %v374_v1, %v33_v59  ;;  %v226_v11 = vmax.f32 %v162_v57, 0.0  ;;  %v166_v12 = vadd.f32 %v379_v2, %v98_v3  ;;  %v102_v13 = vmul.f32 %v374_v1, %v34_v62  ;;  %v44_v42 = vld [vmem:[%s893_s0 + $0xf0] sm:$0xff]  ;;  %v49_v62 = vld [vmem:[%s893_s0 + $0x118] sm:$0xff] }
  0x10   :  { %285 = vst [vmem:[%s896_s3 + $0x38] sm:$0xff] %v221_v50  ;;  %v227_v15 = vmax.f32 %v163_v61, 0.0  ;;  %v167_v16 = vadd.f32 %v379_v2, %v99_v4  ;;  %v103_v17 = vmul.f32 %v374_v1, %v35_v5  ;;  %v228_v19 = vmax.f32 %v164_v0, 0.0  ;;  %v46_v50 = vld [vmem:[%s893_s0 + $0x100] sm:$0xff] }
  0x11   :  { %286 = vst [vmem:[%s896_s3 + $0x40] sm:$0xff] %v222_v56  ;;  %v168_v20 = vadd.f32 %v379_v2, %v100_v8  ;;  %v104_v21 = vmul.f32 %v374_v1, %v36_v10  ;;  %v229_v23 = vmax.f32 %v165_v7, 0.0  ;;  %v169_v24 = vadd.f32 %v379_v2, %v101_v9  ;;  %v50_v4 = vld [vmem:[%s893_s0 + $0x120] sm:$0xff]  ;;  %v51_v8 = vld [vmem:[%s893_s0 + $0x128] sm:$0xff] }
  0x12   :  { %287 = vst [vmem:[%s896_s3 + $0x48] sm:$0xff] %v223_v60  ;;  %v105_v25 = vmul.f32 %v374_v1, %v37_v14  ;;  %v230_v27 = vmax.f32 %v166_v12, 0.0  ;;  %v170_v28 = vadd.f32 %v379_v2, %v102_v13  ;;  %v106_v29 = vmul.f32 %v374_v1, %v38_v18  ;;  %v52_v12 = vld [vmem:[%s893_s0 + $0x130] sm:$0xff] }
  0x13   :  { %288 = vst [vmem:[%s896_s3 + $0x50] sm:$0xff] %v224_v63  ;;  %v231_v31 = vmax.f32 %v167_v16, 0.0  ;;  %v171_v32 = vadd.f32 %v379_v2, %v103_v17  ;;  %v107_v33 = vmul.f32 %v374_v1, %v39_v22  ;;  %v232_v35 = vmax.f32 %v168_v20, 0.0  ;;  %v53_v16 = vld [vmem:[%s893_s0 + $0x138] sm:$0xff]  ;;  %v54_v20 = vld [vmem:[%s893_s0 + $0x140] sm:$0xff] }
  0x14   :  { %289 = vst [vmem:[%s896_s3 + $0x58] sm:$0xff] %v225_v6  ;;  %v172_v36 = vadd.f32 %v379_v2, %v104_v21  ;;  %v108_v37 = vmul.f32 %v374_v1, %v40_v26  ;;  %v233_v39 = vmax.f32 %v169_v24, 0.0  ;;  %v173_v40 = vadd.f32 %v379_v2, %v105_v25  ;;  %v55_v24 = vld [vmem:[%s893_s0 + $0x148] sm:$0xff] }
  0x15   :  { %290 = vst [vmem:[%s896_s3 + $0x60] sm:$0xff] %v226_v11  ;;  %v109_v41 = vmul.f32 %v374_v1, %v41_v30  ;;  %v234_v43 = vmax.f32 %v170_v28, 0.0  ;;  %v174_v44 = vadd.f32 %v379_v2, %v106_v29  ;;  %v110_v45 = vmul.f32 %v374_v1, %v42_v34  ;;  %v56_v28 = vld [vmem:[%s893_s0 + $0x150] sm:$0xff] }
  0x16   :  { %291 = vst [vmem:[%s896_s3 + $0x68] sm:$0xff] %v227_v15  ;;  %v235_v47 = vmax.f32 %v171_v32, 0.0  ;;  %v175_v48 = vadd.f32 %v379_v2, %v107_v33  ;;  %v111_v49 = vmul.f32 %v374_v1, %v43_v38  ;;  %v236_v51 = vmax.f32 %v172_v36, 0.0  ;;  %v57_v32 = vld [vmem:[%s893_s0 + $0x158] sm:$0xff]  ;;  %v58_v36 = vld [vmem:[%s893_s0 + $0x160] sm:$0xff] }
  0x17   :  { %292 = vst [vmem:[%s896_s3 + $0x70] sm:$0xff] %v228_v19  ;;  %v176_v52 = vadd.f32 %v379_v2, %v108_v37  ;;  %v112_v53 = vmul.f32 %v374_v1, %v44_v42  ;;  %v237_v55 = vmax.f32 %v173_v40, 0.0  ;;  %v177_v56 = vadd.f32 %v379_v2, %v109_v41  ;;  %v59_v40 = vld [vmem:[%s893_s0 + $0x168] sm:$0xff] }
  0x18   :  { %293 = vst [vmem:[%s896_s3 + $0x78] sm:$0xff] %v229_v23  ;;  %v113_v57 = vmul.f32 %v374_v1, %v45_v46  ;;  %v238_v59 = vmax.f32 %v174_v44, 0.0  ;;  %v178_v60 = vadd.f32 %v379_v2, %v110_v45  ;;  %v114_v61 = vmul.f32 %v374_v1, %v46_v50  ;;  %v60_v44 = vld [vmem:[%s893_s0 + $0x170] sm:$0xff] }
  0x19   :  { %294 = vst [vmem:[%s896_s3 + $0x80] sm:$0xff] %v230_v27  ;;  %v239_v63 = vmax.f32 %v175_v48, 0.0  ;;  %v179_v0 = vadd.f32 %v379_v2, %v111_v49  ;;  %v115_v3 = vmul.f32 %v374_v1, %v47_v54  ;;  %v240_v5 = vmax.f32 %v176_v52, 0.0  ;;  %v61_v48 = vld [vmem:[%s893_s0 + $0x178] sm:$0xff]  ;;  %v62_v52 = vld [vmem:[%s893_s0 + $0x180] sm:$0xff] }
  0x1a   :  { %295 = vst [vmem:[%s896_s3 + $0x88] sm:$0xff] %v231_v31  ;;  %v180_v6 = vadd.f32 %v379_v2, %v112_v53  ;;  %v116_v7 = vmul.f32 %v374_v1, %v48_v58  ;;  %v241_v9 = vmax.f32 %v177_v56, 0.0  ;;  %v181_v10 = vadd.f32 %v379_v2, %v113_v57  ;;  %v63_v56 = vld [vmem:[%s893_s0 + $0x188] sm:$0xff] }
  0x1b   :  { %296 = vst [vmem:[%s896_s3 + $0x90] sm:$0xff] %v232_v35  ;;  %v117_v11 = vmul.f32 %v374_v1, %v49_v62  ;;  %v242_v13 = vmax.f32 %v178_v60, 0.0  ;;  %v182_v14 = vadd.f32 %v379_v2, %v114_v61  ;;  %v118_v15 = vmul.f32 %v374_v1, %v50_v4  ;;  %v64_v60 = vld [vmem:[%s893_s0 + $0x190] sm:$0xff] }
  0x1c   :  { %297 = vst [vmem:[%s896_s3 + $0x98] sm:$0xff] %v233_v39  ;;  %v243_v17 = vmax.f32 %v179_v0, 0.0  ;;  %v183_v18 = vadd.f32 %v379_v2, %v115_v3  ;;  %v119_v19 = vmul.f32 %v374_v1, %v51_v8  ;;  %v244_v21 = vmax.f32 %v180_v6, 0.0  ;;  %v65_v0 = vld [vmem:[%s893_s0 + $0x198] sm:$0xff] }
  0x1d   :  { %298 = vst [vmem:[%s896_s3 + $0xa0] sm:$0xff] %v234_v43  ;;  %v184_v22 = vadd.f32 %v379_v2, %v116_v7  ;;  %v120_v23 = vmul.f32 %v374_v1, %v52_v12  ;;  %v245_v25 = vmax.f32 %v181_v10, 0.0  ;;  %v185_v26 = vadd.f32 %v379_v2, %v117_v11  ;;  %v77_v3 = vld [vmem:[%s893_s0 + $0x1f8] sm:$0xff]  ;;  %v66_v7 = vld [vmem:[%s893_s0 + $0x1a0] sm:$0xff]  ;;  %v67_v11 = vld [vmem:[%s893_s0 + $0x1a8] sm:$0xff] }
  0x1e   :  { %299 = vst [vmem:[%s896_s3 + $0xa8] sm:$0xff] %v235_v47  ;;  %v121_v27 = vmul.f32 %v374_v1, %v53_v16  ;;  %v246_v29 = vmax.f32 %v182_v14, 0.0  ;;  %v186_v30 = vadd.f32 %v379_v2, %v118_v15  ;;  %v122_v31 = vmul.f32 %v374_v1, %v54_v20  ;;  %v68_v15 = vld [vmem:[%s893_s0 + $0x1b0] sm:$0xff]  ;;  %v69_v20 = vld [vmem:[%s893_s0 + $0x1b8] sm:$0xff] }
  0x1f   :  { %300 = vst [vmem:[%s896_s3 + $0xb0] sm:$0xff] %v236_v51  ;;  %v247_v33 = vmax.f32 %v183_v18, 0.0  ;;  %v187_v34 = vadd.f32 %v379_v2, %v119_v19  ;;  %v123_v35 = vmul.f32 %v374_v1, %v55_v24  ;;  %v248_v37 = vmax.f32 %v184_v22, 0.0  ;;  %v70_v24 = vld [vmem:[%s893_s0 + $0x1c0] sm:$0xff] }
  0x20   :  { %301 = vst [vmem:[%s896_s3 + $0xb8] sm:$0xff] %v237_v55  ;;  %v188_v38 = vadd.f32 %v379_v2, %v120_v23  ;;  %v124_v39 = vmul.f32 %v374_v1, %v56_v28  ;;  %v249_v41 = vmax.f32 %v185_v26, 0.0  ;;  %v189_v42 = vadd.f32 %v379_v2, %v121_v27 }
  0x21   :  { %302 = vst [vmem:[%s896_s3 + $0xc0] sm:$0xff] %v238_v59  ;;  %v125_v43 = vmul.f32 %v374_v1, %v57_v32  ;;  %v250_v45 = vmax.f32 %v186_v30, 0.0  ;;  %v190_v46 = vadd.f32 %v379_v2, %v122_v31  ;;  %v126_v47 = vmul.f32 %v374_v1, %v58_v36 }
  0x22   :  { %303 = vst [vmem:[%s896_s3 + $0xc8] sm:$0xff] %v239_v63  ;;  %v251_v49 = vmax.f32 %v187_v34, 0.0  ;;  %v191_v50 = vadd.f32 %v379_v2, %v123_v35  ;;  %v127_v51 = vmul.f32 %v374_v1, %v59_v40  ;;  %v252_v53 = vmax.f32 %v188_v38, 0.0 }
  0x23   :  { %304 = vst [vmem:[%s896_s3 + $0xd0] sm:$0xff] %v240_v5  ;;  %v192_v54 = vadd.f32 %v379_v2, %v124_v39  ;;  %v128_v55 = vmul.f32 %v374_v1, %v60_v44  ;;  %v253_v57 = vmax.f32 %v189_v42, 0.0  ;;  %v193_v58 = vadd.f32 %v379_v2, %v125_v43 }
  0x24   :  { %305 = vst [vmem:[%s896_s3 + $0xd8] sm:$0xff] %v241_v9  ;;  %v129_v59 = vmul.f32 %v374_v1, %v61_v48  ;;  %v254_v61 = vmax.f32 %v190_v46, 0.0  ;;  %v194_v62 = vadd.f32 %v379_v2, %v126_v47  ;;  %v130_v63 = vmul.f32 %v374_v1, %v62_v52 }
  0x25   :  { %306 = vst [vmem:[%s896_s3 + $0xe0] sm:$0xff] %v242_v13  ;;  %v255_v4 = vmax.f32 %v191_v50, 0.0  ;;  %v195_v5 = vadd.f32 %v379_v2, %v127_v51  ;;  %v131_v6 = vmul.f32 %v374_v1, %v63_v56  ;;  %v256_v8 = vmax.f32 %v192_v54, 0.0 }
  0x26   :  { %307 = vst [vmem:[%s896_s3 + $0xe8] sm:$0xff] %v243_v17  ;;  %v196_v9 = vadd.f32 %v379_v2, %v128_v55  ;;  %v132_v10 = vmul.f32 %v374_v1, %v64_v60  ;;  %v257_v12 = vmax.f32 %v193_v58, 0.0  ;;  %v197_v13 = vadd.f32 %v379_v2, %v129_v59 }
  0x27   :  { %308 = vst [vmem:[%s896_s3 + $0xf0] sm:$0xff] %v244_v21  ;;  %v133_v14 = vmul.f32 %v374_v1, %v65_v0  ;;  %v145_v16 = vmul.f32 %v374_v1, %v77_v3  ;;  %v258_v17 = vmax.f32 %v194_v62, 0.0  ;;  %v198_v18 = vadd.f32 %v379_v2, %v130_v63 }
  0x28   :  { %309 = vst [vmem:[%s896_s3 + $0xf8] sm:$0xff] %v245_v25  ;;  %v134_v19 = vmul.f32 %v374_v1, %v66_v7  ;;  %v259_v21 = vmax.f32 %v195_v5, 0.0  ;;  %v199_v22 = vadd.f32 %v379_v2, %v131_v6  ;;  %v135_v23 = vmul.f32 %v374_v1, %v67_v11 }
  0x29   :  { %310 = vst [vmem:[%s896_s3 + $0x100] sm:$0xff] %v246_v29  ;;  %v784_v25 = vadd.f32 %v379_v2, %v145_v16  ;;  %v260_v26 = vmax.f32 %v196_v9, 0.0  ;;  %v200_v27 = vadd.f32 %v379_v2, %v132_v10  ;;  %v136_v28 = vmul.f32 %v374_v1, %v68_v15  ;;  %v71_v29 = vld [vmem:[%s893_s0 + $0x1c8] sm:$0xff] }
  0x2a   :  { %311 = vst [vmem:[%s896_s3 + $0x108] sm:$0xff] %v247_v33  ;;  %v261_v30 = vmax.f32 %v197_v13, 0.0  ;;  %v201_v31 = vadd.f32 %v379_v2, %v133_v14  ;;  %v137_v32 = vmul.f32 %v374_v1, %v69_v20  ;;  %v72_v33 = vld [vmem:[%s893_s0 + $0x1d0] sm:$0xff]  ;;  %v262_v34 = vmax.f32 %v198_v18, 0.0 }
  0x2b   :  { %312 = vst [vmem:[%s896_s3 + $0x110] sm:$0xff] %v248_v37  ;;  %v202_v35 = vadd.f32 %v379_v2, %v134_v19  ;;  %v138_v36 = vmul.f32 %v374_v1, %v70_v24  ;;  %v73_v37 = vld [vmem:[%s893_s0 + $0x1d8] sm:$0xff]  ;;  %v263_v38 = vmax.f32 %v199_v22, 0.0  ;;  %v203_v39 = vadd.f32 %v379_v2, %v135_v23 }
  0x2c   :  { %313 = vst [vmem:[%s896_s3 + $0x118] sm:$0xff] %v249_v41  ;;  %v139_v40 = vmul.f32 %v374_v1, %v71_v29  ;;  %v74_v41 = vld [vmem:[%s893_s0 + $0x1e0] sm:$0xff]  ;;  %v264_v42 = vmax.f32 %v200_v27, 0.0  ;;  %v204_v43 = vadd.f32 %v379_v2, %v136_v28  ;;  %v140_v44 = vmul.f32 %v374_v1, %v72_v33 }
  0x2d   :  { %314 = vst [vmem:[%s896_s3 + $0x120] sm:$0xff] %v250_v45  ;;  %v75_v45 = vld [vmem:[%s893_s0 + $0x1e8] sm:$0xff]  ;;  %v265_v46 = vmax.f32 %v201_v31, 0.0  ;;  %v205_v47 = vadd.f32 %v379_v2, %v137_v32  ;;  %v141_v48 = vmul.f32 %v374_v1, %v73_v37  ;;  %v266_v50 = vmax.f32 %v202_v35, 0.0 }
  0x2e   :  { %315 = vst [vmem:[%s896_s3 + $0x128] sm:$0xff] %v251_v49  ;;  %v76_v49 = vld [vmem:[%s893_s0 + $0x1f0] sm:$0xff]  ;;  %v206_v51 = vadd.f32 %v379_v2, %v138_v36  ;;  %v142_v52 = vmul.f32 %v374_v1, %v74_v41  ;;  %v207_v54 = vadd.f32 %v379_v2, %v139_v40  ;;  %v143_v55 = vmul.f32 %v374_v1, %v75_v45 }
  0x2f   :  { %316 = vst [vmem:[%s896_s3 + $0x130] sm:$0xff] %v252_v53  ;;  %v267_v53 = vmax.f32 %v203_v39, 0.0  ;;  %v268_v56 = vmax.f32 %v204_v43, 0.0  ;;  %v144_v58 = vmul.f32 %v374_v1, %v76_v49  ;;  %v269_v59 = vmax.f32 %v205_v47, 0.0 }
  0x30   :  { %317 = vst [vmem:[%s896_s3 + $0x138] sm:$0xff] %v253_v57  ;;  %v208_v57 = vadd.f32 %v379_v2, %v140_v44  ;;  %v209_v60 = vadd.f32 %v379_v2, %v141_v48  ;;  %v210_v62 = vadd.f32 %v379_v2, %v142_v52  ;;  %v271_v63 = vmax.f32 %v207_v54, 0.0 }
  0x31   :  { %318 = vst [vmem:[%s896_s3 + $0x140] sm:$0xff] %v254_v61  ;;  %v270_v61 = vmax.f32 %v206_v51, 0.0  ;;  %v211_v1 = vadd.f32 %v379_v2, %v143_v55  ;;  %v212_v3 = vadd.f32 %v379_v2, %v144_v58  ;;  %v277_v7 = vmax.f32 %v784_v25, 0.0 }
  0x32   :  { %319 = vst [vmem:[%s896_s3 + $0x148] sm:$0xff] %v255_v4  ;;  %v272_v0 = vmax.f32 %v208_v57, 0.0  ;;  %v273_v4 = vmax.f32 %v209_v60, 0.0  ;;  %v274_v5 = vmax.f32 %v210_v62, 0.0 }
  0x33   :  { %320 = vst [vmem:[%s896_s3 + $0x150] sm:$0xff] %v256_v8  ;;  %v275_v6 = vmax.f32 %v211_v1, 0.0  ;;  %v276_v2 = vmax.f32 %v212_v3, 0.0 }
  0x34   :  { %321 = vst [vmem:[%s896_s3 + $0x158] sm:$0xff] %v257_v12 }
  0x35   :  { %322 = vst [vmem:[%s896_s3 + $0x160] sm:$0xff] %v258_v17 }
  0x36   :  { %323 = vst [vmem:[%s896_s3 + $0x168] sm:$0xff] %v259_v21 }
  0x37   :  { %324 = vst [vmem:[%s896_s3 + $0x170] sm:$0xff] %v260_v26 }
  0x38   :  { %325 = vst [vmem:[%s896_s3 + $0x178] sm:$0xff] %v261_v30 }
  0x39   :  { %326 = vst [vmem:[%s896_s3 + $0x180] sm:$0xff] %v262_v34 }
  0x3a   :  { %327 = vst [vmem:[%s896_s3 + $0x188] sm:$0xff] %v263_v38 }
  0x3b   :  { %328 = vst [vmem:[%s896_s3 + $0x190] sm:$0xff] %v264_v42 }
  0x3c   :  { %329 = vst [vmem:[%s896_s3 + $0x198] sm:$0xff] %v265_v46 }
  0x3d   :  { %330 = vst [vmem:[%s896_s3 + $0x1a0] sm:$0xff] %v266_v50 }
  0x3e   :  { %331 = vst [vmem:[%s896_s3 + $0x1a8] sm:$0xff] %v267_v53 }
  0x3f   :  { %332 = vst [vmem:[%s896_s3 + $0x1b0] sm:$0xff] %v268_v56 }
  0x40   :  { %333 = vst [vmem:[%s896_s3 + $0x1b8] sm:$0xff] %v269_v59 }
  0x41   :  { %334 = vst [vmem:[%s896_s3 + $0x1c0] sm:$0xff] %v270_v61 }
  0x42   :  { %335 = vst [vmem:[%s896_s3 + $0x1c8] sm:$0xff] %v271_v63 }
  0x43   :  { %336 = vst [vmem:[%s896_s3 + $0x1d0] sm:$0xff] %v272_v0 }
  0x44   :  { %337 = vst [vmem:[%s896_s3 + $0x1d8] sm:$0xff] %v273_v4 }
  0x45   :  { %338 = vst [vmem:[%s896_s3 + $0x1e0] sm:$0xff] %v274_v5 }
  0x46   :  { %339 = vst [vmem:[%s896_s3 + $0x1e8] sm:$0xff] %v275_v6 }
  0x47   :  { %340 = vst [vmem:[%s896_s3 + $0x1f0] sm:$0xff] %v276_v2 }
  0x48   :  { %341 = vst [vmem:[%s896_s3 + $0x1f8] sm:$0xff] %v277_v7 }

// kernel: double_conv.4
= control target key start
LH: loop header
LB: loop body
LE: loop exit
PB: predicated region body
PF: predicated region fallthrough
CT: control target
= control target key end

     0   :  { %s3508_s21 = smov 0   ;;  %s4929_s0 = inlined_call_operand.vmem [shape: f32[2,18,18,128], index: 0, kind: input, shape index: {}]   ;;  %s4930_s1 = inlined_call_operand.vmem [shape: bf16[9,128,128], index: 1, kind: input, shape index: {}]   ;;  %s4931_s2 = inlined_call_operand.vmem [shape: f32[1,128], index: 2, kind: input, shape index: {}]   ;;  %s4932_s3 = inlined_call_operand.vmem [shape: f32[1,128], index: 3, kind: input, shape index: {}]   ;;  %s4933_s4 = inlined_call_operand.vmem [shape: f32[2,256,128], index: 4, kind: output, shape index: {0}]   ;;  %s4934_s5 = inlined_call_operand.vmem [shape: f32[2,1,128], index: 5, kind: output, shape index: {1}]   ;;  %s4935_s6 = inlined_call_operand.vmem [shape: f32[2,1,128], index: 6, kind: output, shape index: {2}]  }
   0x1 LB: > { %s2785_s22 = sadd.s32 4294967295, %s3468_s21   ;;  %p2789_p0 = scmp.ge.s32.totalorder %s3468_s21, 1  ;;  %s3468_s21 = sphi %s3508_s21, %s17_s21  }
   0x2   : > { %p217_p1 = scmp.lt.s32.totalorder %s3468_s21, 3 }
   0x4   : > { %p218_p2 = pnand %p2789_p0, %p217_p1 }
   0x6   : > { %221 = sbr.rel (%p218_p2) target bundleno = 766 (0x2fe), region = 36 }
   0xb   : > { %v3365_v0 = vld [vmem:[%s4930_s1 + $0x78] sm:$0xff]  ;;  %p253_p3 = scmp.lt.s32.totalorder %s2785_s22, 1  ;;  %v493_v1 = vlaneseq  ;;  %v3364_v2 = vld [vmem:[%s4930_s1 + $0x70] sm:$0xff]  ;;  %v3530_v4 = vld [vmem:[%s4931_s2] ss:$0 sm:$0xff]  ;;  %v4943_v37 = vmov 0.0  }
   0xc   : > { %3422 = vmatpush.bf16.msra.mxu1 %v3365_v0  ;;  %3423 = vmatpush.bf16.msra.mxu2 %v3365_v0  ;;  %v3363_v5 = vld [vmem:[%s4930_s1 + $0x68] sm:$0xff]  ;;  %v3543_v6 = vld [vmem:[%s4932_s3] ss:$0 sm:$0xff]  ;;  %v650_v38 = vrot.slane %v4943_v37, 1  ;;  %v3361_v39 = vld [vmem:[%s4930_s1 + $0x58] sm:$0xff]  ;;  %vm649_vm2 = vcmask 1046528  }
   0xd   : > { %s5166_s22 = smov (!%p253_p3, %s2785_s22), 1  ;;  %3424 = vmatpush.bf16.msra.mxu3 %v3365_v0  ;;  %843 = vmatpush.bf16.msra.mxu0 %v3365_v0  ;;  %v3524_v3 = vshrl.u32 %v493_v1, 7  ;;  %v3362_v21 = vld [vmem:[%s4930_s1 + $0x60] sm:$0xff]  ;;  %v3360_v57 = vld [vmem:[%s4930_s1 + $0x50] sm:$0xff]  ;;  %vm3471_vm3 = vmmov 1   ;;  %vm1069_vm5 = vcmask 1045504  }
   0xe   : > { %s3446_s27 = smul.u32 432, %s5166_s22  ;;  %v3620_v53 = vpack.c.bf16 %v650_v38, %v650_v38  ;;  %s265_s13 = scalar_lea.vmem %s4934_s5, %s5166_s22 }
   0xf   : > { %v3549_v10 = vadd.s32 16, %v3524_v3  ;;  %vm497_vm0 = vcmp.ge.s32.totalorder %v3524_v3, 1  ;;  %s268_s16 = scalar_lea.vmem %s4935_s6, %s5166_s22 }
  0x10   : > { %3425 = vmatpush.bf16.msra.mxu1 %v3364_v2  ;;  %3426 = vmatpush.bf16.msra.mxu2 %v3364_v2  ;;  %s3538_s10 = scalar_lea.vmem %s4929_s0, %s3446_s27  ;;  %5012 = vst [vmem:[#allocation4_spill] sm:$0xff] %v3620_v53  ;;  %vm4175_vm4 = vmpackc.low %vm3471_vm3, %vm497_vm0 }
  0x11   : > { %3427 = vmatpush.bf16.msra.mxu3 %v3364_v2  ;;  %844 = vmatpush.bf16.msra.mxu0 %v3364_v2  ;;  %v281_v7 = vld [vmem:[%s3538_s10 + $0x60] sm:$0xff]  ;;  %v282_v8 = vld [vmem:[%s3538_s10 + $0x68] sm:$0xff]  ;;  %v283_v9 = vld [vmem:[%s3538_s10 + $0x70] sm:$0x3]  ;;  %5010 = vst [vmem:[#allocation2_spill] sm:$0xff] %v3549_v10  ;;  %vm508_vm1 = vcmp.le.s32.totalorder %v3549_v10, 16 }
  0x12   : > { %v339_v11 = vmul.f32 %v3530_v4, %v281_v7  ;;  %v340_v12 = vmul.f32 %v3530_v4, %v282_v8  ;;  %v341_v13 = vmul.f32 %v3530_v4, %v283_v9  ;;  %v293_v14 = vld [vmem:[%s3538_s10 + $0xc0] sm:$0xff]  ;;  %v294_v15 = vld [vmem:[%s3538_s10 + $0xc8] sm:$0xff]  ;;  %v295_v16 = vld [vmem:[%s3538_s10 + $0xd0] sm:$0x3] }
  0x13   : > { %v351_v17 = vmul.f32 %v3530_v4, %v293_v14  ;;  %v352_v18 = vmul.f32 %v3530_v4, %v294_v15  ;;  %v353_v19 = vmul.f32 %v3530_v4, %v295_v16  ;;  %v305_v20 = vld [vmem:[%s3538_s10 + $0x120] sm:$0xff]  ;;  %v306_v25 = vld [vmem:[%s3538_s10 + $0x128] sm:$0xff]  ;;  %v307_v29 = vld [vmem:[%s3538_s10 + $0x130] sm:$0x3] }
  0x14   : > { %3428 = vmatpush.bf16.msra.mxu1 %v3363_v5  ;;  %3429 = vmatpush.bf16.msra.mxu2 %v3363_v5  ;;  %v3565_v22 = vadd.f32 %v3543_v6, %v339_v11  ;;  %v398_v23 = vadd.f32 %v3543_v6, %v340_v12  ;;  %v399_v24 = vadd.f32 %v3543_v6, %v341_v13  ;;  %v284_v49 = vld [vmem:[%s3538_s10 + $0x78] sm:$0xff]  ;;  %v285_v54 = vld [vmem:[%s3538_s10 + $0x80] sm:$0xff]  ;;  %v286_v55 = vld [vmem:[%s3538_s10 + $0x88] sm:$0x3] }
  0x15   : > { %3430 = vmatpush.bf16.msra.mxu3 %v3363_v5  ;;  %845 = vmatpush.bf16.msra.mxu0 %v3363_v5  ;;  %v3573_v26 = vadd.f32 %v3543_v6, %v351_v17  ;;  %v410_v27 = vadd.f32 %v3543_v6, %v352_v18  ;;  %v411_v28 = vadd.f32 %v3543_v6, %v353_v19  ;;  %v296_v56 = vld [vmem:[%s3538_s10 + $0xd8] sm:$0xff]  ;;  %v297_v2 = vld [vmem:[%s3538_s10 + $0xe0] sm:$0xff]  ;;  %v298_v9 = vld [vmem:[%s3538_s10 + $0xe8] sm:$0x3] }
  0x16   : > { %v4941_v30 = vmax.f32 %v3565_v22, 0.0  ;;  %v3579_v31 = vmax.f32 %v398_v23, 0.0  ;;  %v453_v32 = vmax.f32 %v399_v24, 0.0  ;;  %v363_v33 = vmul.f32 %v3530_v4, %v305_v20  ;;  %v3359_v16 = vld [vmem:[%s4930_s1 + $0x48] sm:$0xff]  ;;  %v311_v37 = vld [vmem:[%s3538_s10 + $0x150] sm:$0xff] }
  0x17   : > { %v4939_v34 = vmax.f32 %v3573_v26, 0.0  ;;  %v465_v35 = vmax.f32 %v411_v28, 0.0  ;;  %v364_v36 = vmul.f32 %v3530_v4, %v306_v25  ;;  %v3598_v42 = vmax.f32 %v410_v27, 0.0 }
  0x18   : > { %3431 = vmatpush.bf16.msra.mxu1 %v3362_v21  ;;  %3432 = vmatpush.bf16.msra.mxu2 %v3362_v21  ;;  %v3592_v40 = vsel %vm497_vm0, %v4941_v30, 0.0  ;;  %v3596_v41 = vsel %vm508_vm1, %v453_v32, 0.0  ;;  %v365_v43 = vmul.f32 %v3530_v4, %v307_v29  ;;  %v671_v45 = vrot.slane %v3579_v31, 1 }
  0x19   : > { %3433 = vmatpush.bf16.msra.mxu3 %v3362_v21  ;;  %846 = vmatpush.bf16.msra.mxu0 %v3362_v21  ;;  %v670_v44 = vrot.slane %v3592_v40, 1  ;;  %v3607_v46 = vsel %vm497_vm0, %v4939_v34, 0.0  ;;  %v3611_v47 = vsel %vm508_vm1, %v465_v35, 0.0  ;;  %v3614_v48 = vadd.f32 %v3543_v6, %v363_v33  ;;  %v308_v33 = vld [vmem:[%s3538_s10 + $0x138] sm:$0xff] }
  0x1a   : > { %v673_v50 = vrot.slane %v3596_v41, 1  ;;  %v422_v51 = vadd.f32 %v3543_v6, %v364_v36  ;;  %v423_v52 = vadd.f32 %v3543_v6, %v365_v43  ;;  %v690_v58 = vrot.slane %v3607_v46, 1  ;;  %v309_v43 = vld [vmem:[%s3538_s10 + $0x140] sm:$0xff] }
  0x1b   : > { %5011 = vst [vmem:[#allocation3_spill] sm:$0xff] %v3614_v48  ;;  %v691_v59 = vrot.slane %v3598_v42, 1  ;;  %v693_v60 = vrot.slane %v3611_v47, 1  ;;  %v4937_v61 = vmax.f32 %v3614_v48, 0.0  ;;  %v672_v62 = vsel %vm649_vm2, %v670_v44, %v671_v45  ;;  %v3358_v44 = vld [vmem:[%s4930_s1 + $0x40] sm:$0xff]  ;;  %v303_v48 = vld [vmem:[%s3538_s10 + $0x110] sm:$0xff] }
  0x1c   : > { %3434 = vmatpush.bf16.msra.mxu1 %v3361_v39  ;;  %3435 = vmatpush.bf16.msra.mxu2 %v3361_v39  ;;  %v3633_v63 = vmax.f32 %v422_v51, 0.0  ;;  %v477_v0 = vmax.f32 %v423_v52, 0.0  ;;  %v342_v1 = vmul.f32 %v3530_v4, %v284_v49  ;;  %v343_v7 = vmul.f32 %v3530_v4, %v285_v54  ;;  %v310_v52 = vld [vmem:[%s3538_s10 + $0x148] sm:$0x3]  ;;  %v3373_v54 = vld [vmem:[%s4930_s1 + $0xb8] sm:$0xff] }
  0x1d   : > { %3436 = vmatpush.bf16.msra.mxu3 %v3361_v39  ;;  %847 = vmatpush.bf16.msra.mxu0 %v3361_v39  ;;  %v3641_v5 = vsel %vm497_vm0, %v4937_v61, 0.0  ;;  %v344_v8 = vmul.f32 %v3530_v4, %v286_v55  ;;  %v354_v11 = vmul.f32 %v3530_v4, %v296_v56  ;;  %v355_v20 = vmul.f32 %v3530_v4, %v297_v2 }
  0x1e   : > { %5013 = vst [vmem:[#allocation5_spill] sm:$0xff] %v3633_v63  ;;  %v3649_v12 = vsel %vm508_vm1, %v477_v0, 0.0  ;;  %v710_v13 = vrot.slane %v3641_v5, 1  ;;  %v711_v14 = vrot.slane %v3633_v63, 1  ;;  %v3654_v15 = vadd.f32 %v3543_v6, %v342_v1  ;;  %v3381_v0 = vld [vmem:[%s4930_s1 + $0xf8] sm:$0xff] }
  0x1f   : > { %5014 = vst [vmem:[#allocation6_spill] sm:$0xff] %v3641_v5  ;;  %v713_v17 = vrot.slane %v3649_v12, 1  ;;  %v401_v18 = vadd.f32 %v3543_v6, %v343_v7  ;;  %v402_v19 = vadd.f32 %v3543_v6, %v344_v8  ;;  %v674_v21 = vsel %vm649_vm2, %v671_v45, %v673_v50  ;;  %v272_v7 = vld [vmem:[%s3538_s10 + $0x18] sm:$0xff]  ;;  %v273_v8 = vld [vmem:[%s3538_s10 + $0x20] sm:$0xff] }
  0x20   : > { %5015 = vst [vmem:[#allocation7_spill] sm:$0xff] %v3649_v12  ;;  %3437 = vmatpush.bf16.msra.mxu1 %v3360_v57  ;;  %3438 = vmatpush.bf16.msra.mxu2 %v3360_v57  ;;  %v4940_v23 = vmax.f32 %v3654_v15, 0.0  ;;  %v356_v24 = vmul.f32 %v3530_v4, %v298_v9  ;;  %v3667_v25 = vadd.f32 %v3543_v6, %v354_v11 }
  0x21   : > { %3439 = vmatpush.bf16.msra.mxu3 %v3360_v57  ;;  %848 = vmatpush.bf16.msra.mxu0 %v3360_v57  ;;  %v692_v27 = vsel %vm649_vm2, %v690_v58, %v691_v59  ;;  %v3670_v28 = vmax.f32 %v401_v18, 0.0  ;;  %v456_v29 = vmax.f32 %v402_v19, 0.0  ;;  %v413_v32 = vadd.f32 %v3543_v6, %v355_v20 }
  0x22   : > { %5016 = vst [vmem:[#allocation8_spill] sm:$0xff] %v3667_v25  ;;  %v694_v35 = vsel %vm649_vm2, %v691_v59, %v693_v60  ;;  %v3679_v36 = vsel %vm497_vm0, %v4940_v23, 0.0  ;;  %v414_v38 = vadd.f32 %v3543_v6, %v356_v24  ;;  %v4938_v39 = vmax.f32 %v3667_v25, 0.0  ;;  %v3372_v24 = vld [vmem:[%s4930_s1 + $0xb0] sm:$0xff]  ;;  %v301_v23 = vld [vmem:[%s3538_s10 + $0x100] sm:$0x3] }
  0x23   : > { %v712_v45 = vsel %vm649_vm2, %v710_v13, %v711_v14  ;;  %v714_v49 = vsel %vm649_vm2, %v711_v14, %v713_v17  ;;  %v675_v50 = vrot.slane %v3679_v36, 1  ;;  %v676_v51 = vrot.slane %v3670_v28, 1  ;;  %v274_v14 = vld [vmem:[%s3538_s10 + $0x28] sm:$0x3] }
  0x24   : > { %3440 = vmatpush.bf16.msra.mxu1 %v3359_v16  ;;  %3441 = vmatpush.bf16.msra.mxu2 %v3359_v16  ;;  %v3697_v55 = vsel %vm508_vm1, %v456_v29, 0.0  ;;  %v468_v56 = vmax.f32 %v414_v38, 0.0  ;;  %v3703_v57 = vsel %vm497_vm0, %v4938_v39, 0.0  ;;  %v366_v58 = vmul.f32 %v3530_v4, %v308_v33  ;;  %v3389_v29 = vld [vmem:[%s4930_s1 + $0x138] sm:$0xff] }
  0x25   : > { %3442 = vmatpush.bf16.msra.mxu3 %v3359_v16  ;;  %849 = vmatpush.bf16.msra.mxu0 %v3359_v16  ;;  %5017 = vst [vmem:[#allocation9_spill] sm:$0xff] %v3703_v57  ;;  %v3706_v59 = vpack.c.bf16 %v674_v21, %v672_v62  ;;  %v3708_v60 = vpack.c.bf16 %v694_v35, %v692_v27  ;;  %v3713_v1 = vmax.f32 %v413_v32, 0.0  ;;  %v3357_v16 = vld [vmem:[%s4930_s1 + $0x38] sm:$0xff]  ;;  %v678_v18 = vrot.slane %v3697_v55, 1  ;;  %v287_v21 = vld [vmem:[%s3538_s10 + $0x90] sm:$0xff] }
  0x26   : > { %v367_v2 = vmul.f32 %v3530_v4, %v309_v43  ;;  %v3718_v9 = vpack.c.bf16 %v714_v49, %v712_v45  ;;  %v3722_v11 = vsel %vm508_vm1, %v468_v56, 0.0  ;;  %v368_v62 = vmul.f32 %v3530_v4, %v310_v52  ;;  %v3380_v27 = vld [vmem:[%s4930_s1 + $0xf0] sm:$0xff]  ;;  %v289_v52 = vld [vmem:[%s3538_s10 + $0xa0] sm:$0x3] }
  0x27   : > { %5018 = vst [vmem:[#allocation10_spill] sm:$0xff] %v3708_v60  ;;  %v3726_v13 = vadd.f32 %v3543_v6, %v366_v58  ;;  %v3735_v17 = vsel %vm649_vm2, %v675_v50, %v676_v51  ;;  %v695_v19 = vrot.slane %v3703_v57, 1  ;;  %v330_v35 = vmul.f32 %v3530_v4, %v272_v7  ;;  %v288_v50 = vld [vmem:[%s3538_s10 + $0x98] sm:$0xff]  ;;  %v314_v57 = vld [vmem:[%s3538_s10 + $0x168] sm:$0xff] }
  0x28   : > { %5019 = vst [vmem:[#allocation11_spill] sm:$0xff] %v3713_v1  ;;  %3443 = vmatpush.bf16.msra.mxu1 %v3358_v44  ;;  %3444 = vmatpush.bf16.msra.mxu2 %v3358_v44  ;;  %v425_v20 = vadd.f32 %v3543_v6, %v367_v2  ;;  %v426_v32 = vadd.f32 %v3543_v6, %v368_v62  ;;  %v696_v43 = vrot.slane %v3713_v1, 1 }
  0x29   : > { %5020 = vst [vmem:[#allocation12_spill] sm:$0xff] %v3718_v9  ;;  %3445 = vmatpush.bf16.msra.mxu3 %v3358_v44  ;;  %850 = vmatpush.bf16.msra.mxu0 %v3358_v44  ;;  %v4936_v33 = vmax.f32 %v3726_v13, 0.0  ;;  %v331_v38 = vmul.f32 %v3530_v4, %v273_v8  ;;  %v698_v44 = vrot.slane %v3722_v11, 1  ;;  %v332_v49 = vmul.f32 %v3530_v4, %v274_v14  ;;  %v3356_v14 = vld [vmem:[%s4930_s1 + $0x30] sm:$0xff] }
  0x2a   : > { %5021 = vst [vmem:[#allocation13_spill] sm:$0xff] %v3722_v11  ;;  %v3756_v45 = vmax.f32 %v425_v20, 0.0  ;;  %v480_v56 = vmax.f32 %v426_v32, 0.0  ;;  %v3770_v58 = vadd.f32 %v3543_v6, %v330_v35  ;;  %v3388_v32 = vld [vmem:[%s4930_s1 + $0x130] sm:$0xff]  ;;  %v346_v35 = vmul.f32 %v3530_v4, %v288_v50  ;;  %v3379_v50 = vld [vmem:[%s4930_s1 + $0xe8] sm:$0xff] }
  0x2b   : > { %5022 = vst [vmem:[#allocation14_spill] sm:$0xff] %v3726_v13  ;;  %871 = vmatmul.bf16.vlgmr.msra.gmra.mxu1 %v3706_v59  ;;  %891 = vmatmul.bf16.vlgmr.msra.gmra.mxu2 %v3708_v60  ;;  %v389_v8 = vadd.f32 %v3543_v6, %v331_v38  ;;  %v390_v62 = vadd.f32 %v3543_v6, %v332_v49  ;;  %v3371_v49 = vld [vmem:[%s4930_s1 + $0xa8] sm:$0xff]  ;;  %v3384_v13 = vld [vmem:[%s4930_s1 + $0x110] sm:$0xff] }
  0x2c   : > { %1263 = vmatpush.bf16.msrb.mxu2 %v3373_v54  ;;  %5023 = vst [vmem:[#allocation15_spill] sm:$0xff] %v3756_v45  ;;  %v3767_v54 = vsel %vm497_vm0, %v4936_v33, 0.0  ;;  %911 = vmatmul.bf16.vlgmr.msra.gmra.mxu3 %v3718_v9  ;;  %v716_v7 = vrot.slane %v3756_v45, 1  ;;  %v3784_v20 = vsel %vm508_vm1, %v480_v56, 0.0 }
  0x2d   : > { %1450 = vmatpush.bf16.msrb.mxu3 %v3381_v0  ;;  %5024 = vst [vmem:[#allocation16_spill] sm:$0xff] %v3767_v54  ;;  %v345_v0 = vmul.f32 %v3530_v4, %v287_v21  ;;  %851 = vmatmul.bf16.vlgmr.msra.gmra.mxu0 %v3620_v53  ;;  %v715_v2 = vrot.slane %v3767_v54, 1  ;;  %v4942_v21 = vmax.f32 %v3770_v58, 0.0  ;;  %v718_v38 = vrot.slane %v3784_v20, 1 }
  0x2e   : > { %980 = vmatpush.bf16.msrb.mxu1 %v3357_v16  ;;  %1647 = vmatpush.bf16.msrb.mxu0 %v3389_v29  ;;  %5025 = vst [vmem:[#allocation17_spill] sm:$0xff] %v3784_v20  ;;  %v347_v16 = vmul.f32 %v3530_v4, %v289_v52  ;;  %v679_v29 = vsel %vm649_vm2, %v676_v51, %v678_v18  ;;  %v3799_v56 = vmax.f32 %v389_v8, 0.0  ;;  %v444_v33 = vmax.f32 %v390_v62, 0.0  ;;  %v299_v52 = vld [vmem:[%s3538_s10 + $0xf0] sm:$0xff]  ;;  %v300_v8 = vld [vmem:[%s3538_s10 + $0xf8] sm:$0xff] }
  0x2f   : > { %v3811_v51 = vadd.f32 %v3543_v6, %v345_v0  ;;  %v404_v18 = vadd.f32 %v3543_v6, %v346_v35  ;;  %v697_v62 = vsel %vm649_vm2, %v695_v19, %v696_v43  ;;  %v699_v0 = vsel %vm649_vm2, %v696_v43, %v698_v44  ;;  %v3355_v19 = vld [vmem:[%s4930_s1 + $0x28] sm:$0xff]  ;;  %v3370_v43 = vld [vmem:[%s4930_s1 + $0xa0] sm:$0xff] }
  0x30   : > { %1264 = vmatpush.bf16.msrb.mxu2 %v3372_v24  ;;  %v3808_v24 = vsel %vm497_vm0, %v4942_v21, 0.0  ;;  %v3820_v61 = vsel %vm508_vm1, %v444_v33, 0.0  ;;  %v656_v34 = vrot.slane %v3799_v56, 1  ;;  %v717_v35 = vsel %vm649_vm2, %v715_v2, %v716_v7  ;;  %v3387_v33 = vld [vmem:[%s4930_s1 + $0x128] sm:$0xff]  ;;  %v3378_v44 = vld [vmem:[%s4930_s1 + $0xe0] sm:$0xff] }
  0x31   : > { %1451 = vmatpush.bf16.msrb.mxu3 %v3380_v27  ;;  %v405_v27 = vadd.f32 %v3543_v6, %v347_v16  ;;  %v655_v39 = vrot.slane %v3808_v24, 1  ;;  %v658_v16 = vrot.slane %v3820_v61, 1  ;;  %v719_v30 = vsel %vm649_vm2, %v716_v7, %v718_v38 }
  0x32   : > { %981 = vmatpush.bf16.msrb.mxu1 %v3356_v14  ;;  %1648 = vmatpush.bf16.msrb.mxu0 %v3388_v32  ;;  %v357_v32 = vmul.f32 %v3530_v4, %v299_v52  ;;  %v358_v21 = vmul.f32 %v3530_v4, %v300_v8  ;;  %v3846_v14 = vpack.c.bf16 %v679_v29, %v3735_v17  ;;  %v3848_v7 = vmax.f32 %v404_v18, 0.0  ;;  %v3354_v17 = vld [vmem:[%s4930_s1 + $0x20] sm:$0xff] }
  0x33   : > { %v459_v2 = vmax.f32 %v405_v27, 0.0  ;;  %v359_v38 = vmul.f32 %v3530_v4, %v301_v23  ;;  %v3853_v53 = vpack.c.bf16 %v699_v0, %v697_v62  ;;  %v657_v20 = vsel %vm649_vm2, %v655_v39, %v656_v34 }
  0x34   : > { %1265 = vmatpush.bf16.msrb.mxu2 %v3371_v49  ;;  %v312_v49 = vld [vmem:[%s3538_s10 + $0x158] sm:$0xff]  ;;  %v659_v27 = vsel %vm649_vm2, %v656_v34, %v658_v16  ;;  %v3858_v52 = vadd.f32 %v3543_v6, %v357_v32  ;;  %v3860_v8 = vpack.c.bf16 %v719_v30, %v717_v35  ;;  %v5029_v23 = vmax.f32 %v3811_v51, 0.0  ;;  %v3386_v30 = vld [vmem:[%s4930_s1 + $0x120] sm:$0xff] }
  0x35   : > { %1452 = vmatpush.bf16.msrb.mxu3 %v3379_v50  ;;  %v313_v50 = vld [vmem:[%s3538_s10 + $0x160] sm:$0x3]  ;;  %5026 = vst [vmem:[#allocation18_spill] sm:$0xff] %v3853_v53  ;;  %v417_v34 = vadd.f32 %v3543_v6, %v359_v38  ;;  %v369_v39 = vmul.f32 %v3530_v4, %v311_v37  ;;  %v3878_v18 = vsel %vm508_vm1, %v459_v2, 0.0  ;;  %v416_v62 = vadd.f32 %v3543_v6, %v358_v21  ;;  %v3369_v37 = vld [vmem:[%s4930_s1 + $0x98] sm:$0xff] }
  0x36   : > { %5027 = vst [vmem:[#allocation19_spill] sm:$0xff] %v3858_v52  ;;  %982 = vmatpush.bf16.msrb.mxu1 %v3355_v19  ;;  %1649 = vmatpush.bf16.msrb.mxu0 %v3387_v33  ;;  %v3869_v29 = vsel %vm497_vm0, %v5029_v23, 0.0  ;;  %v370_v0 = vmul.f32 %v3530_v4, %v312_v49  ;;  %v371_v35 = vmul.f32 %v3530_v4, %v313_v50  ;;  %v3377_v16 = vld [vmem:[%s4930_s1 + $0xd8] sm:$0xff]  ;;  %v681_v33 = vrot.slane %v3848_v7, 1  ;;  %v277_v23 = vld [vmem:[%s3538_s10 + $0x40] sm:$0x3] }
  0x37   : > { %5028 = vst [vmem:[#allocation20_spill] sm:$0xff] %v3860_v8  ;;  %v3889_v19 = vpack.c.bf16 %v659_v27, %v657_v20  ;;  %v3894_v21 = vadd.f32 %v3543_v6, %v369_v39  ;;  %v680_v2 = vrot.slane %v3869_v29, 1  ;;  %v471_v32 = vmax.f32 %v417_v34, 0.0  ;;  %v276_v50 = vld [vmem:[%s3538_s10 + $0x38] sm:$0xff]  ;;  %v3368_v27 = vld [vmem:[%s4930_s1 + $0x90] sm:$0xff] }
  0x38   : > { %1266 = vmatpush.bf16.msrb.mxu2 %v3370_v43  ;;  %v4947_v43 = vmax.f32 %v3858_v52, 0.0  ;;  %v428_v38 = vadd.f32 %v3543_v6, %v370_v0  ;;  %v429_v49 = vadd.f32 %v3543_v6, %v371_v35  ;;  %v683_v20 = vrot.slane %v3878_v18, 1  ;;  %v3353_v39 = vld [vmem:[%s4930_s1 + $0x18] sm:$0xff] }
  0x39   : > { %1453 = vmatpush.bf16.msrb.mxu3 %v3378_v44  ;;  %5030 = vst [vmem:[#allocation21_spill] sm:$0xff] %v3894_v21  ;;  %v275_v44 = vld [vmem:[%s3538_s10 + $0x30] sm:$0xff]  ;;  %v3385_v34 = vld [vmem:[%s4930_s1 + $0x118] sm:$0xff]  ;;  %v3910_v0 = vmax.f32 %v416_v62, 0.0  ;;  %v3937_v54 = vsel %vm508_vm1, %v471_v32, 0.0 }
  0x3a   : > { %983 = vmatpush.bf16.msrb.mxu1 %v3354_v17  ;;  %1650 = vmatpush.bf16.msrb.mxu0 %v3386_v30  ;;  %v483_v35 = vmax.f32 %v429_v49, 0.0  ;;  %v333_v17 = vmul.f32 %v3530_v4, %v275_v44  ;;  %v3376_v30 = vld [vmem:[%s4930_s1 + $0xd0] sm:$0xff]  ;;  %v3925_v62 = vsel %vm497_vm0, %v4947_v43, 0.0  ;;  %v290_v44 = vld [vmem:[%s3538_s10 + $0xa8] sm:$0xff]  ;;  %v3933_v49 = vsel %vm649_vm2, %v680_v2, %v681_v33  ;;  %5033 = vst [vmem:[#allocation24_spill] sm:$0xff] %v3937_v54 }
  0x3b   : > { %5031 = vst [vmem:[#allocation22_spill] sm:$0xff] %v3910_v0  ;;  %876 = vmatmul.bf16.gmra.mxu1 %v3846_v14  ;;  %896 = vmatmul.bf16.gmra.mxu2 %v3853_v53  ;;  %v3939_v43 = vmax.f32 %v428_v38, 0.0  ;;  %v684_v2 = vsel %vm649_vm2, %v681_v33, %v683_v20  ;;  %v700_v12 = vrot.slane %v3925_v62, 1  ;;  %v701_v33 = vrot.slane %v3910_v0, 1  ;;  %v315_v53 = vld [vmem:[%s3538_s10 + $0x170] sm:$0xff] }
  0x3c   : > { %1267 = vmatpush.bf16.msrb.mxu2 %v3369_v37  ;;  %5032 = vst [vmem:[#allocation23_spill] sm:$0xff] %v3925_v62  ;;  %v334_v37 = vmul.f32 %v3530_v4, %v276_v50  ;;  %916 = vmatmul.bf16.gmra.mxu3 %v3860_v8  ;;  %v5035_v50 = vmax.f32 %v3894_v21, 0.0  ;;  %v3352_v8 = vld [vmem:[%s4930_s1 + $0x10] sm:$0xff]  ;;  %v3953_v45 = vsel %vm508_vm1, %v483_v35, 0.0  ;;  %v3956_v32 = vadd.f32 %v3543_v6, %v333_v17  ;;  %v292_v21 = vld [vmem:[%s3538_s10 + $0xb8] sm:$0x3] }
  0x3d   : > { %1454 = vmatpush.bf16.msrb.mxu3 %v3377_v16  ;;  %v335_v16 = vmul.f32 %v3530_v4, %v277_v23  ;;  %856 = vmatmul.bf16.gmra.mxu0 %v3889_v19  ;;  %5034 = vst [vmem:[#allocation25_spill] sm:$0xff] %v3939_v43  ;;  %v348_v35 = vmul.f32 %v3530_v4, %v290_v44  ;;  %v3375_v17 = vld [vmem:[%s4930_s1 + $0xc8] sm:$0xff]  ;;  %v304_v62 = vld [vmem:[%s3538_s10 + $0x118] sm:$0x3] }
  0x3e   : > { %v3945_v23 = vsel %vm497_vm0, %v5035_v50, 0.0  ;;  %5037 = vst [vmem:[#allocation27_spill] sm:$0xff] %v3953_v45  ;;  %v392_v38 = vadd.f32 %v3543_v6, %v334_v37  ;;  %984 = vmatpush.bf16.msrb.mxu1 %v3353_v39  ;;  %1651 = vmatpush.bf16.msrb.mxu0 %v3385_v34  ;;  %v291_v50 = vld [vmem:[%s3538_s10 + $0xb0] sm:$0xff]  ;;  %v302_v39 = vld [vmem:[%s3538_s10 + $0x108] sm:$0xff]  ;;  %v703_v37 = vrot.slane %v3937_v54, 1  ;;  %v350_v63 = vmul.f32 %v3530_v4, %v292_v21 }
  0x3f   : > { %5036 = vst [vmem:[#allocation26_spill] sm:$0xff] %v3945_v23  ;;  %v393_v20 = vadd.f32 %v3543_v6, %v335_v16  ;;  %v3367_v34 = vld [vmem:[%s4930_s1 + $0x88] sm:$0xff]  ;;  %v720_v5 = vrot.slane %v3945_v23, 1  ;;  %v4966_v16 = vmax.f32 %v3956_v32, 0.0  ;;  %v362_v52 = vmul.f32 %v3530_v4, %v304_v62 }
  0x40   : > { %1268 = vmatpush.bf16.msrb.mxu2 %v3368_v27  ;;  %v3978_v9 = vmax.f32 %v392_v38, 0.0  ;;  %v721_v27 = vrot.slane %v3939_v43, 1  ;;  %v349_v38 = vmul.f32 %v3530_v4, %v291_v50  ;;  %v360_v43 = vmul.f32 %v3530_v4, %v302_v39  ;;  %v3351_v21 = vld [vmem:[%s4930_s1 + $0x8] sm:$0xff]  ;;  %v3366_v39 = vld [vmem:[%s4930_s1 + $0x80] sm:$0xff] }
  0x41   : > { %1455 = vmatpush.bf16.msrb.mxu3 %v3376_v30  ;;  %v723_v30 = vrot.slane %v3953_v45, 1  ;;  %v447_v44 = vmax.f32 %v393_v20, 0.0  ;;  %v3989_v54 = vsel %vm497_vm0, %v4966_v16, 0.0  ;;  %v3383_v20 = vld [vmem:[%s4930_s1 + $0x108] sm:$0xff]  ;;  %v4006_v50 = vadd.f32 %v3543_v6, %v348_v35 }
  0x42   : > { %v661_v23 = vrot.slane %v3978_v9, 1  ;;  %985 = vmatpush.bf16.msrb.mxu1 %v3352_v8  ;;  %1652 = vmatpush.bf16.msrb.mxu0 %v3384_v13  ;;  %v660_v8 = vrot.slane %v3989_v54, 1  ;;  %v408_v13 = vadd.f32 %v3543_v6, %v350_v63  ;;  %v702_v45 = vsel %vm649_vm2, %v700_v12, %v701_v33 }
  0x43   : > { %v4002_v16 = vsel %vm508_vm1, %v447_v44, 0.0  ;;  %v3374_v44 = vld [vmem:[%s4930_s1 + $0xc0] sm:$0xff]  ;;  %v361_v35 = vmul.f32 %v3530_v4, %v303_v48  ;;  %v704_v63 = vsel %vm649_vm2, %v701_v33, %v703_v37  ;;  %v4023_v11 = vadd.f32 %v3543_v6, %v360_v43  ;;  %v316_v48 = vld [vmem:[%s3538_s10 + $0x178] sm:$0x3] }
  0x44   : > { %1269 = vmatpush.bf16.msrb.mxu2 %v3367_v34  ;;  %v663_v0 = vrot.slane %v4002_v16, 1  ;;  %v722_v34 = vsel %vm649_vm2, %v720_v5, %v721_v27  ;;  %v662_v1 = vsel %vm649_vm2, %v660_v8, %v661_v23  ;;  %v407_v25 = vadd.f32 %v3543_v6, %v349_v38  ;;  %v3350_v5 = vld [vmem:[%s4930_s1] sm:$0xff] }
  0x45   : > { %1456 = vmatpush.bf16.msrb.mxu3 %v3375_v17  ;;  %v724_v17 = vsel %vm649_vm2, %v721_v27, %v723_v30  ;;  %v3382_v43 = vld [vmem:[%s4930_s1 + $0x100] sm:$0xff]  ;;  %v4038_v62 = vpack.c.bf16 %v684_v2, %v3933_v49  ;;  %v4980_v33 = vmax.f32 %v4006_v50, 0.0  ;;  %v4042_v37 = vpack.c.bf16 %v704_v63, %v702_v45 }
  0x46   : > { %v664_v12 = vsel %vm649_vm2, %v661_v23, %v663_v0  ;;  %986 = vmatpush.bf16.msrb.mxu1 %v3351_v21  ;;  %1653 = vmatpush.bf16.msrb.mxu0 %v3383_v20  ;;  %v462_v0 = vmax.f32 %v408_v13, 0.0  ;;  %v420_v23 = vadd.f32 %v3543_v6, %v362_v52  ;;  %v419_v27 = vadd.f32 %v3543_v6, %v361_v35  ;;  %v278_v52 = vld [vmem:[%s3538_s10 + $0x48] sm:$0xff] }
  0x47   : > { %5038 = vst [vmem:[#allocation28_spill] sm:$0xff] %v4038_v62  ;;  %v4979_v30 = vmax.f32 %v4023_v11, 0.0  ;;  %v372_v38 = vmul.f32 %v3530_v4, %v314_v57  ;;  %v4047_v21 = vpack.c.bf16 %v724_v17, %v722_v34  ;;  %v4049_v49 = vpack.c.bf16 %v664_v12, %v662_v1 }
  0x48   : > { %1270 = vmatpush.bf16.msrb.mxu2 %v3366_v39  ;;  %v373_v2 = vmul.f32 %v3530_v4, %v315_v53  ;;  %v374_v20 = vmul.f32 %v3530_v4, %v316_v48  ;;  %v4054_v8 = vmax.f32 %v407_v25, 0.0  ;;  %v474_v13 = vmax.f32 %v420_v23, 0.0  ;;  %v279_v39 = vld [vmem:[%s3538_s10 + $0x50] sm:$0xff]  ;;  %v3413_v23 = vld [vmem:[%s4930_s1 + $0x1f8] sm:$0xff] }
  0x49   : > { %1457 = vmatpush.bf16.msrb.mxu3 %v3374_v44  ;;  %5039 = vst [vmem:[#allocation29_spill] sm:$0xff] %v4047_v21  ;;  %v4057_v45 = vadd.f32 %v3543_v6, %v372_v38  ;;  %v280_v44 = vld [vmem:[%s3538_s10 + $0x58] sm:$0x3]  ;;  %v4065_v57 = vsel %vm497_vm0, %v4980_v33, 0.0  ;;  %v4069_v53 = vsel %vm508_vm1, %v462_v0, 0.0  ;;  %v4075_v35 = vmax.f32 %v419_v27, 0.0 }
  0x4a   : > { %987 = vmatpush.bf16.msrb.mxu1 %v3350_v5  ;;  %1654 = vmatpush.bf16.msrb.mxu0 %v3382_v43  ;;  %v431_v25 = vadd.f32 %v3543_v6, %v373_v2  ;;  %v432_v1 = vadd.f32 %v3543_v6, %v374_v20  ;;  %v4081_v63 = vsel %vm497_vm0, %v4979_v30, 0.0  ;;  %v336_v17 = vmul.f32 %v3530_v4, %v278_v52  ;;  %v3405_v0 = vld [vmem:[%s4930_s1 + $0x1b8] sm:$0xff] }
  0x4b   : > { %5040 = vst [vmem:[#allocation30_spill] sm:$0xff] %v4057_v45  ;;  %881 = vmatmul.bf16.gmra.mxu1 %v4038_v62  ;;  %901 = vmatmul.bf16.gmra.mxu2 %v4042_v37  ;;  %v4978_v34 = vmax.f32 %v4057_v45, 0.0  ;;  %v337_v5 = vmul.f32 %v3530_v4, %v279_v39  ;;  %v338_v43 = vmul.f32 %v3530_v4, %v280_v44  ;;  %v3397_v27 = vld [vmem:[%s4930_s1 + $0x178] sm:$0xff]  ;;  %v4102_v38 = vsel %vm508_vm1, %v474_v13, 0.0 }
  0x4c   : > { %5041 = vst [vmem:[#allocation31_spill] sm:$0xff] %v4081_v63  ;;  %921 = vmatmul.bf16.gmra.mxu3 %v4047_v21  ;;  %v4087_v12 = vmax.f32 %v431_v25, 0.0  ;;  %v486_v48 = vmax.f32 %v432_v1, 0.0  ;;  %v4111_v2 = vadd.f32 %v3543_v6, %v336_v17  ;;  %v3421_v20 = vld [vmem:[%s4930_s1 + $0x238] sm:$0xff]  ;;  %v685_v52 = vrot.slane %v4065_v57, 1  ;;  %2028 = vmatpush.bf16.msra.mxu2 %v3405_v0 }
  0x4d   : > { %861 = vmatmul.bf16.gmra.mxu0 %v4049_v49  ;;  %5043 = vst [vmem:[#allocation33_spill] sm:$0xff] %v4102_v38  ;;  %v4108_v4 = vsel %vm497_vm0, %v4978_v34, 0.0  ;;  %v686_v39 = vrot.slane %v4054_v8, 1  ;;  %v688_v13 = vrot.slane %v4069_v53, 1  ;;  %2225 = vmatpush.bf16.msra.mxu3 %v3413_v23  ;;  %v705_v25 = vrot.slane %v4081_v63, 1 }
  0x4e   : > { %5042 = vst [vmem:[#allocation32_spill] sm:$0xff] %v4087_v12  ;;  %v4121_v44 = vsel %vm508_vm1, %v486_v48, 0.0  ;;  %v395_v1 = vadd.f32 %v3543_v6, %v337_v5  ;;  %v396_v17 = vadd.f32 %v3543_v6, %v338_v43  ;;  %v4986_v34 = vmax.f32 %v4111_v2, 0.0  ;;  %1841 = vmatpush.bf16.msra.mxu1 %v3397_v27  ;;  %2419 = vmatpush.bf16.msra.mxu0 %v3421_v20 }
  0x4f   : > { %5044 = vst [vmem:[#allocation34_spill] sm:$0xff] %v4108_v4  ;;  %v706_v30 = vrot.slane %v4075_v35, 1  ;;  %v708_v33 = vrot.slane %v4102_v38, 1  ;;  %v725_v45 = vrot.slane %v4108_v4, 1  ;;  %v726_v48 = vrot.slane %v4087_v12, 1 }
  0x50   : > { %5045 = vst [vmem:[#allocation35_spill] sm:$0xff] %v4121_v44  ;;  %v728_v0 = vrot.slane %v4121_v44, 1  ;;  %v4132_v23 = vmax.f32 %v395_v1, 0.0  ;;  %v450_v21 = vmax.f32 %v396_v17, 0.0  ;;  %v4138_v6 = vsel %vm497_vm0, %v4986_v34, 0.0 }
  0x51   : > { %v665_v5 = vrot.slane %v4138_v6, 1  ;;  %v687_v43 = vsel %vm649_vm2, %v685_v52, %v686_v39  ;;  %v689_v1 = vsel %vm649_vm2, %v686_v39, %v688_v13  ;;  %v707_v17 = vsel %vm649_vm2, %v705_v25, %v706_v30  ;;  %v3420_v25 = vld [vmem:[%s4930_s1 + $0x230] sm:$0xff] }
  0x52   : > { %v4144_v27 = vsel %vm508_vm1, %v450_v21, 0.0  ;;  %v666_v20 = vrot.slane %v4132_v23, 1  ;;  %v709_v44 = vsel %vm649_vm2, %v706_v30, %v708_v33  ;;  %v727_v34 = vsel %vm649_vm2, %v725_v45, %v726_v48  ;;  %2420 = vmatpush.bf16.msra.mxu0 %v3420_v25 }
  0x53   : > { %v668_v4 = vrot.slane %v4144_v27, 1  ;;  %v729_v12 = vsel %vm649_vm2, %v726_v48, %v728_v0  ;;  %v4155_v21 = vpack.c.bf16 %v689_v1, %v687_v43  ;;  %v4157_v38 = vpack.c.bf16 %v709_v44, %v707_v17  ;;  %v3396_v44 = vld [vmem:[%s4930_s1 + $0x170] sm:$0xff] }
  0x54   : > { %v667_v52 = vsel %vm649_vm2, %v665_v5, %v666_v20  ;;  %v4159_v63 = vpack.c.bf16 %v729_v12, %v727_v34  ;;  %v5047_v33 = vmov 0.0   ;;  %v4992_v34 = vmov 0.0|0.0   ;;  %v3412_v12 = vld [vmem:[%s4930_s1 + $0x1f0] sm:$0xff]  ;;  %1842 = vmatpush.bf16.msra.mxu1 %v3396_v44 }
  0x55   : > { %v669_v10 = vsel %vm649_vm2, %v666_v20, %v668_v4  ;;  %5046 = vst [vmem:[#allocation36_spill] sm:$0xff] %v4155_v21  ;;  %v1070_v30 = vrot.slane %v5047_v33, 2  ;;  %v5049_v4 = vmax.f32 %v3770_v58, 0.0  ;;  %v3404_v58 = vld [vmem:[%s4930_s1 + $0x1b0] sm:$0xff]  ;;  %2226 = vmatpush.bf16.msra.mxu3 %v3412_v12  ;;  %v1076_v48 = vrot.slane %v3799_v56, 2  ;;  %v3419_v12 = vld [vmem:[%s4930_s1 + $0x228] sm:$0xff] }
  0x56   : > { %v4161_v39 = vpack.c.bf16 %v669_v10, %v667_v52  ;;  %2029 = vmatpush.bf16.msra.mxu2 %v3404_v58  ;;  %v1078_v0 = vrot.slane %v3820_v61, 2  ;;  %v5052_v1 = vmax.f32 %v3956_v32, 0.0  ;;  %v1080_v61 = vrot.slane %v3989_v54, 2  ;;  %v3411_v54 = vld [vmem:[%s4930_s1 + $0x1e8] sm:$0xff]  ;;  %2421 = vmatpush.bf16.msra.mxu0 %v3419_v12 }
  0x57   : > { %v4168_v45 = vpack.c.bf16 %v1070_v30, %v1070_v30  ;;  %v2874_v13 = vpack.c.bf16 %v3799_v56, %v5049_v4  ;;  %v1081_v56 = vrot.slane %v3978_v9, 2  ;;  %v5053_v30 = vmax.f32 %v4111_v2, 0.0 }
  0x58   : > { %v1079_v43 = vsel %vm1069_vm5, %v1076_v48, %v1078_v0  ;;  %v4206_v17 = vpack.c.bf16 %v3978_v9, %v5052_v1  ;;  %v3403_v9 = vld [vmem:[%s4930_s1 + $0x1a8] sm:$0xff]  ;;  %v1085_v2 = vrot.slane %v4138_v6, 2  ;;  %v1088_v58 = vrot.slane %v4144_v27, 2 }
  0x59   : > { %5048 = vst [vmem:[#allocation37_spill] sm:$0xff] %v4168_v45  ;;  %v1082_v32 = vsel %vm1069_vm5, %v1080_v61, %v1081_v56  ;;  %v4225_v4 = vpack.c.bf16 %v4132_v23, %v5053_v30  ;;  %2227 = vmatpush.bf16.msra.mxu3 %v3411_v54  ;;  %v1091_v27 = vrot.slane %v3579_v31, 2  ;;  %v5055_v61 = vmax.f32 %v3654_v15, 0.0 }
  0x5a   : > { %2030 = vmatpush.bf16.msra.mxu2 %v3403_v9  ;;  %v1095_v30 = vrot.slane %v3679_v36, 2  ;;  %v1096_v9 = vrot.slane %v3670_v28, 2  ;;  %v1098_v54 = vrot.slane %v3697_v55, 2  ;;  %v5058_v55 = vmax.f32 %v3811_v51, 0.0 }
  0x5b   : > { %886 = vmatmul.bf16.gmra.mxu1 %v4155_v21  ;;  %906 = vmatmul.bf16.gmra.mxu2 %v4157_v38 }
  0x5c   : > { %926 = vmatmul.bf16.gmra.mxu3 %v4159_v63 }
  0x5d   : > { %866 = vmatmul.bf16.gmra.mxu0 %v4161_v39 }
  0x6b   : > { %988 = vmatmul.bf16.vlgmr.msrb.gmra.mxu1 %v4992_v34  ;;  %1271 = vmatmul.bf16.vlgmr.msrb.gmra.mxu2 %v4168_v45  ;;  %v5068_v45 = vmax.f32 %v3573_v26, 0.0 }
  0x6c   : > { %3016 = vmatmul.msk.bf16.vlgmr.msrb.gmra.mxu3 %vm4175_vm4, %v2874_v13 }
  0x6d   : > { %1655 = vmatmul.bf16.vlgmr.msrb.gmra.mxu0 %v3889_v19  ;;  %v1075_v19 = vrot.slane %v3808_v24, 2  ;;  %v1083_v24 = vrot.slane %v4002_v16, 2  ;;  %v3395_v16 = vld [vmem:[%s4930_s1 + $0x168] sm:$0xff] }
  0x6e   : > { %1843 = vmatpush.bf16.msra.mxu1 %v3395_v16 }
  0x6f   : > { %v1077_v5 = vsel %vm1069_vm5, %v1075_v19, %v1076_v48  ;;  %v1084_v52 = vsel %vm1069_vm5, %v1081_v56, %v1083_v24  ;;  %v5054_v48 = vmax.f32 %v3565_v22, 0.0  ;;  %v1093_v22 = vrot.slane %v3596_v41, 2 }
  0x70   : > { %v4201_v20 = vpack.c.bf16 %v1079_v43, %v1077_v5  ;;  %v4220_v33 = vpack.c.bf16 %v1084_v52, %v1082_v32  ;;  %v4279_v56 = vpack.c.bf16 %v3670_v28, %v5055_v61  ;;  %v3394_v32 = vld [vmem:[%s4930_s1 + $0x160] sm:$0xff] }
  0x71   : > { %v4257_v6 = vpack.c.bf16 %v3579_v31, %v5054_v48  ;;  %v1094_v5 = vsel %vm1069_vm5, %v1091_v27, %v1093_v22  ;;  %v3402_v31 = vld [vmem:[%s4930_s1 + $0x1a0] sm:$0xff]  ;;  %v1100_v22 = vrot.slane %v3869_v29, 2  ;;  %v5063_v29 = vmax.f32 %v4006_v50, 0.0  ;;  %v3401_v50 = vld [vmem:[%s4930_s1 + $0x198] sm:$0xff] }
  0x72   : > { %2031 = vmatpush.bf16.msra.mxu2 %v3402_v31  ;;  %1844 = vmatpush.bf16.msra.mxu1 %v3394_v32 }
  0x76   : > { %2032 = vmatpush.bf16.msra.mxu2 %v3401_v50 }
  0x7b   : > { %2875 = vmatmul.msk.bf16.gmra.mxu1 %vm4175_vm4, %v2874_v13  ;;  %1276 = vmatmul.bf16.gmra.mxu2 %v4201_v20  ;;  %v1086_v13 = vrot.slane %v4132_v23, 2  ;;  %v1090_v23 = vrot.slane %v3592_v40, 2  ;;  %v3410_v40 = vld [vmem:[%s4930_s1 + $0x1e0] sm:$0xff] }
  0x7c   : > { %3019 = vmatmul.msk.bf16.gmra.mxu3 %vm4175_vm4, %v4206_v17 }
  0x7d   : > { %1660 = vmatmul.bf16.gmra.mxu0 %v4049_v49  ;;  %v1087_v44 = vsel %vm1069_vm5, %v1085_v2, %v1086_v13  ;;  %v1089_v25 = vsel %vm1069_vm5, %v1086_v13, %v1088_v58  ;;  %v1092_v0 = vsel %vm1069_vm5, %v1090_v23, %v1091_v27  ;;  %2228 = vmatpush.bf16.msra.mxu3 %v3410_v40  ;;  %v3418_v2 = vld [vmem:[%s4930_s1 + $0x220] sm:$0xff] }
  0x7e   : > { %v4252_v19 = vpack.c.bf16 %v1089_v25, %v1087_v44  ;;  %v4272_v43 = vpack.c.bf16 %v1094_v5, %v1092_v0  ;;  %2422 = vmatpush.bf16.msra.mxu0 %v3418_v2  ;;  %v1097_v13 = vsel %vm1069_vm5, %v1095_v30, %v1096_v9  ;;  %v1099_v58 = vsel %vm1069_vm5, %v1096_v9, %v1098_v54  ;;  %v3409_v2 = vld [vmem:[%s4930_s1 + $0x1d8] sm:$0xff] }
  0x7f   : > { %v4320_v36 = vpack.c.bf16 %v1099_v58, %v1097_v13  ;;  %v4327_v25 = vpack.c.bf16 %v3848_v7, %v5058_v55  ;;  %v1101_v0 = vrot.slane %v3848_v7, 2  ;;  %v1103_v5 = vrot.slane %v3878_v18, 2 }
  0x80   : > { %v4363_v7 = vpack.c.bf16 %v4054_v8, %v5063_v29  ;;  %v3417_v29 = vld [vmem:[%s4930_s1 + $0x218] sm:$0xff] }
  0x81   : > { %5059 = vst [vmem:[#allocation40_spill] sm:$0xff] %v4327_v25  ;;  %v1102_v31 = vsel %vm1069_vm5, %v1100_v22, %v1101_v0  ;;  %v1104_v40 = vsel %vm1069_vm5, %v1101_v0, %v1103_v5  ;;  %2229 = vmatpush.bf16.msra.mxu3 %v3409_v2  ;;  %v1105_v22 = vrot.slane %v4065_v57, 2  ;;  %v1106_v0 = vrot.slane %v4054_v8, 2 }
  0x82   : > { %v4356_v9 = vpack.c.bf16 %v1104_v40, %v1102_v31  ;;  %5064 = vst [vmem:[#allocation44_spill] sm:$0xff] %v4363_v7  ;;  %v1108_v5 = vrot.slane %v4069_v53, 2  ;;  %v3393_v40 = vld [vmem:[%s4930_s1 + $0x158] sm:$0xff]  ;;  %2423 = vmatpush.bf16.msra.mxu0 %v3417_v29 }
  0x83   : > { %1845 = vmatpush.bf16.msra.mxu1 %v3393_v40  ;;  %v1107_v50 = vsel %vm1069_vm5, %v1105_v22, %v1106_v0  ;;  %v1113_v40 = vrot.slane %v3611_v47, 2 }
  0x84   : > { %5062 = vst [vmem:[#allocation43_spill] sm:$0xff] %v4356_v9  ;;  %v1109_v57 = vsel %vm1069_vm5, %v1106_v0, %v1108_v5  ;;  %v1110_v0 = vrot.slane %v3607_v46, 2  ;;  %v1111_v5 = vrot.slane %v3598_v42, 2  ;;  %v5076_v46 = vld [vmem:[#allocation11_spill] sm:$0xff] }
  0x85   : > { %v4404_v53 = vpack.c.bf16 %v1109_v57, %v1107_v50 }
  0x86   : > { %v1112_v50 = vsel %vm1069_vm5, %v1110_v0, %v1111_v5  ;;  %v1114_v57 = vsel %vm1069_vm5, %v1111_v5, %v1113_v40  ;;  %v5077_v0 = vld [vmem:[#allocation18_spill] sm:$0xff] }
  0x87   : > { %5067 = vst [vmem:[#allocation47_spill] sm:$0xff] %v4404_v53 }
  0x8b   : > { %2878 = vmatmul.msk.bf16.gmra.mxu1 %vm4175_vm4, %v4206_v17  ;;  %1281 = vmatmul.bf16.gmra.mxu2 %v4220_v33 }
  0x8c   : > { %3022 = vmatmul.msk.bf16.gmra.mxu3 %vm4175_vm4, %v4225_v4 }
  0x8d   : > { %1665 = vmatmul.bf16.gmra.mxu0 %v4161_v39 }
  0x9b   : > { %2881 = vmatmul.msk.bf16.gmra.mxu1 %vm4175_vm4, %v4225_v4  ;;  %1286 = vmatmul.bf16.gmra.mxu2 %v4252_v19 }
  0x9c   : > { %3025 = vmatmul.msk.bf16.gmra.mxu3 %vm4175_vm4, %v4257_v6 }
  0x9d   : > { %1670 = vmatmul.bf16.gmra.mxu0 %v3706_v59 }
  0xa8   : > { %v4274_v1 = vpop.f32.mrf.mxu1 }
  0xaa   : > { %v4281_v24 = vpop.f32.mrf.mxu0 }
  0xab   : > { %2884 = vmatmul.msk.bf16.gmra.mxu1 %vm4175_vm4, %v4257_v6  ;;  %1291 = vmatmul.bf16.gmra.mxu2 %v4272_v43 }
  0xac   : > { %3028 = vmatmul.msk.bf16.gmra.mxu3 %vm4175_vm4, %v4279_v56 }
  0xad   : > { %1675 = vmatmul.bf16.gmra.mxu0 %v3846_v14 }
  0xae   : > { %v4297_v41 = vpop.f32.mrf.mxu2 }
  0xaf   : > { %v4299_v15 = vpop.f32.mrf.mxu3 }
  0xb0   : > { %5056 = vst [vmem:[#allocation38_spill] sm:$0xff] %v4299_v15  ;;  %v4304_v52 = vpop.f32.mrf.mxu1 }
  0xb2   : > { %v4309_v16 = vpop.f32.mrf.mxu0 }
  0xb6   : > { %v4316_v12 = vpop.f32.mrf.mxu2 }
  0xb7   : > { %v4318_v44 = vpop.f32.mrf.mxu3 }
  0xb8   : > { %5057 = vst [vmem:[#allocation39_spill] sm:$0xff] %v4318_v44  ;;  %v4322_v28 = vpop.f32.mrf.mxu1 }
  0xba   : > { %v4329_v48 = vpop.f32.mrf.mxu0 }
  0xbb   : > { %2887 = vmatmul.msk.bf16.gmra.mxu1 %vm4175_vm4, %v4279_v56  ;;  %1296 = vmatmul.bf16.gmra.mxu2 %v4320_v36 }
  0xbc   : > { %3031 = vmatmul.msk.bf16.gmra.mxu3 %vm4175_vm4, %v4327_v25 }
  0xbd   : > { %1680 = vmatmul.bf16.gmra.mxu0 %v4038_v62  ;;  %v5082_v62 = vld [vmem:[#allocation22_spill] sm:$0xff] }
  0xbe   : > { %v4339_v23 = vpop.f32.mrf.mxu2 }
  0xbf   : > { %v4341_v51 = vpop.f32.mrf.mxu3 }
  0xc0   : > { %5060 = vst [vmem:[#allocation41_spill] sm:$0xff] %v4341_v51  ;;  %v4343_v27 = vpop.f32.mrf.mxu1  ;;  %v4440_v51 = vpack.c.bf16 %v1114_v57, %v1112_v50  ;;  %v5078_v50 = vld [vmem:[#allocation9_spill] sm:$0xff] }
  0xc1   : > { %v1115_v57 = vrot.slane %v5078_v50, 2 }
  0xc2   : > { %v4348_v61 = vpop.f32.mrf.mxu0  ;;  %5073 = vst [vmem:[#allocation52_spill] sm:$0xff] %v4440_v51 }
  0xc6   : > { %v4352_v32 = vpop.f32.mrf.mxu2 }
  0xc7   : > { %v4354_v30 = vpop.f32.mrf.mxu3 }
  0xc8   : > { %5061 = vst [vmem:[#allocation42_spill] sm:$0xff] %v4354_v30  ;;  %v4358_v54 = vpop.f32.mrf.mxu1 }
  0xca   : > { %v4365_v18 = vpop.f32.mrf.mxu0 }
  0xcb   : > { %2890 = vmatmul.msk.bf16.gmra.mxu1 %vm4175_vm4, %v4327_v25  ;;  %1301 = vmatmul.bf16.gmra.mxu2 %v4356_v9  ;;  %v3392_v9 = vld [vmem:[%s4930_s1 + $0x150] sm:$0xff] }
  0xcc   : > { %3034 = vmatmul.msk.bf16.gmra.mxu3 %vm4175_vm4, %v4363_v7  ;;  %1846 = vmatpush.bf16.msra.mxu1 %v3392_v9 }
  0xcd   : > { %1685 = vmatmul.bf16.gmra.mxu0 %v4155_v21 }
  0xce   : > { %v4381_v13 = vpop.f32.mrf.mxu2 }
  0xcf   : > { %v4383_v58 = vpop.f32.mrf.mxu3 }
  0xd0   : > { %5065 = vst [vmem:[#allocation45_spill] sm:$0xff] %v4383_v58  ;;  %v4385_v55 = vpop.f32.mrf.mxu1  ;;  %v4411_v58 = vpack.c.bf16 %v3598_v42, %v5068_v45 }
  0xd2   : > { %v4390_v31 = vpop.f32.mrf.mxu0  ;;  %5069 = vst [vmem:[#allocation48_spill] sm:$0xff] %v4411_v58 }
  0xd6   : > { %v4400_v2 = vpop.f32.mrf.mxu2 }
  0xd7   : > { %v4402_v8 = vpop.f32.mrf.mxu3 }
  0xd8   : > { %5066 = vst [vmem:[#allocation46_spill] sm:$0xff] %v4402_v8  ;;  %v4406_v34 = vpop.f32.mrf.mxu1 }
  0xda   : > { %v4413_v30 = vpop.f32.mrf.mxu0 }
  0xdb   : > { %2893 = vmatmul.msk.bf16.gmra.mxu1 %vm4175_vm4, %v4363_v7  ;;  %1306 = vmatmul.bf16.gmra.mxu2 %v4404_v53  ;;  %v5074_v53 = vld [vmem:[#allocation8_spill] sm:$0xff] }
  0xdc   : > { %3037 = vmatmul.msk.bf16.gmra.mxu3 %vm4175_vm4, %v4411_v58  ;;  %v5075_v21 = vmax.f32 %v5074_v53, 0.0 }
  0xdd   : > { %1690 = vmatmul.bf16.gmra.mxu0 %v3708_v60 }
  0xde   : > { %v4423_v22 = vpop.f32.mrf.mxu2  ;;  %v4445_v7 = vpack.c.bf16 %v5076_v46, %v5075_v21  ;;  %v3400_v21 = vld [vmem:[%s4930_s1 + $0x190] sm:$0xff] }
  0xdf   : > { %v4425_v26 = vpop.f32.mrf.mxu3  ;;  %2033 = vmatpush.bf16.msra.mxu2 %v3400_v21 }
  0xe0   : > { %5070 = vst [vmem:[#allocation49_spill] sm:$0xff] %v4425_v26  ;;  %v4427_v45 = vpop.f32.mrf.mxu1 }
  0xe2   : > { %v4432_v29 = vpop.f32.mrf.mxu0 }
  0xe6   : > { %v4436_v8 = vpop.f32.mrf.mxu2 }
  0xe7   : > { %5071 = vst [vmem:[#allocation50_spill] sm:$0xff] %v4436_v8  ;;  %v4438_v60 = vpop.f32.mrf.mxu3 }
  0xe8   : > { %5072 = vst [vmem:[#allocation51_spill] sm:$0xff] %v4438_v60  ;;  %v989_v26 = vpop.f32.mrf.mxu1  ;;  %v1116_v60 = vrot.slane %v5076_v46, 2 }
  0xe9   : > { %v990_v42 = vadd.f32 %v989_v26, %v4281_v24  ;;  %v3408_v24 = vld [vmem:[%s4930_s1 + $0x1d0] sm:$0xff] }
  0xea   : > { %v1656_v47 = vpop.f32.mrf.mxu0  ;;  %2230 = vmatpush.bf16.msra.mxu3 %v3408_v24  ;;  %v1117_v46 = vsel %vm1069_vm5, %v1115_v57, %v1116_v60 }
  0xeb   : > { %2896 = vmatmul.msk.bf16.gmra.mxu1 %vm4175_vm4, %v4411_v58  ;;  %1311 = vmatmul.bf16.gmra.mxu2 %v4440_v51  ;;  %v5079_v51 = vld [vmem:[#allocation13_spill] sm:$0xff] }
  0xec   : > { %3040 = vmatmul.msk.bf16.gmra.mxu3 %vm4175_vm4, %v4445_v7 }
  0xed   : > { %1695 = vmatmul.bf16.gmra.mxu0 %v5077_v0  ;;  %v1118_v0 = vrot.slane %v5079_v51, 2 }
  0xee   : > { %v1272_v53 = vpop.f32.mrf.mxu2 }
  0xef   : > { %v1352_v26 = vadd.f32 %v1272_v53, %v990_v42  ;;  %v1459_v5 = vpop.f32.mrf.mxu3  ;;  %v3416_v42 = vld [vmem:[%s4930_s1 + $0x210] sm:$0xff]  ;;  %v1119_v51 = vsel %vm1069_vm5, %v1116_v60, %v1118_v0 }
  0xf0   : > { %v991_v40 = vpop.f32.mrf.mxu1  ;;  %2424 = vmatpush.bf16.msra.mxu0 %v3416_v42 }
  0xf1   : > { %v1539_v58 = vadd.f32 %v1459_v5, %v1352_v26  ;;  %v992_v44 = vadd.f32 %v991_v40, %v4309_v16  ;;  %v4476_v26 = vpack.c.bf16 %v1119_v51, %v1117_v46  ;;  %v5080_v40 = vld [vmem:[#allocation19_spill] sm:$0xff]  ;;  %v1121_v46 = vrot.slane %v5082_v62, 2  ;;  %v5085_v51 = vld [vmem:[#allocation24_spill] sm:$0xff] }
  0xf2   : > { %v1658_v15 = vpop.f32.mrf.mxu0  ;;  %v5081_v50 = vmax.f32 %v5080_v40, 0.0 }
  0xf3   : > { %v4472_v21 = vadd.f32 %v1656_v47, %v1539_v58 }
  0xf4   : > { %v4481_v25 = vpack.c.bf16 %v5082_v62, %v5081_v50  ;;  %v5087_v62 = vmax.f32 %v4023_v11, 0.0  ;;  %v3399_v11 = vld [vmem:[%s4930_s1 + $0x188] sm:$0xff] }
  0xf5   : > { %2034 = vmatpush.bf16.msra.mxu2 %v3399_v11 }
  0xf6   : > { %v1274_v24 = vpop.f32.mrf.mxu2 }
  0xf7   : > { %v1353_v53 = vadd.f32 %v1274_v24, %v992_v44  ;;  %v1461_v16 = vpop.f32.mrf.mxu3  ;;  %v1123_v24 = vrot.slane %v5085_v51, 2  ;;  %v4507_v51 = vpack.c.bf16 %v4075_v35, %v5087_v62  ;;  %v3415_v62 = vld [vmem:[%s4930_s1 + $0x208] sm:$0xff] }
  0xf8   : > { %v994_v5 = vpop.f32.mrf.mxu1  ;;  %2425 = vmatpush.bf16.msra.mxu0 %v3415_v62 }
  0xf9   : > { %v1540_v8 = vadd.f32 %v1461_v16, %v1353_v53  ;;  %v995_v9 = vadd.f32 %v994_v5, %v4329_v48  ;;  %v5084_v48 = vld [vmem:[#allocation23_spill] sm:$0xff]  ;;  %v1124_v40 = vsel %vm1069_vm5, %v1121_v46, %v1123_v24 }
  0xfa   : > { %v1661_v58 = vpop.f32.mrf.mxu0  ;;  %v1120_v42 = vrot.slane %v5084_v48, 2 }
  0xfb   : > { %2899 = vmatmul.msk.bf16.gmra.mxu1 %vm4175_vm4, %v4445_v7  ;;  %1316 = vmatmul.bf16.gmra.mxu2 %v4476_v26  ;;  %v4488_v60 = vadd.f32 %v1658_v15, %v1540_v8 }
  0xfc   : > { %3043 = vmatmul.msk.bf16.gmra.mxu3 %vm4175_vm4, %v4481_v25  ;;  %v1122_v5 = vsel %vm1069_vm5, %v1120_v42, %v1121_v46 }
  0xfd   : > { %5083 = vst [vmem:[#allocation8_spill] sm:$0xff] %v4488_v60  ;;  %1700 = vmatmul.bf16.gmra.mxu0 %v4042_v37  ;;  %v4502_v60 = vpack.c.bf16 %v1124_v40, %v1122_v5  ;;  %v5090_v5 = vld [vmem:[#allocation33_spill] sm:$0xff] }
  0xfe   : > { %v1277_v44 = vpop.f32.mrf.mxu2  ;;  %v1128_v40 = vrot.slane %v5090_v5, 2 }
  0xff   : > { %v1354_v47 = vadd.f32 %v1277_v44, %v995_v9  ;;  %v1464_v0 = vpop.f32.mrf.mxu3 }
 0x100   : > { %v996_v57 = vpop.f32.mrf.mxu1 }
 0x101   : > { %v1541_v53 = vadd.f32 %v1464_v0, %v1354_v47  ;;  %v997_v15 = vadd.f32 %v996_v57, %v4348_v61 }
 0x102   : > { %v1663_v8 = vpop.f32.mrf.mxu0 }
 0x103   : > { %v4498_v16 = vadd.f32 %v1661_v58, %v1541_v53  ;;  %v5089_v53 = vld [vmem:[#allocation31_spill] sm:$0xff] }
 0x105   : > { %5086 = vst [vmem:[#allocation11_spill] sm:$0xff] %v4498_v16  ;;  %v5102_v16 = vld [vmem:[#allocation15_spill] sm:$0xff] }
 0x106   : > { %v1279_v50 = vpop.f32.mrf.mxu2 }
 0x107   : > { %v1355_v9 = vadd.f32 %v1279_v50, %v997_v15  ;;  %v1466_v44 = vpop.f32.mrf.mxu3  ;;  %v1125_v15 = vrot.slane %v5089_v53, 2  ;;  %v5094_v53 = vld [vmem:[#allocation5_spill] sm:$0xff] }
 0x108   : > { %v999_v48 = vpop.f32.mrf.mxu1 }
 0x109   : > { %v1542_v47 = vadd.f32 %v1466_v44, %v1355_v9  ;;  %v1000_v61 = vadd.f32 %v999_v48, %v4365_v18  ;;  %v3407_v18 = vld [vmem:[%s4930_s1 + $0x1c8] sm:$0xff] }
 0x10a   : > { %v1666_v58 = vpop.f32.mrf.mxu0  ;;  %2231 = vmatpush.bf16.msra.mxu3 %v3407_v18  ;;  %v3391_v48 = vld [vmem:[%s4930_s1 + $0x148] sm:$0xff] }
 0x10b   : > { %2902 = vmatmul.msk.bf16.gmra.mxu1 %vm4175_vm4, %v4481_v25  ;;  %1321 = vmatmul.bf16.gmra.mxu2 %v4502_v60  ;;  %v4514_v0 = vadd.f32 %v1663_v8, %v1542_v47  ;;  %v1126_v8 = vrot.slane %v4075_v35, 2 }
 0x10c   : > { %3046 = vmatmul.msk.bf16.gmra.mxu3 %vm4175_vm4, %v4507_v51  ;;  %1847 = vmatpush.bf16.msra.mxu1 %v3391_v48 }
 0x10d   : > { %5088 = vst [vmem:[#allocation9_spill] sm:$0xff] %v4514_v0  ;;  %1705 = vmatmul.bf16.gmra.mxu0 %v4157_v38  ;;  %v1127_v35 = vsel %vm1069_vm5, %v1125_v15, %v1126_v8 }
 0x10e   : > { %v1282_v57 = vpop.f32.mrf.mxu2 }
 0x10f   : > { %v1356_v42 = vadd.f32 %v1282_v57, %v1000_v61  ;;  %v1469_v46 = vpop.f32.mrf.mxu3  ;;  %v1129_v61 = vsel %vm1069_vm5, %v1126_v8, %v1128_v40  ;;  %v5096_v8 = vld [vmem:[#allocation12_spill] sm:$0xff] }
 0x110   : > { %v1001_v24 = vpop.f32.mrf.mxu1  ;;  %v4540_v57 = vpack.c.bf16 %v1129_v61, %v1127_v35  ;;  %v1131_v61 = vrot.slane %v5094_v53, 2 }
 0x111   : > { %v1543_v50 = vadd.f32 %v1469_v46, %v1356_v42  ;;  %v1002_v9 = vadd.f32 %v1001_v24, %v4390_v31  ;;  %v5092_v46 = vld [vmem:[#allocation3_spill] sm:$0xff] }
 0x112   : > { %v1668_v44 = vpop.f32.mrf.mxu0  ;;  %v5093_v24 = vmax.f32 %v5092_v46, 0.0 }
 0x113   : > { %v4536_v47 = vadd.f32 %v1666_v58, %v1543_v50 }
 0x114   : > { %v4545_v5 = vpack.c.bf16 %v5094_v53, %v5093_v24 }
 0x115   : > { %5091 = vst [vmem:[#allocation13_spill] sm:$0xff] %v4536_v47 }
 0x116   : > { %v1284_v11 = vpop.f32.mrf.mxu2 }
 0x117   : > { %v1357_v18 = vadd.f32 %v1284_v11, %v1002_v9  ;;  %v1471_v31 = vpop.f32.mrf.mxu3  ;;  %v5098_v11 = vld [vmem:[#allocation7_spill] sm:$0xff] }
 0x118   : > { %v1004_v42 = vpop.f32.mrf.mxu1 }
 0x119   : > { %v1544_v0 = vadd.f32 %v1471_v31, %v1357_v18  ;;  %v1005_v48 = vadd.f32 %v1004_v42, %v4413_v30  ;;  %v5097_v30 = vld [vmem:[#allocation6_spill] sm:$0xff]  ;;  %v1133_v18 = vrot.slane %v5098_v11, 2 }
 0x11a   : > { %v1671_v58 = vpop.f32.mrf.mxu0  ;;  %v1130_v35 = vrot.slane %v5097_v30, 2 }
 0x11b   : > { %2905 = vmatmul.msk.bf16.gmra.mxu1 %vm4175_vm4, %v4507_v51  ;;  %1326 = vmatmul.bf16.gmra.mxu2 %v4540_v57  ;;  %v4552_v15 = vadd.f32 %v1668_v44, %v1544_v0  ;;  %v1134_v24 = vsel %vm1069_vm5, %v1131_v61, %v1133_v18 }
 0x11c   : > { %3049 = vmatmul.msk.bf16.gmra.mxu3 %vm4175_vm4, %v4545_v5  ;;  %v1132_v46 = vsel %vm1069_vm5, %v1130_v35, %v1131_v61 }
 0x11d   : > { %5095 = vst [vmem:[#allocation19_spill] sm:$0xff] %v4552_v15  ;;  %1710 = vmatmul.bf16.gmra.mxu0 %v5096_v8  ;;  %v4566_v47 = vpack.c.bf16 %v1134_v24, %v1132_v46  ;;  %v5100_v8 = vld [vmem:[#allocation14_spill] sm:$0xff]  ;;  %v1136_v46 = vrot.slane %v5102_v16, 2  ;;  %v5107_v24 = vld [vmem:[#allocation17_spill] sm:$0xff] }
 0x11e   : > { %v1287_v40 = vpop.f32.mrf.mxu2  ;;  %v5101_v53 = vmax.f32 %v5100_v8, 0.0  ;;  %v3398_v8 = vld [vmem:[%s4930_s1 + $0x180] sm:$0xff] }
 0x11f   : > { %v1358_v50 = vadd.f32 %v1287_v40, %v1005_v48  ;;  %v1474_v9 = vpop.f32.mrf.mxu3  ;;  %2035 = vmatpush.bf16.msra.mxu2 %v3398_v8 }
 0x120   : > { %v1006_v62 = vpop.f32.mrf.mxu1  ;;  %v4571_v11 = vpack.c.bf16 %v5102_v16, %v5101_v53 }
 0x121   : > { %v1545_v31 = vadd.f32 %v1474_v9, %v1358_v50  ;;  %v1007_v0 = vadd.f32 %v1006_v62, %v4432_v29  ;;  %v3406_v9 = vld [vmem:[%s4930_s1 + $0x1c0] sm:$0xff] }
 0x122   : > { %v1673_v44 = vpop.f32.mrf.mxu0  ;;  %5103 = vst [vmem:[#allocation23_spill] sm:$0xff] %v4571_v11  ;;  %2232 = vmatpush.bf16.msra.mxu3 %v3406_v9 }
 0x123   : > { %v4562_v42 = vadd.f32 %v1671_v58, %v1545_v31 }
 0x125   : > { %5099 = vst [vmem:[#allocation22_spill] sm:$0xff] %v4562_v42 }
 0x126   : > { %v1289_v15 = vpop.f32.mrf.mxu2 }
 0x127   : > { %v1359_v48 = vadd.f32 %v1289_v15, %v1007_v0  ;;  %v1476_v40 = vpop.f32.mrf.mxu3  ;;  %v5105_v15 = vld [vmem:[#allocation20_spill] sm:$0xff] }
 0x128   : > { %v1009_v30 = vpop.f32.mrf.mxu1  ;;  %v5106_v0 = vld [vmem:[#allocation16_spill] sm:$0xff] }
 0x129   : > { %v1546_v50 = vadd.f32 %v1476_v40, %v1359_v48  ;;  %v1010_v62 = vadd.f32 %v1009_v30, %v4274_v1  ;;  %v1138_v48 = vrot.slane %v5107_v24, 2  ;;  %v3414_v1 = vld [vmem:[%s4930_s1 + $0x200] sm:$0xff]  ;;  %v5110_v24 = vld [vmem:[#allocation21_spill] sm:$0xff] }
 0x12a   : > { %v1676_v29 = vpop.f32.mrf.mxu0  ;;  %2426 = vmatpush.bf16.msra.mxu0 %v3414_v1 }
 0x12b   : > { %2908 = vmatmul.msk.bf16.gmra.mxu1 %vm4175_vm4, %v4545_v5  ;;  %1331 = vmatmul.bf16.gmra.mxu2 %v4566_v47  ;;  %v4577_v58 = vadd.f32 %v1673_v44, %v1546_v50  ;;  %v1135_v44 = vrot.slane %v5106_v0, 2  ;;  %v3390_v50 = vld [vmem:[%s4930_s1 + $0x140] sm:$0xff]  ;;  %v1139_v16 = vsel %vm1069_vm5, %v1136_v46, %v1138_v48 }
 0x12c   : > { %3052 = vmatmul.msk.bf16.gmra.mxu3 %vm4175_vm4, %v4571_v11  ;;  %1848 = vmatpush.bf16.msra.mxu1 %v3390_v50  ;;  %v5112_v50 = vld [vmem:[#allocation25_spill] sm:$0xff] }
 0x12d   : > { %5104 = vst [vmem:[#allocation24_spill] sm:$0xff] %v4577_v58  ;;  %1715 = vmatmul.bf16.gmra.mxu0 %v5105_v15  ;;  %v1137_v8 = vsel %vm1069_vm5, %v1135_v44, %v1136_v46  ;;  %v5111_v58 = vmax.f32 %v5110_v24, 0.0 }
 0x12e   : > { %v1292_v35 = vpop.f32.mrf.mxu2 }
 0x12f   : > { %v1360_v61 = vadd.f32 %v1292_v35, %v1010_v62  ;;  %v1479_v18 = vpop.f32.mrf.mxu3  ;;  %v4609_v1 = vpack.c.bf16 %v5112_v50, %v5111_v58 }
 0x130   : > { %v1011_v31 = vpop.f32.mrf.mxu1 }
 0x131   : > { %v1547_v40 = vadd.f32 %v1479_v18, %v1360_v61  ;;  %v1012_v9 = vadd.f32 %v1011_v31, %v4304_v52  ;;  %v4604_v18 = vpack.c.bf16 %v1139_v16, %v1137_v8  ;;  %v5114_v31 = vld [vmem:[#allocation29_spill] sm:$0xff]  ;;  %v317_v8 = vld [vmem:[%s3538_s10 + $0x180] sm:$0xff]  ;;  %v319_v16 = vld [vmem:[%s3538_s10 + $0x190] sm:$0x3] }
 0x132   : > { %v1678_v53 = vpop.f32.mrf.mxu0 }
 0x133   : > { %v4599_v30 = vadd.f32 %v1676_v29, %v1547_v40  ;;  %5109 = vst [vmem:[#allocation33_spill] sm:$0xff] %v4604_v18 }
 0x135   : > { %5108 = vst [vmem:[#allocation31_spill] sm:$0xff] %v4599_v30  ;;  %v318_v30 = vld [vmem:[%s3538_s10 + $0x188] sm:$0xff]  ;;  %s3349_s10 = sshll.u32 %s5166_s22, 8 }
 0x136   : > { %v1294_v62 = vpop.f32.mrf.mxu2  ;;  %s4810_s9 = scalar_lea.vmem %s4933_s4, %s3349_s10 }
 0x137   : > { %v1361_v35 = vadd.f32 %v1294_v62, %v1012_v9  ;;  %v1481_v61 = vpop.f32.mrf.mxu3  ;;  %v5115_v62 = vld [vmem:[#allocation26_spill] sm:$0xff] }
 0x138   : > { %v1014_v0 = vpop.f32.mrf.mxu1 }
 0x139   : > { %v1548_v29 = vadd.f32 %v1481_v61, %v1361_v35  ;;  %v1015_v58 = vadd.f32 %v1014_v0, %v4322_v28  ;;  %v1140_v35 = vrot.slane %v5115_v62, 2  ;;  %v1141_v61 = vrot.slane %v5112_v50, 2 }
 0x13a   : > { %v1681_v40 = vpop.f32.mrf.mxu0 }
 0x13b   : > { %2911 = vmatmul.msk.bf16.gmra.mxu1 %vm4175_vm4, %v4571_v11  ;;  %1336 = vmatmul.bf16.gmra.mxu2 %v4604_v18  ;;  %v4615_v52 = vadd.f32 %v1678_v53, %v1548_v29  ;;  %v5116_v53 = vld [vmem:[#allocation27_spill] sm:$0xff] }
 0x13c   : > { %3055 = vmatmul.msk.bf16.gmra.mxu3 %vm4175_vm4, %v4609_v1  ;;  %v1143_v24 = vrot.slane %v5116_v53, 2 }
 0x13d   : > { %5113 = vst [vmem:[#allocation3_spill] sm:$0xff] %v4615_v52  ;;  %1720 = vmatmul.bf16.gmra.mxu0 %v5114_v31  ;;  %v3460_v31 = vld [vmem:[%s4931_s2] ss:$0 sm:$0xff] }
 0x13e   : > { %v1297_v44 = vpop.f32.mrf.mxu2  ;;  %v375_v28 = vmul.f32 %v3460_v31, %v317_v8  ;;  %v377_v0 = vmul.f32 %v3460_v31, %v319_v16  ;;  %v1144_v42 = vsel %vm1069_vm5, %v1141_v61, %v1143_v24  ;;  %v376_v50 = vmul.f32 %v3460_v31, %v318_v30  ;;  %v5118_v16 = vld [vmem:[#allocation30_spill] sm:$0xff] }
 0x13f   : > { %v1362_v46 = vadd.f32 %v1297_v44, %v1015_v58  ;;  %v1484_v48 = vpop.f32.mrf.mxu3  ;;  %v1142_v44 = vsel %vm1069_vm5, %v1140_v35, %v1141_v61  ;;  %v5120_v35 = vld [vmem:[#allocation32_spill] sm:$0xff] }
 0x140   : > { %v1016_v9 = vpop.f32.mrf.mxu1  ;;  %v4639_v8 = vpack.c.bf16 %v1144_v42, %v1142_v44 }
 0x141   : > { %v1549_v29 = vadd.f32 %v1484_v48, %v1362_v46  ;;  %v1017_v62 = vadd.f32 %v1016_v9, %v4343_v27  ;;  %v3461_v46 = vld [vmem:[%s4932_s3] ss:$0 sm:$0xff] }
 0x142   : > { %v1683_v52 = vpop.f32.mrf.mxu0  ;;  %v433_v48 = vadd.f32 %v3461_v46, %v375_v28  ;;  %v435_v53 = vadd.f32 %v3461_v46, %v377_v0  ;;  %v434_v30 = vadd.f32 %v3461_v46, %v376_v50  ;;  %v5124_v50 = vld [vmem:[#allocation34_spill] sm:$0xff] }
 0x143   : > { %v4631_v58 = vadd.f32 %v1681_v40, %v1549_v29  ;;  %v5119_v29 = vmax.f32 %v5118_v16, 0.0  ;;  %v1145_v46 = vrot.slane %v5124_v50, 2 }
 0x144   : > { %v487_v31 = vmax.f32 %v433_v48, 0.0  ;;  %v489_v9 = vmax.f32 %v435_v53, 0.0  ;;  %v1146_v48 = vrot.slane %v5120_v35, 2  ;;  %v5125_v53 = vld [vmem:[#allocation35_spill] sm:$0xff] }
 0x145   : > { %5117 = vst [vmem:[#allocation5_spill] sm:$0xff] %v4631_v58  ;;  %v4644_v58 = vpack.c.bf16 %v5120_v35, %v5119_v29 }
 0x146   : > { %v1299_v18 = vpop.f32.mrf.mxu2  ;;  %v4661_v24 = vsel %vm497_vm0, %v487_v31, 0.0  ;;  %v4665_v0 = vsel %vm508_vm1, %v489_v9, 0.0  ;;  %v1147_v9 = vsel %vm1069_vm5, %v1145_v46, %v1146_v48 }
 0x147   : > { %v1363_v15 = vadd.f32 %v1299_v18, %v1017_v62  ;;  %v1486_v11 = vpop.f32.mrf.mxu3  ;;  %5123 = vst [vmem:[#allocation7_spill] sm:$0xff] %v4665_v0  ;;  %v1574_v29 = vrot.slane %v4661_v24, 1 }
 0x148   : > { %v1019_v40 = vpop.f32.mrf.mxu1 }
 0x149   : > { %v1550_v61 = vadd.f32 %v1486_v11, %v1363_v15  ;;  %v1020_v42 = vadd.f32 %v1019_v40, %v4358_v54  ;;  %v4657_v11 = vmax.f32 %v434_v30, 0.0  ;;  %v1148_v54 = vrot.slane %v5125_v53, 2 }
 0x14a   : > { %v1686_v27 = vpop.f32.mrf.mxu0 }
 0x14b   : > { %2914 = vmatmul.msk.bf16.gmra.mxu1 %vm4175_vm4, %v4609_v1  ;;  %1341 = vmatmul.bf16.gmra.mxu2 %v4639_v8  ;;  %v4650_v18 = vadd.f32 %v1683_v52, %v1550_v61  ;;  %v1575_v3 = vrot.slane %v4657_v11, 1  ;;  %v1577_v61 = vrot.slane %v4665_v0, 1  ;;  %v4683_v0 = vpack.c.bf16 %v4657_v11, %v487_v31 }
 0x14c   : > { %3058 = vmatmul.msk.bf16.gmra.mxu3 %vm4175_vm4, %v4644_v58 }
 0x14d   : > { %5121 = vst [vmem:[#allocation6_spill] sm:$0xff] %v4650_v18  ;;  %1725 = vmatmul.bf16.gmra.mxu0 %v4159_v63  ;;  %v1576_v35 = vsel %vm649_vm2, %v1574_v29, %v1575_v3  ;;  %v1578_v28 = vsel %vm649_vm2, %v1575_v3, %v1577_v61 }
 0x14e   : > { %v1302_v15 = vpop.f32.mrf.mxu2 }
 0x14f   : > { %v1364_v52 = vadd.f32 %v1302_v15, %v1020_v42  ;;  %v1489_v44 = vpop.f32.mrf.mxu3  ;;  %v1149_v42 = vsel %vm1069_vm5, %v1146_v48, %v1148_v54 }
 0x150   : > { %v1021_v62 = vpop.f32.mrf.mxu1  ;;  %v4680_v53 = vpack.c.bf16 %v1149_v42, %v1147_v9 }
 0x151   : > { %v1551_v40 = vadd.f32 %v1489_v44, %v1364_v52  ;;  %v1022_v15 = vadd.f32 %v1021_v62, %v4385_v55 }
 0x152   : > { %v1688_v16 = vpop.f32.mrf.mxu0 }
 0x153   : > { %v4673_v30 = vadd.f32 %v1686_v27, %v1551_v40  ;;  %v4685_v27 = vpack.c.bf16 %v1578_v28, %v1576_v35 }
 0x156   : > { %v1304_v52 = vpop.f32.mrf.mxu2 }
 0x157   : > { %v1365_v44 = vadd.f32 %v1304_v52, %v1022_v15  ;;  %v1491_v50 = vpop.f32.mrf.mxu3 }
 0x158   : > { %v1024_v18 = vpop.f32.mrf.mxu1 }
 0x159   : > { %v1552_v46 = vadd.f32 %v1491_v50, %v1365_v44  ;;  %v1025_v31 = vadd.f32 %v1024_v18, %v4406_v34 }
 0x15a   : > { %v1691_v40 = vpop.f32.mrf.mxu0 }
 0x15b   : > { %2917 = vmatmul.msk.bf16.gmra.mxu1 %vm4175_vm4, %v4644_v58  ;;  %1346 = vmatmul.bf16.gmra.mxu2 %v4680_v53  ;;  %v4691_v55 = vadd.f32 %v1688_v16, %v1552_v46 }
 0x15c   : > { %3061 = vmatmul.msk.bf16.gmra.mxu3 %vm4175_vm4, %v4683_v0 }
 0x15d   : > { %1730 = vmatmul.bf16.gmra.mxu0 %v4685_v27 }
 0x15e   : > { %v1307_v62 = vpop.f32.mrf.mxu2 }
 0x15f   : > { %v1366_v48 = vadd.f32 %v1307_v62, %v1025_v31  ;;  %v1494_v54 = vpop.f32.mrf.mxu3 }
 0x160   : > { %v1026_v29 = vpop.f32.mrf.mxu1 }
 0x161   : > { %v1553_v3 = vadd.f32 %v1494_v54, %v1366_v48  ;;  %v1027_v42 = vadd.f32 %v1026_v29, %v4427_v45 }
 0x162   : > { %v1693_v61 = vpop.f32.mrf.mxu0 }
 0x163   : > { %v4698_v9 = vadd.f32 %v1691_v40, %v1553_v3 }
 0x166   : > { %v1309_v16 = vpop.f32.mrf.mxu2 }
 0x167   : > { %v1367_v15 = vadd.f32 %v1309_v16, %v1027_v42  ;;  %v1496_v35 = vpop.f32.mrf.mxu3 }
 0x168   : > { %v1029_v28 = vpop.f32.mrf.mxu1 }
 0x169   : > { %v1554_v52 = vadd.f32 %v1496_v35, %v1367_v15  ;;  %v1030_v45 = vadd.f32 %v1029_v28, %v4297_v41 }
 0x16a   : > { %v1696_v44 = vpop.f32.mrf.mxu0 }
 0x16b   : > { %1849 = vmatmul.bf16.vlgmr.msra.gmra.mxu1 %v4201_v20  ;;  %3208 = vmatmul.msk.bf16.vlgmr.msra.gmra.mxu2 %vm4175_vm4, %v4206_v17  ;;  %v4705_v34 = vadd.f32 %v1693_v61, %v1554_v52 }
 0x16c   : > { %2233 = vmatmul.bf16.vlgmr.msra.gmra.mxu3 %v4049_v49 }
 0x16d   : > { %2427 = vmatmul.bf16.vlgmr.msra.gmra.mxu0 %v4220_v33 }
 0x16e   : > { %v1312_v18 = vpop.f32.mrf.mxu2 }
 0x16f   : > { %v1368_v50 = vadd.f32 %v1312_v18, %v1030_v45  ;;  %v1499_v46 = vpop.f32.mrf.mxu3 }
 0x170   : > { %v1031_v40 = vpop.f32.mrf.mxu1 }
 0x171   : > { %v1555_v31 = vadd.f32 %v1499_v46, %v1368_v50  ;;  %v1032_v20 = vadd.f32 %v1031_v40, %v4316_v12 }
 0x172   : > { %v1698_v62 = vpop.f32.mrf.mxu0 }
 0x173   : > { %v4710_v48 = vadd.f32 %v1696_v44, %v1555_v31 }
 0x176   : > { %v1314_v54 = vpop.f32.mrf.mxu2 }
 0x177   : > { %v1369_v17 = vadd.f32 %v1314_v54, %v1032_v20  ;;  %v1501_v29 = vpop.f32.mrf.mxu3 }
 0x178   : > { %v1034_v3 = vpop.f32.mrf.mxu1 }
 0x179   : > { %v1556_v61 = vadd.f32 %v1501_v29, %v1369_v17  ;;  %v1035_v12 = vadd.f32 %v1034_v3, %v4339_v23 }
 0x17a   : > { %v1701_v49 = vpop.f32.mrf.mxu0 }
 0x17b   : > { %1854 = vmatmul.bf16.gmra.mxu1 %v4220_v33  ;;  %3211 = vmatmul.msk.bf16.gmra.mxu2 %vm4175_vm4, %v4225_v4  ;;  %v4717_v41 = vadd.f32 %v1698_v62, %v1556_v61 }
 0x17c   : > { %2238 = vmatmul.bf16.gmra.mxu3 %v4161_v39 }
 0x17d   : > { %2432 = vmatmul.bf16.gmra.mxu0 %v4252_v19 }
 0x17e   : > { %v1317_v42 = vpop.f32.mrf.mxu2 }
 0x17f   : > { %v1370_v16 = vadd.f32 %v1317_v42, %v1035_v12  ;;  %v1504_v15 = vpop.f32.mrf.mxu3 }
 0x180   : > { %v1036_v35 = vpop.f32.mrf.mxu1 }
 0x181   : > { %v1557_v28 = vadd.f32 %v1504_v15, %v1370_v16  ;;  %v1037_v33 = vadd.f32 %v1036_v35, %v4352_v32 }
 0x182   : > { %v1703_v52 = vpop.f32.mrf.mxu0 }
 0x183   : > { %v4722_v44 = vadd.f32 %v1701_v49, %v1557_v28 }
 0x186   : > { %v1319_v45 = vpop.f32.mrf.mxu2 }
 0x187   : > { %v1371_v4 = vadd.f32 %v1319_v45, %v1037_v33  ;;  %v1506_v18 = vpop.f32.mrf.mxu3 }
 0x188   : > { %v1039_v50 = vpop.f32.mrf.mxu1 }
 0x189   : > { %v1558_v46 = vadd.f32 %v1506_v18, %v1371_v4  ;;  %v1040_v32 = vadd.f32 %v1039_v50, %v4381_v13 }
 0x18a   : > { %v1706_v39 = vpop.f32.mrf.mxu0 }
 0x18b   : > { %1859 = vmatmul.bf16.gmra.mxu1 %v4252_v19  ;;  %3214 = vmatmul.msk.bf16.gmra.mxu2 %vm4175_vm4, %v4257_v6  ;;  %v4729_v23 = vadd.f32 %v1703_v52, %v1558_v46 }
 0x18c   : > { %2243 = vmatmul.bf16.gmra.mxu3 %v3706_v59 }
 0x18d   : > { %2437 = vmatmul.bf16.gmra.mxu0 %v4272_v43 }
 0x18e   : > { %v1322_v40 = vpop.f32.mrf.mxu2 }
 0x18f   : > { %v1372_v31 = vadd.f32 %v1322_v40, %v1040_v32  ;;  %v1509_v62 = vpop.f32.mrf.mxu3  ;;  %v5128_v32 = vld [vmem:[#allocation28_spill] sm:$0xff]  ;;  %v5129_v40 = vld [vmem:[#allocation43_spill] sm:$0xff] }
 0x190   : > { %v1041_v20 = vpop.f32.mrf.mxu1 }
 0x191   : > { %v1559_v54 = vadd.f32 %v1509_v62, %v1372_v31  ;;  %v1042_v19 = vadd.f32 %v1041_v20, %v4400_v2  ;;  %v5130_v31 = vld [vmem:[#allocation38_spill] sm:$0xff] }
 0x192   : > { %v1708_v17 = vpop.f32.mrf.mxu0 }
 0x193   : > { %v4734_v29 = vadd.f32 %v1706_v39, %v1559_v54  ;;  %v5127_v39 = vld [vmem:[#allocation40_spill] sm:$0xff] }
 0x196   : > { %v1324_v3 = vpop.f32.mrf.mxu2 }
 0x197   : > { %v1373_v6 = vadd.f32 %v1324_v3, %v1042_v19  ;;  %v1511_v61 = vpop.f32.mrf.mxu3 }
 0x198   : > { %v1044_v49 = vpop.f32.mrf.mxu1 }
 0x199   : > { %v1560_v12 = vadd.f32 %v1511_v61, %v1373_v6  ;;  %v1045_v2 = vadd.f32 %v1044_v49, %v4423_v22 }
 0x19a   : > { %v1711_v59 = vpop.f32.mrf.mxu0 }
 0x19b   : > { %1864 = vmatmul.bf16.gmra.mxu1 %v4272_v43  ;;  %3217 = vmatmul.msk.bf16.gmra.mxu2 %vm4175_vm4, %v4279_v56  ;;  %v4741_v13 = vadd.f32 %v1708_v17, %v1560_v12  ;;  %v5126_v43 = vld [vmem:[#allocation50_spill] sm:$0xff] }
 0x19c   : > { %2248 = vmatmul.bf16.gmra.mxu3 %v3846_v14 }
 0x19d   : > { %2442 = vmatmul.bf16.gmra.mxu0 %v4320_v36 }
 0x19e   : > { %v1327_v42 = vpop.f32.mrf.mxu2 }
 0x19f   : > { %v1374_v16 = vadd.f32 %v1327_v42, %v1045_v2  ;;  %v1514_v15 = vpop.f32.mrf.mxu3 }
 0x1a0   : > { %v1046_v35 = vpop.f32.mrf.mxu1 }
 0x1a1   : > { %v1561_v28 = vadd.f32 %v1514_v15, %v1374_v16  ;;  %v1047_v45 = vadd.f32 %v1046_v35, %v5126_v43  ;;  %v5132_v35 = vld [vmem:[#allocation44_spill] sm:$0xff]  ;;  %v5134_v43 = vld [vmem:[#allocation47_spill] sm:$0xff] }
 0x1a2   : > { %v1713_v52 = vpop.f32.mrf.mxu0 }
 0x1a3   : > { %v4746_v33 = vadd.f32 %v1711_v59, %v1561_v28 }
 0x1a6   : > { %v1329_v4 = vpop.f32.mrf.mxu2 }
 0x1a7   : > { %v1375_v56 = vadd.f32 %v1329_v4, %v1047_v45  ;;  %v1516_v18 = vpop.f32.mrf.mxu3  ;;  %v5135_v45 = vld [vmem:[#allocation41_spill] sm:$0xff] }
 0x1a8   : > { %v1049_v50 = vpop.f32.mrf.mxu1 }
 0x1a9   : > { %v1562_v46 = vadd.f32 %v1516_v18, %v1375_v56  ;;  %v1050_v62 = vadd.f32 %v1049_v50, %v5130_v31 }
 0x1aa   : > { %v1716_v14 = vpop.f32.mrf.mxu0 }
 0x1ab   : > { %1869 = vmatmul.bf16.gmra.mxu1 %v4320_v36  ;;  %3220 = vmatmul.msk.bf16.gmra.mxu2 %vm4175_vm4, %v5127_v39  ;;  %v4753_v22 = vadd.f32 %v1713_v52, %v1562_v46  ;;  %v5131_v36 = vld [vmem:[#allocation39_spill] sm:$0xff]  ;;  %v5133_v52 = vld [vmem:[#allocation36_spill] sm:$0xff] }
 0x1ac   : > { %2253 = vmatmul.bf16.gmra.mxu3 %v5128_v32 }
 0x1ad   : > { %2447 = vmatmul.bf16.gmra.mxu0 %v5129_v40 }
 0x1ae   : > { %v1332_v20 = vpop.f32.mrf.mxu2 }
 0x1af   : > { %v1376_v54 = vadd.f32 %v1332_v20, %v1050_v62  ;;  %v1519_v17 = vpop.f32.mrf.mxu3 }
 0x1b0   : > { %v1051_v19 = vpop.f32.mrf.mxu1 }
 0x1b1   : > { %v1563_v3 = vadd.f32 %v1519_v17, %v1376_v54  ;;  %v1052_v49 = vadd.f32 %v1051_v19, %v5131_v36 }
 0x1b2   : > { %v1718_v6 = vpop.f32.mrf.mxu0 }
 0x1b3   : > { %v4758_v61 = vadd.f32 %v1716_v14, %v1563_v3 }
 0x1b6   : > { %v1334_v12 = vpop.f32.mrf.mxu2 }
 0x1b7   : > { %v1377_v59 = vadd.f32 %v1334_v12, %v1052_v49  ;;  %v1521_v2 = vpop.f32.mrf.mxu3  ;;  %v5138_v49 = vld [vmem:[#allocation10_spill] sm:$0xff]  ;;  %v5139_v12 = vld [vmem:[#allocation52_spill] sm:$0xff] }
 0x1b8   : > { %v1054_v42 = vpop.f32.mrf.mxu1 }
 0x1b9   : > { %v1564_v16 = vadd.f32 %v1521_v2, %v1377_v59  ;;  %v1055_v4 = vadd.f32 %v1054_v42, %v5135_v45  ;;  %v5140_v59 = vld [vmem:[#allocation45_spill] sm:$0xff] }
 0x1ba   : > { %v1721_v15 = vpop.f32.mrf.mxu0 }
 0x1bb   : > { %1874 = vmatmul.bf16.gmra.mxu1 %v5129_v40  ;;  %3223 = vmatmul.msk.bf16.gmra.mxu2 %vm4175_vm4, %v5132_v35  ;;  %v4765_v28 = vadd.f32 %v1718_v6, %v1564_v16  ;;  %v5136_v40 = vld [vmem:[#allocation42_spill] sm:$0xff]  ;;  %v5137_v6 = vld [vmem:[#allocation48_spill] sm:$0xff] }
 0x1bc   : > { %2258 = vmatmul.bf16.gmra.mxu3 %v5133_v52 }
 0x1bd   : > { %2452 = vmatmul.bf16.gmra.mxu0 %v5134_v43 }
 0x1be   : > { %v1337_v56 = vpop.f32.mrf.mxu2 }
 0x1bf   : > { %v1378_v18 = vadd.f32 %v1337_v56, %v1055_v4  ;;  %v1524_v50 = vpop.f32.mrf.mxu3 }
 0x1c0   : > { %v1056_v46 = vpop.f32.mrf.mxu1 }
 0x1c1   : > { %v1565_v14 = vadd.f32 %v1524_v50, %v1378_v18  ;;  %v1057_v31 = vadd.f32 %v1056_v46, %v5136_v40 }
 0x1c2   : > { %v1723_v39 = vpop.f32.mrf.mxu0 }
 0x1c3   : > { %v4770_v32 = vadd.f32 %v1721_v15, %v1565_v14 }
 0x1c6   : > { %v1339_v62 = vpop.f32.mrf.mxu2 }
 0x1c7   : > { %v1379_v20 = vadd.f32 %v1339_v62, %v1057_v31  ;;  %v1526_v54 = vpop.f32.mrf.mxu3  ;;  %v5142_v62 = vld [vmem:[#allocation18_spill] sm:$0xff] }
 0x1c8   : > { %v1059_v17 = vpop.f32.mrf.mxu1 }
 0x1c9   : > { %v1566_v19 = vadd.f32 %v1526_v54, %v1379_v20  ;;  %v1060_v2 = vadd.f32 %v1059_v17, %v5140_v59  ;;  %v5143_v20 = vld [vmem:[#allocation49_spill] sm:$0xff] }
 0x1ca   : > { %v1726_v3 = vpop.f32.mrf.mxu0 }
 0x1cb   : > { %1879 = vmatmul.bf16.gmra.mxu1 %v5134_v43  ;;  %3226 = vmatmul.msk.bf16.gmra.mxu2 %vm4175_vm4, %v5137_v6  ;;  %v4777_v36 = vadd.f32 %v1723_v39, %v1566_v19  ;;  %v5141_v43 = vld [vmem:[#allocation46_spill] sm:$0xff] }
 0x1cc   : > { %2263 = vmatmul.bf16.gmra.mxu3 %v5138_v49 }
 0x1cd   : > { %2457 = vmatmul.bf16.gmra.mxu0 %v5139_v12 }
 0x1ce   : > { %v1342_v42 = vpop.f32.mrf.mxu2 }
 0x1cf   : > { %v1380_v16 = vadd.f32 %v1342_v42, %v1060_v2  ;;  %v1529_v15 = vpop.f32.mrf.mxu3 }
 0x1d0   : > { %v1061_v35 = vpop.f32.mrf.mxu1 }
 0x1d1   : > { %v1567_v52 = vadd.f32 %v1529_v15, %v1380_v16  ;;  %v1062_v56 = vadd.f32 %v1061_v35, %v5141_v43 }
 0x1d2   : > { %v1728_v45 = vpop.f32.mrf.mxu0 }
 0x1d3   : > { %v4782_v4 = vadd.f32 %v1726_v3, %v1567_v52 }
 0x1d6   : > { %v1344_v18 = vpop.f32.mrf.mxu2 }
 0x1d7   : > { %v1381_v50 = vadd.f32 %v1344_v18, %v1062_v56  ;;  %v1531_v46 = vpop.f32.mrf.mxu3 }
 0x1d8   : > { %v1064_v14 = vpop.f32.mrf.mxu1 }
 0x1d9   : > { %v1568_v39 = vadd.f32 %v1531_v46, %v1381_v50  ;;  %v1065_v54 = vadd.f32 %v1064_v14, %v5143_v20 }
 0x1da   : > { %v1731_v40 = vpop.f32.mrf.mxu0 }
 0x1db   : > { %1884 = vmatmul.bf16.gmra.mxu1 %v5139_v12  ;;  %3229 = vmatmul.msk.bf16.gmra.mxu2 %vm4175_vm4, %v4445_v7  ;;  %v4789_v31 = vadd.f32 %v1728_v45, %v1568_v39  ;;  %v5144_v12 = vld [vmem:[#allocation51_spill] sm:$0xff] }
 0x1dc   : > { %2268 = vmatmul.bf16.gmra.mxu3 %v5142_v62 }
 0x1dd   : > { %2462 = vmatmul.bf16.gmra.mxu0 %v4476_v26 }
 0x1de   : > { %v1347_v17 = vpop.f32.mrf.mxu2 }
 0x1df   : > { %v1382_v19 = vadd.f32 %v1347_v17, %v1065_v54  ;;  %v1534_v3 = vpop.f32.mrf.mxu3 }
 0x1e0   : > { %v1066_v6 = vpop.f32.mrf.mxu1 }
 0x1e1   : > { %v1569_v49 = vadd.f32 %v1534_v3, %v1382_v19  ;;  %v1067_v42 = vadd.f32 %v1066_v6, %v5144_v12  ;;  %v5146_v12 = vld [vmem:[#allocation11_spill] sm:$0xff] }
 0x1e2   : > { %v1733_v59 = vpop.f32.mrf.mxu0 }
 0x1e3   : > { %v4794_v2 = vadd.f32 %v1731_v40, %v1569_v49 }
 0x1e6   : > { %v1349_v7 = vpop.f32.mrf.mxu2 }
 0x1e7   : > { %v1383_v16 = vadd.f32 %v1349_v7, %v1067_v42  ;;  %v1536_v15 = vpop.f32.mrf.mxu3 }
 0x1e8   : > { %v1850_v35 = vpop.f32.mrf.mxu1 }
 0x1e9   : > { %v1570_v52 = vadd.f32 %v1536_v15, %v1383_v16  ;;  %v1930_v56 = vadd.f32 %v1850_v35, %v4472_v21 }
 0x1ea   : > { %v2428_v45 = vpop.f32.mrf.mxu0 }
 0x1eb   : > { %1889 = vmatmul.bf16.gmra.mxu1 %v4476_v26  ;;  %3232 = vmatmul.msk.bf16.gmra.mxu2 %vm4175_vm4, %v4481_v25  ;;  %v4801_v43 = vadd.f32 %v1733_v59, %v1570_v52 }
 0x1ec   : > { %2273 = vmatmul.bf16.gmra.mxu3 %v4042_v37  ;;  %v5145_v37 = vld [vmem:[#allocation8_spill] sm:$0xff] }
 0x1ed   : > { %2467 = vmatmul.bf16.gmra.mxu0 %v4502_v60 }
 0x1ee   : > { %v2037_v18 = vpop.f32.mrf.mxu2 }
 0x1ef   : > { %v2117_v50 = vadd.f32 %v2037_v18, %v1930_v56  ;;  %v2234_v46 = vpop.f32.mrf.mxu3  ;;  %v5147_v18 = vld [vmem:[#allocation9_spill] sm:$0xff] }
 0x1f0   : > { %v1852_v14 = vpop.f32.mrf.mxu1 }
 0x1f1   : > { %v2314_v39 = vadd.f32 %v2234_v46, %v2117_v50  ;;  %v1931_v26 = vadd.f32 %v1852_v14, %v5145_v37 }
 0x1f2   : > { %v2430_v40 = vpop.f32.mrf.mxu0 }
 0x1f3   : > { %v2508_v25 = vadd.f32 %v2428_v45, %v2314_v39 }
 0x1f5   : > { %2540 = vst [vmem:[%s4810_s9] sm:$0xff] %v2508_v25  ;;  %v2610_v6 = vmul.f32 %v2508_v25, %v2508_v25 }
 0x1f6   : > { %v2039_v62 = vpop.f32.mrf.mxu2 }
 0x1f7   : > { %v2118_v21 = vadd.f32 %v2039_v62, %v1931_v26  ;;  %v2236_v20 = vpop.f32.mrf.mxu3 }
 0x1f8   : > { %v1855_v54 = vpop.f32.mrf.mxu1 }
 0x1f9   : > { %v2315_v17 = vadd.f32 %v2236_v20, %v2118_v21  ;;  %v1932_v42 = vadd.f32 %v1855_v54, %v5146_v12  ;;  %v5148_v21 = vld [vmem:[#allocation12_spill] sm:$0xff] }
 0x1fa   : > { %v2433_v19 = vpop.f32.mrf.mxu0 }
 0x1fb   : > { %v2509_v3 = vadd.f32 %v2430_v40, %v2315_v17  ;;  %1894 = vmatmul.bf16.gmra.mxu1 %v4502_v60  ;;  %3235 = vmatmul.msk.bf16.gmra.mxu2 %vm4175_vm4, %v4507_v51  ;;  %v5149_v17 = vld [vmem:[#allocation13_spill] sm:$0xff] }
 0x1fc   : > { %2278 = vmatmul.bf16.gmra.mxu3 %v4157_v38 }
 0x1fd   : > { %2472 = vmatmul.bf16.gmra.mxu0 %v4540_v57  ;;  %2541 = vst [vmem:[%s4810_s9 + $0x8] sm:$0xff] %v2509_v3  ;;  %v2572_v49 = vadd.f32 %v2509_v3, %v2508_v25  ;;  %v2611_v59 = vmul.f32 %v2509_v3, %v2509_v3 }
 0x1fe   : > { %v2042_v7 = vpop.f32.mrf.mxu2 }
 0x1ff   : > { %v2642_v16 = vadd.f32 %v2611_v59, %v2610_v6  ;;  %v2119_v15 = vadd.f32 %v2042_v7, %v1932_v42  ;;  %v2239_v35 = vpop.f32.mrf.mxu3 }
 0x200   : > { %v1857_v60 = vpop.f32.mrf.mxu1 }
 0x201   : > { %v2316_v52 = vadd.f32 %v2239_v35, %v2119_v15  ;;  %v1933_v50 = vadd.f32 %v1857_v60, %v5147_v18  ;;  %v5150_v15 = vld [vmem:[#allocation19_spill] sm:$0xff] }
 0x202   : > { %v2435_v45 = vpop.f32.mrf.mxu0 }
 0x203   : > { %v2510_v56 = vadd.f32 %v2433_v19, %v2316_v52 }
 0x205   : > { %2542 = vst [vmem:[%s4810_s9 + $0x10] sm:$0xff] %v2510_v56  ;;  %v2573_v51 = vadd.f32 %v2572_v49, %v2510_v56  ;;  %v2612_v38 = vmul.f32 %v2510_v56, %v2510_v56 }
 0x206   : > { %v2044_v46 = vpop.f32.mrf.mxu2 }
 0x207   : > { %v2643_v14 = vadd.f32 %v2642_v16, %v2612_v38  ;;  %v2120_v39 = vadd.f32 %v2044_v46, %v1933_v50  ;;  %v2241_v40 = vpop.f32.mrf.mxu3  ;;  %v5151_v46 = vld [vmem:[#allocation23_spill] sm:$0xff] }
 0x208   : > { %v1860_v25 = vpop.f32.mrf.mxu1 }
 0x209   : > { %v2317_v37 = vadd.f32 %v2241_v40, %v2120_v39  ;;  %v1934_v19 = vadd.f32 %v1860_v25, %v5149_v17  ;;  %v5153_v39 = vld [vmem:[#allocation33_spill] sm:$0xff] }
 0x20a   : > { %v2438_v26 = vpop.f32.mrf.mxu0 }
 0x20b   : > { %v2511_v62 = vadd.f32 %v2435_v45, %v2317_v37  ;;  %1899 = vmatmul.bf16.gmra.mxu1 %v4540_v57  ;;  %3238 = vmatmul.msk.bf16.gmra.mxu2 %vm4175_vm4, %v4545_v5  ;;  %v5154_v37 = vld [vmem:[#allocation22_spill] sm:$0xff] }
 0x20c   : > { %2283 = vmatmul.bf16.gmra.mxu3 %v5148_v21 }
 0x20d   : > { %2477 = vmatmul.bf16.gmra.mxu0 %v4566_v47  ;;  %2543 = vst [vmem:[%s4810_s9 + $0x18] sm:$0xff] %v2511_v62  ;;  %v2574_v20 = vadd.f32 %v2573_v51, %v2511_v62  ;;  %v2613_v54 = vmul.f32 %v2511_v62, %v2511_v62 }
 0x20e   : > { %v2047_v3 = vpop.f32.mrf.mxu2 }
 0x20f   : > { %v2644_v6 = vadd.f32 %v2643_v14, %v2613_v54  ;;  %v2121_v49 = vadd.f32 %v2047_v3, %v1934_v19  ;;  %v2244_v59 = vpop.f32.mrf.mxu3  ;;  %v5152_v14 = vld [vmem:[#allocation20_spill] sm:$0xff] }
 0x210   : > { %v1862_v12 = vpop.f32.mrf.mxu1 }
 0x211   : > { %v2318_v57 = vadd.f32 %v2244_v59, %v2121_v49  ;;  %v1935_v35 = vadd.f32 %v1862_v12, %v5150_v15  ;;  %v5155_v59 = vld [vmem:[#allocation24_spill] sm:$0xff] }
 0x212   : > { %v2440_v42 = vpop.f32.mrf.mxu0 }
 0x213   : > { %v2512_v7 = vadd.f32 %v2438_v26, %v2318_v57 }
 0x215   : > { %2544 = vst [vmem:[%s4810_s9 + $0x20] sm:$0xff] %v2512_v7  ;;  %v2575_v5 = vadd.f32 %v2574_v20, %v2512_v7  ;;  %v2614_v16 = vmul.f32 %v2512_v7, %v2512_v7 }
 0x216   : > { %v2049_v60 = vpop.f32.mrf.mxu2 }
 0x217   : > { %v2645_v52 = vadd.f32 %v2644_v6, %v2614_v16  ;;  %v2122_v45 = vadd.f32 %v2049_v60, %v1935_v35  ;;  %v2246_v56 = vpop.f32.mrf.mxu3 }
 0x218   : > { %v1865_v51 = vpop.f32.mrf.mxu1 }
 0x219   : > { %v2319_v38 = vadd.f32 %v2246_v56, %v2122_v45  ;;  %v1936_v26 = vadd.f32 %v1865_v51, %v5154_v37  ;;  %v5157_v51 = vld [vmem:[#allocation31_spill] sm:$0xff] }
 0x21a   : > { %v2443_v18 = vpop.f32.mrf.mxu0 }
 0x21b   : > { %v2513_v50 = vadd.f32 %v2440_v42, %v2319_v38  ;;  %1904 = vmatmul.bf16.gmra.mxu1 %v4566_v47  ;;  %3241 = vmatmul.msk.bf16.gmra.mxu2 %vm4175_vm4, %v5151_v46 }
 0x21c   : > { %2288 = vmatmul.bf16.gmra.mxu3 %v5152_v14 }
 0x21d   : > { %2482 = vmatmul.bf16.gmra.mxu0 %v5153_v39  ;;  %2545 = vst [vmem:[%s4810_s9 + $0x28] sm:$0xff] %v2513_v50  ;;  %v2576_v40 = vadd.f32 %v2575_v5, %v2513_v50  ;;  %v2615_v25 = vmul.f32 %v2513_v50, %v2513_v50 }
 0x21e   : > { %v2052_v62 = vpop.f32.mrf.mxu2 }
 0x21f   : > { %v2646_v21 = vadd.f32 %v2645_v52, %v2615_v25  ;;  %v2123_v20 = vadd.f32 %v2052_v62, %v1936_v26  ;;  %v2249_v54 = vpop.f32.mrf.mxu3  ;;  %v5156_v52 = vld [vmem:[#allocation29_spill] sm:$0xff]  ;;  %v5158_v62 = vld [vmem:[#allocation3_spill] sm:$0xff] }
 0x220   : > { %v1867_v17 = vpop.f32.mrf.mxu1 }
 0x221   : > { %v2320_v47 = vadd.f32 %v2249_v54, %v2123_v20  ;;  %v1937_v12 = vadd.f32 %v1867_v17, %v5155_v59 }
 0x222   : > { %v2445_v19 = vpop.f32.mrf.mxu0 }
 0x223   : > { %v2514_v3 = vadd.f32 %v2443_v18, %v2320_v47 }
 0x225   : > { %2546 = vst [vmem:[%s4810_s9 + $0x30] sm:$0xff] %v2514_v3  ;;  %v2577_v6 = vadd.f32 %v2576_v40, %v2514_v3  ;;  %v2616_v49 = vmul.f32 %v2514_v3, %v2514_v3 }
 0x226   : > { %v2054_v57 = vpop.f32.mrf.mxu2 }
 0x227   : > { %v2647_v42 = vadd.f32 %v2646_v21, %v2616_v49  ;;  %v2124_v7 = vadd.f32 %v2054_v57, %v1937_v12  ;;  %v2251_v5 = vpop.f32.mrf.mxu3  ;;  %v5159_v57 = vld [vmem:[#allocation5_spill] sm:$0xff] }
 0x228   : > { %v1870_v16 = vpop.f32.mrf.mxu1 }
 0x229   : > { %v2321_v15 = vadd.f32 %v2251_v5, %v2124_v7  ;;  %v1938_v38 = vadd.f32 %v1870_v16, %v5157_v51 }
 0x22a   : > { %v2448_v35 = vpop.f32.mrf.mxu0 }
 0x22b   : > { %v2515_v60 = vadd.f32 %v2445_v19, %v2321_v15  ;;  %1909 = vmatmul.bf16.gmra.mxu1 %v5153_v39  ;;  %3244 = vmatmul.msk.bf16.gmra.mxu2 %vm4175_vm4, %v4609_v1 }
 0x22c   : > { %2293 = vmatmul.bf16.gmra.mxu3 %v5156_v52 }
 0x22d   : > { %2487 = vmatmul.bf16.gmra.mxu0 %v4639_v8  ;;  %2547 = vst [vmem:[%s4810_s9 + $0x38] sm:$0xff] %v2515_v60  ;;  %v2578_v45 = vadd.f32 %v2577_v6, %v2515_v60  ;;  %v2617_v56 = vmul.f32 %v2515_v60, %v2515_v60  ;;  %v1769_v60 = vrot.slane %v4657_v11, 2 }
 0x22e   : > { %v2057_v18 = vpop.f32.mrf.mxu2 }
 0x22f   : > { %v2648_v50 = vadd.f32 %v2647_v42, %v2617_v56  ;;  %v2125_v46 = vadd.f32 %v2057_v18, %v1938_v38  ;;  %v2254_v14 = vpop.f32.mrf.mxu3 }
 0x230   : > { %v1872_v40 = vpop.f32.mrf.mxu1 }
 0x231   : > { %v2322_v39 = vadd.f32 %v2254_v14, %v2125_v46  ;;  %v1939_v21 = vadd.f32 %v1872_v40, %v5158_v62 }
 0x232   : > { %v2450_v25 = vpop.f32.mrf.mxu0 }
 0x233   : > { %v2516_v37 = vadd.f32 %v2448_v35, %v2322_v39 }
 0x235   : > { %2548 = vst [vmem:[%s4810_s9 + $0x40] sm:$0xff] %v2516_v37  ;;  %v2579_v1 = vadd.f32 %v2578_v45, %v2516_v37  ;;  %v2618_v26 = vmul.f32 %v2516_v37, %v2516_v37 }
 0x236   : > { %v2059_v20 = vpop.f32.mrf.mxu2 }
 0x237   : > { %v2649_v54 = vadd.f32 %v2648_v50, %v2618_v26  ;;  %v2126_v17 = vadd.f32 %v2059_v20, %v1939_v21  ;;  %v2256_v47 = vpop.f32.mrf.mxu3  ;;  %v5161_v50 = vld [vmem:[#allocation6_spill] sm:$0xff] }
 0x238   : > { %v1875_v19 = vpop.f32.mrf.mxu1 }
 0x239   : > { %v2323_v3 = vadd.f32 %v2256_v47, %v2126_v17  ;;  %v1940_v42 = vadd.f32 %v1875_v19, %v5159_v57 }
 0x23a   : > { %v2453_v6 = vpop.f32.mrf.mxu0 }
 0x23b   : > { %v2517_v49 = vadd.f32 %v2450_v25, %v2323_v3  ;;  %1914 = vmatmul.bf16.gmra.mxu1 %v4639_v8  ;;  %3247 = vmatmul.msk.bf16.gmra.mxu2 %vm4175_vm4, %v4644_v58  ;;  %v1768_v8 = vrot.slane %v4661_v24, 2 }
 0x23c   : > { %2298 = vmatmul.bf16.gmra.mxu3 %v4159_v63  ;;  %v5160_v63 = vld [vmem:[#allocation7_spill] sm:$0xff] }
 0x23d   : > { %2492 = vmatmul.bf16.gmra.mxu0 %v4680_v53  ;;  %2549 = vst [vmem:[%s4810_s9 + $0x48] sm:$0xff] %v2517_v49  ;;  %v2580_v59 = vadd.f32 %v2579_v1, %v2517_v49  ;;  %v2619_v12 = vmul.f32 %v2517_v49, %v2517_v49  ;;  %v1771_v45 = vrot.slane %v5160_v63, 2  ;;  %v1770_v51 = vsel %vm1069_vm5, %v1768_v8, %v1769_v60  ;;  %v5163_v8 = vld [vmem:[#allocation4_spill] sm:$0xff] }
 0x23e   : > { %v2062_v7 = vpop.f32.mrf.mxu2 }
 0x23f   : > { %v2650_v5 = vadd.f32 %v2649_v54, %v2619_v12  ;;  %v2127_v16 = vadd.f32 %v2062_v7, %v1940_v42  ;;  %v2259_v15 = vpop.f32.mrf.mxu3  ;;  %v1772_v14 = vsel %vm1069_vm5, %v1769_v60, %v1771_v45  ;;  %v5164_v60 = vld [vmem:[#allocation37_spill] sm:$0xff] }
 0x240   : > { %v1877_v35 = vpop.f32.mrf.mxu1  ;;  %v1775_v37 = vpack.c.bf16 %v1772_v14, %v1770_v51 }
 0x241   : > { %v2324_v58 = vadd.f32 %v2259_v15, %v2127_v16  ;;  %v1941_v46 = vadd.f32 %v1877_v35, %v5161_v50  ;;  %v5162_v35 = vmov 0.0|0.0  }
 0x242   : > { %v2455_v52 = vpop.f32.mrf.mxu0 }
 0x243   : > { %v2518_v56 = vadd.f32 %v2453_v6, %v2324_v58 }
 0x245   : > { %2550 = vst [vmem:[%s4810_s9 + $0x50] sm:$0xff] %v2518_v56  ;;  %v2581_v38 = vadd.f32 %v2580_v59, %v2518_v56  ;;  %v2620_v18 = vmul.f32 %v2518_v56, %v2518_v56 }
 0x246   : > { %v2064_v40 = vpop.f32.mrf.mxu2 }
 0x247   : > { %v2651_v39 = vadd.f32 %v2650_v5, %v2620_v18  ;;  %v2128_v24 = vadd.f32 %v2064_v40, %v1941_v46  ;;  %v2261_v25 = vpop.f32.mrf.mxu3 }
 0x248   : > { %v1880_v11 = vpop.f32.mrf.mxu1 }
 0x249   : > { %v2325_v1 = vadd.f32 %v2261_v25, %v2128_v24  ;;  %v1942_v54 = vadd.f32 %v1880_v11, %v4673_v30 }
 0x24a   : > { %v2458_v26 = vpop.f32.mrf.mxu0 }
 0x24b   : > { %v2519_v62 = vadd.f32 %v2455_v52, %v2325_v1  ;;  %1919 = vmatmul.bf16.gmra.mxu1 %v4680_v53  ;;  %3250 = vmatmul.msk.bf16.gmra.mxu2 %vm4175_vm4, %v4683_v0 }
 0x24c   : > { %2303 = vmatmul.bf16.gmra.mxu3 %v4685_v27 }
 0x24d   : > { %2497 = vmatmul.bf16.gmra.mxu0 %v1775_v37  ;;  %2551 = vst [vmem:[%s4810_s9 + $0x58] sm:$0xff] %v2519_v62  ;;  %v2582_v21 = vadd.f32 %v2581_v38, %v2519_v62  ;;  %v2621_v20 = vmul.f32 %v2519_v62, %v2519_v62 }
 0x24e   : > { %v2067_v17 = vpop.f32.mrf.mxu2 }
 0x24f   : > { %v2652_v47 = vadd.f32 %v2651_v39, %v2621_v20  ;;  %v2129_v19 = vadd.f32 %v2067_v17, %v1942_v54  ;;  %v2264_v3 = vpop.f32.mrf.mxu3 }
 0x250   : > { %v1882_v6 = vpop.f32.mrf.mxu1 }
 0x251   : > { %v2326_v49 = vadd.f32 %v2264_v3, %v2129_v19  ;;  %v1943_v27 = vadd.f32 %v1882_v6, %v4691_v55 }
 0x252   : > { %v2460_v53 = vpop.f32.mrf.mxu0 }
 0x253   : > { %v2520_v59 = vadd.f32 %v2458_v26, %v2326_v49 }
 0x255   : > { %2552 = vst [vmem:[%s4810_s9 + $0x60] sm:$0xff] %v2520_v59  ;;  %v2583_v10 = vadd.f32 %v2582_v21, %v2520_v59  ;;  %v2622_v0 = vmul.f32 %v2520_v59, %v2520_v59 }
 0x256   : > { %v2069_v12 = vpop.f32.mrf.mxu2 }
 0x257   : > { %v2653_v57 = vadd.f32 %v2652_v47, %v2622_v0  ;;  %v2130_v42 = vadd.f32 %v2069_v12, %v1943_v27  ;;  %v2266_v7 = vpop.f32.mrf.mxu3 }
 0x258   : > { %v1885_v5 = vpop.f32.mrf.mxu1 }
 0x259   : > { %v2327_v30 = vadd.f32 %v2266_v7, %v2130_v42  ;;  %v1944_v55 = vadd.f32 %v1885_v5, %v4698_v9 }
 0x25a   : > { %v2463_v16 = vpop.f32.mrf.mxu0 }
 0x25b   : > { %v2521_v15 = vadd.f32 %v2460_v53, %v2327_v30  ;;  %1924 = vmatmul.bf16.gmra.mxu1 %v1775_v37  ;;  %2111 = vmatmul.bf16.gmra.mxu2 %v5162_v35 }
 0x25c   : > { %2308 = vmatmul.bf16.gmra.mxu3 %v5163_v8 }
 0x25d   : > { %2502 = vmatmul.bf16.gmra.mxu0 %v5164_v60  ;;  %2553 = vst [vmem:[%s4810_s9 + $0x68] sm:$0xff] %v2521_v15  ;;  %v2584_v58 = vadd.f32 %v2583_v10, %v2521_v15  ;;  %v2623_v52 = vmul.f32 %v2521_v15, %v2521_v15 }
 0x25e   : > { %v2072_v63 = vpop.f32.mrf.mxu2 }
 0x25f   : > { %v2654_v45 = vadd.f32 %v2653_v57, %v2623_v52  ;;  %v2131_v56 = vadd.f32 %v2072_v63, %v1944_v55  ;;  %v2269_v51 = vpop.f32.mrf.mxu3 }
 0x260   : > { %v1887_v38 = vpop.f32.mrf.mxu1 }
 0x261   : > { %v2328_v18 = vadd.f32 %v2269_v51, %v2131_v56  ;;  %v1945_v39 = vadd.f32 %v1887_v38, %v4705_v34 }
 0x262   : > { %v2465_v50 = vpop.f32.mrf.mxu0 }
 0x263   : > { %v2522_v46 = vadd.f32 %v2463_v16, %v2328_v18 }
 0x265   : > { %2554 = vst [vmem:[%s4810_s9 + $0x70] sm:$0xff] %v2522_v46  ;;  %v2585_v14 = vadd.f32 %v2584_v58, %v2522_v46  ;;  %v2624_v40 = vmul.f32 %v2522_v46, %v2522_v46 }
 0x266   : > { %v2074_v24 = vpop.f32.mrf.mxu2 }
 0x267   : > { %v2655_v25 = vadd.f32 %v2654_v45, %v2624_v40  ;;  %v2132_v11 = vadd.f32 %v2074_v24, %v1945_v39  ;;  %v2271_v37 = vpop.f32.mrf.mxu3 }
 0x268   : > { %v1890_v1 = vpop.f32.mrf.mxu1 }
 0x269   : > { %v2329_v9 = vadd.f32 %v2271_v37, %v2132_v11  ;;  %v1946_v54 = vadd.f32 %v1890_v1, %v4710_v48 }
 0x26a   : > { %v2468_v26 = vpop.f32.mrf.mxu0 }
 0x26b   : > { %v2523_v62 = vadd.f32 %v2465_v50, %v2329_v9 }
 0x26d   : > { %2555 = vst [vmem:[%s4810_s9 + $0x78] sm:$0xff] %v2523_v62  ;;  %v2586_v21 = vadd.f32 %v2585_v14, %v2523_v62  ;;  %v2625_v20 = vmul.f32 %v2523_v62, %v2523_v62 }
 0x26e   : > { %v2077_v17 = vpop.f32.mrf.mxu2 }
 0x26f   : > { %v2656_v47 = vadd.f32 %v2655_v25, %v2625_v20  ;;  %v2133_v19 = vadd.f32 %v2077_v17, %v1946_v54  ;;  %v2274_v3 = vpop.f32.mrf.mxu3 }
 0x270   : > { %v1892_v6 = vpop.f32.mrf.mxu1 }
 0x271   : > { %v2330_v34 = vadd.f32 %v2274_v3, %v2133_v19  ;;  %v1947_v0 = vadd.f32 %v1892_v6, %v4717_v41 }
 0x272   : > { %v2470_v49 = vpop.f32.mrf.mxu0 }
 0x273   : > { %v2524_v53 = vadd.f32 %v2468_v26, %v2330_v34 }
 0x275   : > { %2556 = vst [vmem:[%s4810_s9 + $0x80] sm:$0xff] %v2524_v53  ;;  %v2587_v59 = vadd.f32 %v2586_v21, %v2524_v53  ;;  %v2626_v10 = vmul.f32 %v2524_v53, %v2524_v53 }
 0x276   : > { %v2079_v27 = vpop.f32.mrf.mxu2 }
 0x277   : > { %v2657_v12 = vadd.f32 %v2656_v47, %v2626_v10  ;;  %v2134_v57 = vadd.f32 %v2079_v27, %v1947_v0  ;;  %v2276_v42 = vpop.f32.mrf.mxu3 }
 0x278   : > { %v1895_v7 = vpop.f32.mrf.mxu1 }
 0x279   : > { %v2331_v48 = vadd.f32 %v2276_v42, %v2134_v57  ;;  %v1948_v35 = vadd.f32 %v1895_v7, %v4722_v44 }
 0x27a   : > { %v2473_v5 = vpop.f32.mrf.mxu0 }
 0x27b   : > { %v2525_v30 = vadd.f32 %v2470_v49, %v2331_v48 }
 0x27d   : > { %2557 = vst [vmem:[%s4810_s9 + $0x88] sm:$0xff] %v2525_v30  ;;  %v2588_v16 = vadd.f32 %v2587_v59, %v2525_v30  ;;  %v2627_v15 = vmul.f32 %v2525_v30, %v2525_v30 }
 0x27e   : > { %v2082_v8 = vpop.f32.mrf.mxu2 }
 0x27f   : > { %v2658_v60 = vadd.f32 %v2657_v12, %v2627_v15  ;;  %v2135_v58 = vadd.f32 %v2082_v8, %v1948_v35  ;;  %v2279_v52 = vpop.f32.mrf.mxu3 }
 0x280   : > { %v1897_v55 = vpop.f32.mrf.mxu1 }
 0x281   : > { %v2332_v41 = vadd.f32 %v2279_v52, %v2135_v58  ;;  %v1949_v38 = vadd.f32 %v1897_v55, %v4729_v23 }
 0x282   : > { %v2475_v63 = vpop.f32.mrf.mxu0 }
 0x283   : > { %v2526_v45 = vadd.f32 %v2473_v5, %v2332_v41 }
 0x285   : > { %2558 = vst [vmem:[%s4810_s9 + $0x90] sm:$0xff] %v2526_v45  ;;  %v2589_v56 = vadd.f32 %v2588_v16, %v2526_v45  ;;  %v2628_v51 = vmul.f32 %v2526_v45, %v2526_v45 }
 0x286   : > { %v2084_v18 = vpop.f32.mrf.mxu2 }
 0x287   : > { %v2659_v50 = vadd.f32 %v2658_v60, %v2628_v51  ;;  %v2136_v46 = vadd.f32 %v2084_v18, %v1949_v38  ;;  %v2281_v14 = vpop.f32.mrf.mxu3 }
 0x288   : > { %v1900_v40 = vpop.f32.mrf.mxu1 }
 0x289   : > { %v2333_v44 = vadd.f32 %v2281_v14, %v2136_v46  ;;  %v1950_v37 = vadd.f32 %v1900_v40, %v4734_v29 }
 0x28a   : > { %v2478_v39 = vpop.f32.mrf.mxu0 }
 0x28b   : > { %v2527_v24 = vadd.f32 %v2475_v63, %v2333_v44 }
 0x28d   : > { %2559 = vst [vmem:[%s4810_s9 + $0x98] sm:$0xff] %v2527_v24  ;;  %v2590_v25 = vadd.f32 %v2589_v56, %v2527_v24  ;;  %v2629_v11 = vmul.f32 %v2527_v24, %v2527_v24 }
 0x28e   : > { %v2087_v1 = vpop.f32.mrf.mxu2 }
 0x28f   : > { %v2660_v9 = vadd.f32 %v2659_v50, %v2629_v11  ;;  %v2137_v26 = vadd.f32 %v2087_v1, %v1950_v37  ;;  %v2284_v62 = vpop.f32.mrf.mxu3 }
 0x290   : > { %v1902_v21 = vpop.f32.mrf.mxu1 }
 0x291   : > { %v2334_v23 = vadd.f32 %v2284_v62, %v2137_v26  ;;  %v1951_v19 = vadd.f32 %v1902_v21, %v4741_v13 }
 0x292   : > { %v2480_v20 = vpop.f32.mrf.mxu0 }
 0x293   : > { %v2528_v54 = vadd.f32 %v2478_v39, %v2334_v23 }
 0x295   : > { %2560 = vst [vmem:[%s4810_s9 + $0xa0] sm:$0xff] %v2528_v54  ;;  %v2591_v17 = vadd.f32 %v2590_v25, %v2528_v54  ;;  %v2630_v47 = vmul.f32 %v2528_v54, %v2528_v54 }
 0x296   : > { %v2089_v3 = vpop.f32.mrf.mxu2 }
 0x297   : > { %v2661_v6 = vadd.f32 %v2660_v9, %v2630_v47  ;;  %v2138_v34 = vadd.f32 %v2089_v3, %v1951_v19  ;;  %v2286_v49 = vpop.f32.mrf.mxu3 }
 0x298   : > { %v1905_v53 = vpop.f32.mrf.mxu1 }
 0x299   : > { %v2335_v29 = vadd.f32 %v2286_v49, %v2138_v34  ;;  %v1952_v12 = vadd.f32 %v1905_v53, %v4746_v33 }
 0x29a   : > { %v2483_v59 = vpop.f32.mrf.mxu0 }
 0x29b   : > { %v2529_v10 = vadd.f32 %v2480_v20, %v2335_v29 }
 0x29d   : > { %2561 = vst [vmem:[%s4810_s9 + $0xa8] sm:$0xff] %v2529_v10  ;;  %v2592_v0 = vadd.f32 %v2591_v17, %v2529_v10  ;;  %v2631_v27 = vmul.f32 %v2529_v10, %v2529_v10 }
 0x29e   : > { %v2092_v57 = vpop.f32.mrf.mxu2 }
 0x29f   : > { %v2662_v42 = vadd.f32 %v2661_v6, %v2631_v27  ;;  %v2139_v7 = vadd.f32 %v2092_v57, %v1952_v12  ;;  %v2289_v48 = vpop.f32.mrf.mxu3 }
 0x2a0   : > { %v1907_v5 = vpop.f32.mrf.mxu1 }
 0x2a1   : > { %v2336_v13 = vadd.f32 %v2289_v48, %v2139_v7  ;;  %v1953_v8 = vadd.f32 %v1907_v5, %v4753_v22 }
 0x2a2   : > { %v2485_v30 = vpop.f32.mrf.mxu0 }
 0x2a3   : > { %v2530_v16 = vadd.f32 %v2483_v59, %v2336_v13 }
 0x2a5   : > { %2562 = vst [vmem:[%s4810_s9 + $0xb0] sm:$0xff] %v2530_v16  ;;  %v2593_v15 = vadd.f32 %v2592_v0, %v2530_v16  ;;  %v2632_v35 = vmul.f32 %v2530_v16, %v2530_v16 }
 0x2a6   : > { %v2094_v60 = vpop.f32.mrf.mxu2 }
 0x2a7   : > { %v2663_v58 = vadd.f32 %v2662_v42, %v2632_v35  ;;  %v2140_v52 = vadd.f32 %v2094_v60, %v1953_v8  ;;  %v2291_v55 = vpop.f32.mrf.mxu3 }
 0x2a8   : > { %v1910_v41 = vpop.f32.mrf.mxu1 }
 0x2a9   : > { %v2337_v33 = vadd.f32 %v2291_v55, %v2140_v52  ;;  %v1954_v38 = vadd.f32 %v1910_v41, %v4758_v61 }
 0x2aa   : > { %v2488_v63 = vpop.f32.mrf.mxu0 }
 0x2ab   : > { %v2531_v45 = vadd.f32 %v2485_v30, %v2337_v33 }
 0x2ad   : > { %2563 = vst [vmem:[%s4810_s9 + $0xb8] sm:$0xff] %v2531_v45  ;;  %v2594_v56 = vadd.f32 %v2593_v15, %v2531_v45  ;;  %v2633_v51 = vmul.f32 %v2531_v45, %v2531_v45 }
 0x2ae   : > { %v2097_v18 = vpop.f32.mrf.mxu2 }
 0x2af   : > { %v2664_v50 = vadd.f32 %v2663_v58, %v2633_v51  ;;  %v2141_v46 = vadd.f32 %v2097_v18, %v1954_v38  ;;  %v2294_v14 = vpop.f32.mrf.mxu3 }
 0x2b0   : > { %v1912_v40 = vpop.f32.mrf.mxu1 }
 0x2b1   : > { %v2338_v22 = vadd.f32 %v2294_v14, %v2141_v46  ;;  %v1955_v11 = vadd.f32 %v1912_v40, %v4765_v28 }
 0x2b2   : > { %v2490_v44 = vpop.f32.mrf.mxu0 }
 0x2b3   : > { %v2532_v39 = vadd.f32 %v2488_v63, %v2338_v22 }
 0x2b5   : > { %2564 = vst [vmem:[%s4810_s9 + $0xc0] sm:$0xff] %v2532_v39  ;;  %v2595_v24 = vadd.f32 %v2594_v56, %v2532_v39  ;;  %v2634_v25 = vmul.f32 %v2532_v39, %v2532_v39 }
 0x2b6   : > { %v2099_v37 = vpop.f32.mrf.mxu2 }
 0x2b7   : > { %v2665_v1 = vadd.f32 %v2664_v50, %v2634_v25  ;;  %v2142_v9 = vadd.f32 %v2099_v37, %v1955_v11  ;;  %v2296_v26 = vpop.f32.mrf.mxu3 }
 0x2b8   : > { %v1915_v62 = vpop.f32.mrf.mxu1 }
 0x2b9   : > { %v2339_v61 = vadd.f32 %v2296_v26, %v2142_v9  ;;  %v1956_v17 = vadd.f32 %v1915_v62, %v4770_v32 }
 0x2ba   : > { %v2493_v21 = vpop.f32.mrf.mxu0 }
 0x2bb   : > { %v2533_v23 = vadd.f32 %v2490_v44, %v2339_v61 }
 0x2bd   : > { %2565 = vst [vmem:[%s4810_s9 + $0xc8] sm:$0xff] %v2533_v23  ;;  %v2596_v20 = vadd.f32 %v2595_v24, %v2533_v23  ;;  %v2635_v54 = vmul.f32 %v2533_v23, %v2533_v23 }
 0x2be   : > { %v2102_v47 = vpop.f32.mrf.mxu2 }
 0x2bf   : > { %v2666_v19 = vadd.f32 %v2665_v1, %v2635_v54  ;;  %v2143_v3 = vadd.f32 %v2102_v47, %v1956_v17  ;;  %v2299_v6 = vpop.f32.mrf.mxu3 }
 0x2c0   : > { %v1917_v34 = vpop.f32.mrf.mxu1 }
 0x2c1   : > { %v2340_v28 = vadd.f32 %v2299_v6, %v2143_v3  ;;  %v1957_v10 = vadd.f32 %v1917_v34, %v4777_v36 }
 0x2c2   : > { %v2495_v49 = vpop.f32.mrf.mxu0 }
 0x2c3   : > { %v2534_v53 = vadd.f32 %v2493_v21, %v2340_v28 }
 0x2c5   : > { %2566 = vst [vmem:[%s4810_s9 + $0xd0] sm:$0xff] %v2534_v53  ;;  %v2597_v29 = vadd.f32 %v2596_v20, %v2534_v53  ;;  %v2636_v59 = vmul.f32 %v2534_v53, %v2534_v53 }
 0x2c6   : > { %v2104_v0 = vpop.f32.mrf.mxu2 }
 0x2c7   : > { %v2667_v27 = vadd.f32 %v2666_v19, %v2636_v59  ;;  %v2144_v12 = vadd.f32 %v2104_v0, %v1957_v10  ;;  %v2301_v57 = vpop.f32.mrf.mxu3 }
 0x2c8   : > { %v1920_v32 = vpop.f32.mrf.mxu1 }
 0x2c9   : > { %v2341_v42 = vadd.f32 %v2301_v57, %v2144_v12  ;;  %v1958_v30 = vadd.f32 %v1920_v32, %v4782_v4 }
 0x2ca   : > { %v2498_v48 = vpop.f32.mrf.mxu0 }
 0x2cb   : > { %v2535_v7 = vadd.f32 %v2495_v49, %v2341_v42 }
 0x2cd   : > { %2567 = vst [vmem:[%s4810_s9 + $0xd8] sm:$0xff] %v2535_v7  ;;  %v2598_v5 = vadd.f32 %v2597_v29, %v2535_v7  ;;  %v2637_v13 = vmul.f32 %v2535_v7, %v2535_v7 }
 0x2ce   : > { %v2107_v16 = vpop.f32.mrf.mxu2 }
 0x2cf   : > { %v2668_v15 = vadd.f32 %v2667_v27, %v2637_v13  ;;  %v2145_v35 = vadd.f32 %v2107_v16, %v1958_v30  ;;  %v2304_v8 = vpop.f32.mrf.mxu3 }
 0x2d0   : > { %v1922_v36 = vpop.f32.mrf.mxu1 }
 0x2d1   : > { %v2342_v60 = vadd.f32 %v2304_v8, %v2145_v35  ;;  %v1959_v41 = vadd.f32 %v1922_v36, %v4789_v31 }
 0x2d2   : > { %v2500_v33 = vpop.f32.mrf.mxu0 }
 0x2d3   : > { %v2536_v58 = vadd.f32 %v2498_v48, %v2342_v60 }
 0x2d5   : > { %2568 = vst [vmem:[%s4810_s9 + $0xe0] sm:$0xff] %v2536_v58  ;;  %v2599_v52 = vadd.f32 %v2598_v5, %v2536_v58  ;;  %v2638_v55 = vmul.f32 %v2536_v58, %v2536_v58 }
 0x2d6   : > { %v2109_v63 = vpop.f32.mrf.mxu2 }
 0x2d7   : > { %v2669_v45 = vadd.f32 %v2668_v15, %v2638_v55  ;;  %v2146_v56 = vadd.f32 %v2109_v63, %v1959_v41  ;;  %v2306_v51 = vpop.f32.mrf.mxu3 }
 0x2d8   : > { %v1925_v4 = vpop.f32.mrf.mxu1 }
 0x2d9   : > { %v2343_v38 = vadd.f32 %v2306_v51, %v2146_v56  ;;  %v1960_v14 = vadd.f32 %v1925_v4, %v4794_v2 }
 0x2da   : > { %v2503_v31 = vpop.f32.mrf.mxu0 }
 0x2db   : > { %v2537_v18 = vadd.f32 %v2500_v33, %v2343_v38 }
 0x2dd   : > { %2569 = vst [vmem:[%s4810_s9 + $0xe8] sm:$0xff] %v2537_v18  ;;  %v2600_v50 = vadd.f32 %v2599_v52, %v2537_v18  ;;  %v2639_v46 = vmul.f32 %v2537_v18, %v2537_v18 }
 0x2de   : > { %v2112_v40 = vpop.f32.mrf.mxu2 }
 0x2df   : > { %v2670_v22 = vadd.f32 %v2669_v45, %v2639_v46  ;;  %v2147_v44 = vadd.f32 %v2112_v40, %v1960_v14  ;;  %v2309_v39 = vpop.f32.mrf.mxu3 }
 0x2e0   : > { %v1927_v25 = vpop.f32.mrf.mxu1 }
 0x2e1   : > { %v2344_v24 = vadd.f32 %v2309_v39, %v2147_v44  ;;  %v1961_v9 = vadd.f32 %v1927_v25, %v4801_v43 }
 0x2e2   : > { %v2505_v2 = vpop.f32.mrf.mxu0 }
 0x2e3   : > { %v2538_v11 = vadd.f32 %v2503_v31, %v2344_v24 }
 0x2e5   : > { %2570 = vst [vmem:[%s4810_s9 + $0xf0] sm:$0xff] %v2538_v11  ;;  %v2601_v37 = vadd.f32 %v2600_v50, %v2538_v11  ;;  %v2640_v1 = vmul.f32 %v2538_v11, %v2538_v11 }
 0x2e6   : > { %v2114_v26 = vpop.f32.mrf.mxu2 }
 0x2e7   : > { %v2671_v62 = vadd.f32 %v2670_v22, %v2640_v1  ;;  %v2148_v61 = vadd.f32 %v2114_v26, %v1961_v9  ;;  %v2311_v21 = vpop.f32.mrf.mxu3 }
 0x2e9   : > { %v2345_v23 = vadd.f32 %v2311_v21, %v2148_v61 }
 0x2eb   : > { %v2539_v20 = vadd.f32 %v2505_v2, %v2345_v23 }
 0x2ed   : > { %2571 = vst [vmem:[%s4810_s9 + $0xf8] sm:$0xff] %v2539_v20  ;;  %v2602_v54 = vadd.f32 %v2601_v37, %v2539_v20  ;;  %v2641_v17 = vmul.f32 %v2539_v20, %v2539_v20 }
 0x2ef   : > { %v2603_v47 = vrot.slane %v2602_v54, 4  ;;  %v2672_v19 = vadd.f32 %v2671_v62, %v2641_v17 }
 0x2f1   : > { %v2604_v3 = vadd.f32 %v2603_v47, %v2602_v54  ;;  %v2673_v6 = vrot.slane %v2672_v19, 4 }
 0x2f3   : > { %v2605_v34 = vrot.slane %v2604_v3, 2  ;;  %v2674_v28 = vadd.f32 %v2673_v6, %v2672_v19 }
 0x2f5   : > { %v2606_v49 = vadd.f32 %v2605_v34, %v2604_v3  ;;  %v2675_v43 = vrot.slane %v2674_v28, 2 }
 0x2f7   : > { %v2607_v53 = vrot.slane %v2606_v49, 1  ;;  %v2676_v29 = vadd.f32 %v2675_v43, %v2674_v28 }
 0x2f9   : > { %v2608_v59 = vadd.f32 %v2607_v53, %v2606_v49  ;;  %v2677_v10 = vrot.slane %v2676_v29, 1 }
 0x2fb   : > { %2609 = vst [vmem:[%s265_s13] sm:$0x1] %v2608_v59  ;;  %v2678_v0 = vadd.f32 %v2677_v10, %v2676_v29 }
 0x2fd   : > { %2679 = vst [vmem:[%s268_s16] sm:$0x1] %v2678_v0 }
 0x2fe PF: > { %s17_s21 = sadd.s32 1, %s3468_s21  }
 0x2ff   : > { %p14_p4 = scmp.ge.s32.totalorder %s17_s21, 4  }
 0x301   :  { %16 = sbr.rel (!%p14_p4) target bundleno = 1 (0x1), region = 98 }

// kernel: double_conv.3
= control target key start
LH: loop header
LB: loop body
LE: loop exit
PB: predicated region body
PF: predicated region fallthrough
CT: control target
= control target key end

     0   :  { %s3712_s21 = smov 0   ;;  %s4819_s0 = inlined_call_operand.vmem [shape: bf16[2,18,18,128], index: 0, kind: input, shape index: {}]   ;;  %s4820_s1 = inlined_call_operand.vmem [shape: bf16[9,128,128], index: 1, kind: input, shape index: {}]   ;;  %s4821_s2 = inlined_call_operand.vmem [shape: f32[1,128], index: 2, kind: input, shape index: {}, may-alias: {2,3}]   ;;  %s4822_s3 = inlined_call_operand.vmem [shape: f32[1,128], index: 3, kind: input, shape index: {}, may-alias: {2,3}]   ;;  %s4823_s4 = inlined_call_operand.vmem [shape: f32[2,256,128], index: 4, kind: output, shape index: {0}]   ;;  %s4824_s5 = inlined_call_operand.vmem [shape: f32[2,1,128], index: 5, kind: output, shape index: {1}]   ;;  %s4825_s6 = inlined_call_operand.vmem [shape: f32[2,1,128], index: 6, kind: output, shape index: {2}]  }
   0x1 LB: > { %s3011_s2 = sadd.s32 4294967295, %s3675_s21   ;;  %p3015_p0 = scmp.ge.s32.totalorder %s3675_s21, 1  ;;  %s3675_s21 = sphi %s3712_s21, %s17_s21  }
   0x2   : > { %p217_p1 = scmp.lt.s32.totalorder %s3675_s21, 3 }
   0x4   : > { %p218_p2 = pnand %p3015_p0, %p217_p1 }
   0x6   : > { %221 = sbr.rel (%p218_p2) target bundleno = 770 (0x302), region = 36 }
   0xb   : > { %v3561_v0 = vld [vmem:[%s4820_s1 + $0x78] sm:$0xff]  ;;  %p253_p3 = scmp.lt.s32.totalorder %s3011_s2, 1  ;;  %v3560_v1 = vld [vmem:[%s4820_s1 + $0x70] sm:$0xff]  ;;  %v3559_v2 = vld [vmem:[%s4820_s1 + $0x68] sm:$0xff]  ;;  %vm339_vm0 = vsmask.f32 3328 }
   0xc   : > { %3618 = vmatpush.bf16.msra.mxu1 %v3561_v0  ;;  %3619 = vmatpush.bf16.msra.mxu2 %v3561_v0  ;;  %vm340_vm1 = vsmask.f32 7440  ;;  %v3558_v6 = vld [vmem:[%s4820_s1 + $0x60] sm:$0xff]  ;;  %v3557_v35 = vld [vmem:[%s4820_s1 + $0x58] sm:$0xff]  ;;  %v3556_v54 = vld [vmem:[%s4820_s1 + $0x50] sm:$0xff]  ;;  %vm1193_vm3 = vcmask 1042432  }
   0xd   : > { %s4945_s2 = smov (!%p253_p3, %s3011_s2), 1  ;;  %3620 = vmatpush.bf16.msra.mxu3 %v3561_v0  ;;  %855 = vmatpush.bf16.msra.mxu0 %v3561_v0  ;;  %vm3750_vm2 = vmor %vm339_vm0, %vm340_vm1  ;;  %vm1194_vm4 = vcmask 1046532  }
   0xe   : > { %s3642_s25 = smul.u32 216, %s4945_s2  ;;  %vm4123_vm5 = vmor %vm1193_vm3, %vm1194_vm4  ;;  %s3527_s7 = sshll.u32 %s4945_s2, 8 }
   0xf   : > { %s4691_s10 = scalar_lea.vmem %s4823_s4, %s3527_s7  ;;  %s265_s12 = scalar_lea.vmem %s4824_s5, %s4945_s2 }
  0x10   : > { %3621 = vmatpush.bf16.msra.mxu1 %v3560_v1  ;;  %3622 = vmatpush.bf16.msra.mxu2 %v3560_v1  ;;  %s3735_s30 = scalar_lea.vmem %s4819_s0, %s3642_s25  ;;  %s268_s15 = scalar_lea.vmem %s4825_s6, %s4945_s2 }
  0x11   : > { %3623 = vmatpush.bf16.msra.mxu3 %v3560_v1  ;;  %856 = vmatpush.bf16.msra.mxu0 %v3560_v1  ;;  %v281_v3 = vld [vmem:[%s3735_s30 + $0x30] sm:$0xf]  ;;  %v282_v4 = vld [vmem:[%s3735_s30 + $0x34] sm:$0xf]  ;;  %v283_v5 = vld [vmem:[%s3735_s30 + $0x38] sm:$0x1] }
  0x12   : > { %v439_v7 = vshrl.u32 %v281_v3, 16  ;;  %v442_v8 = vshll.u32 %v281_v3, 16  ;;  %v448_v9 = vshll.u32 %v282_v4, 16  ;;  %v452_v10 = vshrl.u32 %v282_v4, 16  ;;  %v293_v11 = vld [vmem:[%s3735_s30 + $0x60] sm:$0xf] }
  0x13   : > { %v458_v12 = vshll.u32 %v283_v5, 16  ;;  %v294_v13 = vld [vmem:[%s3735_s30 + $0x64] sm:$0xf]  ;;  %v295_v14 = vld [vmem:[%s3735_s30 + $0x68] sm:$0x1]  ;;  %v535_v15 = vshrl.u32 %v293_v11, 16 }
  0x14   : > { %3624 = vmatpush.bf16.msra.mxu1 %v3559_v2  ;;  %3625 = vmatpush.bf16.msra.mxu2 %v3559_v2  ;;  %v441_v16 = vrot.slane %v439_v7, 4  ;;  %v444_v17 = vrot.slane %v442_v8, 5  ;;  %v450_v18 = vrot.slane %v448_v9, 5  ;;  %v454_v19 = vrot.slane %v452_v10, 4  ;;  %v305_v20 = vld [vmem:[%s3735_s30 + $0x90] sm:$0xf] }
  0x15   : > { %3626 = vmatpush.bf16.msra.mxu3 %v3559_v2  ;;  %857 = vmatpush.bf16.msra.mxu0 %v3559_v2  ;;  %v460_v21 = vrot.slane %v458_v12, 5  ;;  %v537_v22 = vrot.slane %v535_v15, 4  ;;  %v538_v23 = vshll.u32 %v293_v11, 16  ;;  %v544_v24 = vshll.u32 %v294_v13, 16  ;;  %v306_v29 = vld [vmem:[%s3735_s30 + $0x94] sm:$0xf] }
  0x16   : > { %v445_v25 = vor.u32 %v444_v17, %v441_v16  ;;  %v455_v26 = vor.u32 %v454_v19, %v450_v18  ;;  %v548_v27 = vshrl.u32 %v294_v13, 16  ;;  %v554_v28 = vshll.u32 %v295_v14, 16  ;;  %v307_v41 = vld [vmem:[%s3735_s30 + $0x98] sm:$0x1]  ;;  %v3763_v49 = vld [vmem:[%s3735_s30] sm:$0xf] }
  0x17   : > { %v540_v31 = vrot.slane %v538_v23, 5  ;;  %v546_v32 = vrot.slane %v544_v24, 5  ;;  %v631_v33 = vshrl.u32 %v305_v20, 16  ;;  %v634_v34 = vshll.u32 %v305_v20, 16  ;;  %v3773_v62 = vld [vmem:[%s3735_s30 + $0x4] sm:$0xf] }
  0x18   : > { %3627 = vmatpush.bf16.msra.mxu1 %v3558_v6  ;;  %3628 = vmatpush.bf16.msra.mxu2 %v3558_v6  ;;  %v446_v36 = vrot.slane %v445_v25, 4  ;;  %v456_v37 = vrot.slane %v455_v26, 4  ;;  %v550_v38 = vrot.slane %v548_v27, 4  ;;  %v556_v39 = vrot.slane %v554_v28, 5  ;;  %v3779_v4 = vld [vmem:[%s3735_s30 + $0x8] sm:$0x1] }
  0x19   : > { %3629 = vmatpush.bf16.msra.mxu3 %v3558_v6  ;;  %858 = vmatpush.bf16.msra.mxu0 %v3558_v6  ;;  %v541_v40 = vor.u32 %v540_v31, %v537_v22  ;;  %v633_v42 = vrot.slane %v631_v33, 4  ;;  %v636_v43 = vrot.slane %v634_v34, 5  ;;  %v640_v44 = vshll.u32 %v306_v29, 16  ;;  %v3782_v5 = vld [vmem:[%s3735_s30 + $0x3c] sm:$0xf]  ;;  %v3555_v10 = vld [vmem:[%s4820_s1 + $0x48] sm:$0xff] }
  0x1a   : > { %v451_v45 = vsel %vm3750_vm2, %v446_v36, %v450_v18  ;;  %v461_v46 = vsel %vm3750_vm2, %v456_v37, %v460_v21  ;;  %v551_v47 = vor.u32 %v550_v38, %v546_v32  ;;  %v644_v48 = vshrl.u32 %v306_v29, 16  ;;  %v3793_v15 = vld [vmem:[%s3735_s30 + $0x40] sm:$0xf]  ;;  %v3799_v19 = vld [vmem:[%s3735_s30 + $0x44] sm:$0x1]  ;;  %v3569_v37 = vld [vmem:[%s4820_s1 + $0xb8] sm:$0xff] }
  0x1b   : > { %v751_v50 = vunpack.c.l.b16 %v451_v45  ;;  %v752_v51 = vunpack.c.l.b16 %v461_v46  ;;  %v542_v52 = vrot.slane %v541_v40, 4  ;;  %v637_v53 = vor.u32 %v636_v43, %v633_v42  ;;  %v296_v25 = vld [vmem:[%s3735_s30 + $0x6c] sm:$0xf]  ;;  %v3554_v31 = vld [vmem:[%s4820_s1 + $0x40] sm:$0xff]  ;;  %v297_v40 = vld [vmem:[%s3735_s30 + $0x70] sm:$0xf] }
  0x1c   : > { %3630 = vmatpush.bf16.msra.mxu1 %v3557_v35  ;;  %3631 = vmatpush.bf16.msra.mxu2 %v3557_v35  ;;  %v552_v55 = vrot.slane %v551_v47, 4  ;;  %v642_v56 = vrot.slane %v640_v44, 5  ;;  %v646_v57 = vrot.slane %v644_v48, 4  ;;  %v650_v58 = vshll.u32 %v307_v41, 16  ;;  %v3577_v43 = vld [vmem:[%s4820_s1 + $0xf8] sm:$0xff] }
  0x1d   : > { %3632 = vmatpush.bf16.msra.mxu3 %v3557_v35  ;;  %859 = vmatpush.bf16.msra.mxu0 %v3557_v35  ;;  %v3768_v59 = vpack.c.b16 %v752_v51, %v751_v50  ;;  %v547_v60 = vsel %vm3750_vm2, %v542_v52, %v546_v32  ;;  %v638_v61 = vrot.slane %v637_v53, 4  ;;  %v343_v63 = vshrl.u32 %v3763_v49, 16  ;;  %v298_v47 = vld [vmem:[%s3735_s30 + $0x74] sm:$0x1]  ;;  %v308_v53 = vld [vmem:[%s3735_s30 + $0x9c] sm:$0xf] }
  0x1e   : > { %v557_v0 = vsel %vm3750_vm2, %v552_v55, %v556_v39  ;;  %v759_v1 = vunpack.c.l.b16 %v547_v60  ;;  %v647_v2 = vor.u32 %v646_v57, %v642_v56  ;;  %v652_v3 = vrot.slane %v650_v58, 5 }
  0x1f   : > { %v760_v6 = vunpack.c.l.b16 %v557_v0  ;;  %v643_v7 = vsel %vm3750_vm2, %v638_v61, %v642_v56  ;;  %v345_v8 = vrot.slane %v343_v63, 4  ;;  %v346_v9 = vshll.u32 %v3763_v49, 16  ;;  %v3553_v56 = vld [vmem:[%s4820_s1 + $0x38] sm:$0xff]  ;;  %v3568_v61 = vld [vmem:[%s4820_s1 + $0xb0] sm:$0xff] }
  0x20   : > { %3633 = vmatpush.bf16.msra.mxu1 %v3556_v54  ;;  %3634 = vmatpush.bf16.msra.mxu2 %v3556_v54  ;;  %v648_v11 = vrot.slane %v647_v2, 4  ;;  %v767_v12 = vunpack.c.l.b16 %v643_v7  ;;  %v352_v13 = vshll.u32 %v3773_v62, 16  ;;  %v356_v14 = vshrl.u32 %v3773_v62, 16  ;;  %v3576_v2 = vld [vmem:[%s4820_s1 + $0xf0] sm:$0xff] }
  0x21   : > { %3635 = vmatpush.bf16.msra.mxu3 %v3556_v54  ;;  %860 = vmatpush.bf16.msra.mxu0 %v3556_v54  ;;  %v3795_v16 = vpack.c.b16 %v760_v6, %v759_v1  ;;  %v348_v17 = vrot.slane %v346_v9, 5  ;;  %v362_v18 = vshll.u32 %v3779_v4, 16  ;;  %v463_v20 = vshrl.u32 %v3782_v5, 16 }
  0x22   : > { %v653_v21 = vsel %vm3750_vm2, %v648_v11, %v652_v3  ;;  %v354_v22 = vrot.slane %v352_v13, 5  ;;  %v358_v23 = vrot.slane %v356_v14, 4  ;;  %v466_v24 = vshll.u32 %v3782_v5, 16  ;;  %v3585_v11 = vld [vmem:[%s4820_s1 + $0x138] sm:$0xff] }
  0x23   : > { %4860 = vst [vmem:[#allocation2_spill] sm:$0xff] %v3795_v16  ;;  %v768_v26 = vunpack.c.l.b16 %v653_v21  ;;  %v349_v27 = vor.u32 %v348_v17, %v345_v8  ;;  %v364_v28 = vrot.slane %v362_v18, 5  ;;  %v465_v29 = vrot.slane %v463_v20, 4  ;;  %v309_v8 = vld [vmem:[%s3735_s30 + $0xa0] sm:$0xf]  ;;  %v3552_v20 = vld [vmem:[%s4820_s1 + $0x30] sm:$0xff] }
  0x24   : > { %3636 = vmatpush.bf16.msra.mxu1 %v3555_v10  ;;  %3637 = vmatpush.bf16.msra.mxu2 %v3555_v10  ;;  %v359_v32 = vor.u32 %v358_v23, %v354_v22  ;;  %v468_v33 = vrot.slane %v466_v24, 5  ;;  %v472_v34 = vshll.u32 %v3793_v15, 16  ;;  %v476_v35 = vshrl.u32 %v3793_v15, 16  ;;  %v310_v17 = vld [vmem:[%s3735_s30 + $0xa4] sm:$0x1] }
  0x25   : > { %3638 = vmatpush.bf16.msra.mxu3 %v3555_v10  ;;  %861 = vmatpush.bf16.msra.mxu0 %v3555_v10  ;;  %v3811_v36 = vpack.c.b16 %v768_v26, %v767_v12  ;;  %v350_v38 = vrot.slane %v349_v27, 4  ;;  %v482_v39 = vshll.u32 %v3799_v19, 16  ;;  %v559_v41 = vshrl.u32 %v296_v25, 16  ;;  %v3846_v18 = vld [vmem:[%s3735_s30 + $0xc] sm:$0xf] }
  0x26   : > { %v360_v42 = vrot.slane %v359_v32, 4  ;;  %v469_v44 = vor.u32 %v468_v33, %v465_v29  ;;  %v474_v45 = vrot.slane %v472_v34, 5  ;;  %v478_v46 = vrot.slane %v476_v35, 4  ;;  %v3567_v29 = vld [vmem:[%s4820_s1 + $0xa8] sm:$0xff]  ;;  %v3858_v34 = vld [vmem:[%s3735_s30 + $0x10] sm:$0xf] }
  0x27   : > { %v355_v48 = vsel %vm3750_vm2, %v350_v38, %v354_v22  ;;  %v484_v50 = vrot.slane %v482_v39, 5  ;;  %v561_v51 = vrot.slane %v559_v41, 4  ;;  %v562_v52 = vshll.u32 %v296_v25, 16 }
  0x28   : > { %3639 = vmatpush.bf16.msra.mxu1 %v3554_v31  ;;  %3640 = vmatpush.bf16.msra.mxu2 %v3554_v31  ;;  %v365_v54 = vsel %vm3750_vm2, %v360_v42, %v364_v28  ;;  %v743_v55 = vunpack.c.l.b16 %v355_v48  ;;  %v470_v57 = vrot.slane %v469_v44, 4  ;;  %v479_v58 = vor.u32 %v478_v46, %v474_v45  ;;  %v3869_v42 = vld [vmem:[%s3735_s30 + $0x14] sm:$0x1]  ;;  %v3551_v48 = vld [vmem:[%s4820_s1 + $0x28] sm:$0xff] }
  0x29   : > { %3641 = vmatpush.bf16.msra.mxu3 %v3554_v31  ;;  %862 = vmatpush.bf16.msra.mxu0 %v3554_v31  ;;  %v744_v60 = vunpack.c.l.b16 %v365_v54  ;;  %v564_v63 = vrot.slane %v562_v52, 5  ;;  %v568_v0 = vshll.u32 %v297_v40, 16  ;;  %v572_v1 = vshrl.u32 %v297_v40, 16  ;;  %v3880_v54 = vld [vmem:[%s3735_s30 + $0x48] sm:$0xf] }
  0x2a   : > { %v475_v3 = vsel %vm3750_vm2, %v470_v57, %v474_v45  ;;  %v480_v6 = vrot.slane %v479_v58, 4  ;;  %v578_v7 = vshll.u32 %v298_v47, 16  ;;  %v655_v9 = vshrl.u32 %v308_v53, 16 }
  0x2b   : > { %883 = vmatmul.bf16.vlgmr.msra.gmra.mxu1 %v3768_v59  ;;  %903 = vmatmul.bf16.vlgmr.msra.gmra.mxu2 %v3795_v16  ;;  %v775_v10 = vpack.c.b16 %v744_v60, %v743_v55  ;;  %v753_v12 = vunpack.c.l.b16 %v475_v3  ;;  %v565_v13 = vor.u32 %v564_v63, %v561_v51  ;;  %v570_v14 = vrot.slane %v568_v0, 5  ;;  %v3566_v60 = vld [vmem:[%s4820_s1 + $0xa0] sm:$0xff]  ;;  %v3583_v3 = vld [vmem:[%s4820_s1 + $0x128] sm:$0xff] }
  0x2c   : > { %1437 = vmatpush.bf16.msrb.mxu2 %v3569_v37  ;;  %923 = vmatmul.bf16.vlgmr.msra.gmra.mxu3 %v3811_v36  ;;  %v485_v21 = vsel %vm3750_vm2, %v480_v6, %v484_v50  ;;  %v574_v22 = vrot.slane %v572_v1, 4  ;;  %v580_v23 = vrot.slane %v578_v7, 5  ;;  %v657_v24 = vrot.slane %v655_v9, 4  ;;  %v3575_v37 = vld [vmem:[%s4820_s1 + $0xe8] sm:$0xff]  ;;  %v3550_v6 = vld [vmem:[%s4820_s1 + $0x20] sm:$0xff] }
  0x2d   : > { %1629 = vmatpush.bf16.msrb.mxu3 %v3577_v43  ;;  %1088 = vmatpush.bf16.msrb.mxu1 %v3553_v56  ;;  %v754_v25 = vunpack.c.l.b16 %v485_v21  ;;  %v566_v26 = vrot.slane %v565_v13, 4  ;;  %v658_v27 = vshll.u32 %v308_v53, 16  ;;  %v664_v28 = vshll.u32 %v309_v8, 16  ;;  %v3584_v43 = vld [vmem:[%s4820_s1 + $0x130] sm:$0xff]  ;;  %v3911_v21 = vld [vmem:[%s3735_s30 + $0x78] sm:$0xf] }
  0x2e   : > { %863 = vmatmul.bf16.vlgmr.msra.gmra.mxu0 %v775_v10  ;;  %v575_v31 = vor.u32 %v574_v22, %v570_v14  ;;  %v668_v32 = vshrl.u32 %v309_v8, 16  ;;  %v674_v33 = vshll.u32 %v310_v17, 16  ;;  %v367_v35 = vshrl.u32 %v3846_v18, 16  ;;  %v3899_v10 = vld [vmem:[%s3735_s30 + $0x4c] sm:$0xf] }
  0x2f   : > { %1843 = vmatpush.bf16.msrb.mxu0 %v3585_v11  ;;  %v3864_v38 = vpack.c.b16 %v754_v25, %v753_v12  ;;  %v571_v39 = vsel %vm3750_vm2, %v566_v26, %v570_v14  ;;  %v660_v40 = vrot.slane %v658_v27, 5  ;;  %v666_v41 = vrot.slane %v664_v28, 5  ;;  %v3907_v17 = vld [vmem:[%s3735_s30 + $0x50] sm:$0x1]  ;;  %v3565_v26 = vld [vmem:[%s4820_s1 + $0x98] sm:$0xff] }
  0x30   : > { %1438 = vmatpush.bf16.msrb.mxu2 %v3568_v61  ;;  %v576_v44 = vrot.slane %v575_v31, 4  ;;  %v761_v45 = vunpack.c.l.b16 %v571_v39  ;;  %v670_v46 = vrot.slane %v668_v32, 4  ;;  %v676_v47 = vrot.slane %v674_v33, 5  ;;  %v3574_v61 = vld [vmem:[%s4820_s1 + $0xe0] sm:$0xff]  ;;  %v3573_v27 = vld [vmem:[%s4820_s1 + $0xd8] sm:$0xff] }
  0x31   : > { %1630 = vmatpush.bf16.msrb.mxu3 %v3576_v2  ;;  %4861 = vst [vmem:[#allocation3_spill] sm:$0xff] %v3864_v38  ;;  %1089 = vmatpush.bf16.msrb.mxu1 %v3552_v20  ;;  %v661_v50 = vor.u32 %v660_v40, %v657_v24  ;;  %v369_v51 = vrot.slane %v367_v35, 4  ;;  %v370_v52 = vshll.u32 %v3846_v18, 16  ;;  %v376_v53 = vshll.u32 %v3858_v34, 16  ;;  %v3582_v40 = vld [vmem:[%s4820_s1 + $0x120] sm:$0xff] }
  0x32   : > { %v581_v55 = vsel %vm3750_vm2, %v576_v44, %v580_v23  ;;  %v671_v56 = vor.u32 %v670_v46, %v666_v41  ;;  %v380_v57 = vshrl.u32 %v3858_v34, 16  ;;  %v386_v58 = vshll.u32 %v3869_v42, 16  ;;  %v3933_v46 = vld [vmem:[%s3735_s30 + $0x7c] sm:$0xf] }
  0x33   : > { %v762_v63 = vunpack.c.l.b16 %v581_v55  ;;  %v662_v0 = vrot.slane %v661_v50, 4  ;;  %v372_v1 = vrot.slane %v370_v52, 5  ;;  %v378_v2 = vrot.slane %v376_v53, 5  ;;  %1844 = vmatpush.bf16.msrb.mxu0 %v3584_v43  ;;  %v311_v55 = vld [vmem:[%s3735_s30 + $0xa8] sm:$0xf] }
  0x34   : > { %1439 = vmatpush.bf16.msrb.mxu2 %v3567_v29  ;;  %v672_v7 = vrot.slane %v671_v56, 4  ;;  %v382_v8 = vrot.slane %v380_v57, 4  ;;  %v388_v9 = vrot.slane %v386_v58, 5  ;;  %v487_v11 = vshrl.u32 %v3880_v54, 16  ;;  %v3564_v56 = vld [vmem:[%s4820_s1 + $0x90] sm:$0xff] }
  0x35   : > { %1631 = vmatpush.bf16.msrb.mxu3 %v3575_v37  ;;  %1090 = vmatpush.bf16.msrb.mxu1 %v3551_v48  ;;  %v3902_v12 = vpack.c.b16 %v762_v63, %v761_v45  ;;  %v667_v13 = vsel %vm3750_vm2, %v662_v0, %v666_v41  ;;  %v373_v14 = vor.u32 %v372_v1, %v369_v51  ;;  %v490_v20 = vshll.u32 %v3880_v54, 16  ;;  %v3549_v48 = vld [vmem:[%s4820_s1 + $0x18] sm:$0xff]  ;;  %v3572_v57 = vld [vmem:[%s4820_s1 + $0xd0] sm:$0xff] }
  0x36   : > { %v677_v22 = vsel %vm3750_vm2, %v672_v7, %v676_v47  ;;  %v769_v23 = vunpack.c.l.b16 %v667_v13  ;;  %v383_v24 = vor.u32 %v382_v8, %v378_v2  ;;  %v489_v25 = vrot.slane %v487_v11, 4  ;;  %v3936_v47 = vld [vmem:[%s3735_s30 + $0x80] sm:$0x1]  ;;  %v312_v11 = vld [vmem:[%s3735_s30 + $0xac] sm:$0xf] }
  0x37   : > { %v770_v28 = vunpack.c.l.b16 %v677_v22  ;;  %v374_v29 = vrot.slane %v373_v14, 4  ;;  %1845 = vmatpush.bf16.msrb.mxu0 %v3583_v3  ;;  %v492_v31 = vrot.slane %v490_v20, 5  ;;  %v496_v32 = vshll.u32 %v3899_v10, 16  ;;  %v3548_v14 = vld [vmem:[%s4820_s1 + $0x10] sm:$0xff] }
  0x38   : > { %1440 = vmatpush.bf16.msrb.mxu2 %v3566_v60  ;;  %v384_v33 = vrot.slane %v383_v24, 4  ;;  %v500_v35 = vshrl.u32 %v3899_v10, 16  ;;  %v506_v37 = vshll.u32 %v3907_v17, 16  ;;  %v583_v39 = vshrl.u32 %v3911_v21, 16 }
  0x39   : > { %1632 = vmatpush.bf16.msrb.mxu3 %v3574_v61  ;;  %1091 = vmatpush.bf16.msrb.mxu1 %v3550_v6  ;;  %v3928_v41 = vpack.c.b16 %v770_v28, %v769_v23  ;;  %v379_v43 = vsel %vm3750_vm2, %v374_v29, %v378_v2  ;;  %v493_v44 = vor.u32 %v492_v31, %v489_v25  ;;  %v498_v45 = vrot.slane %v496_v32, 5  ;;  %v3581_v6 = vld [vmem:[%s4820_s1 + $0x118] sm:$0xff]  ;;  %v313_v25 = vld [vmem:[%s3735_s30 + $0xb0] sm:$0x1] }
  0x3a   : > { %v389_v50 = vsel %vm3750_vm2, %v384_v33, %v388_v9  ;;  %v745_v51 = vunpack.c.l.b16 %v379_v43  ;;  %v502_v52 = vrot.slane %v500_v35, 4  ;;  %v508_v53 = vrot.slane %v506_v37, 5  ;;  %v3971_v31 = vld [vmem:[%s3735_s30 + $0x18] sm:$0xf] }
  0x3b   : > { %4862 = vst [vmem:[#allocation4_spill] sm:$0xff] %v3928_v41  ;;  %888 = vmatmul.bf16.gmra.mxu1 %v3864_v38  ;;  %908 = vmatmul.bf16.gmra.mxu2 %v3902_v12  ;;  %v746_v58 = vunpack.c.l.b16 %v389_v50  ;;  %v494_v60 = vrot.slane %v493_v44, 4  ;;  %v585_v61 = vrot.slane %v583_v39, 4  ;;  %v586_v63 = vshll.u32 %v3911_v21, 16 }
  0x3c   : > { %1441 = vmatpush.bf16.msrb.mxu2 %v3565_v26  ;;  %928 = vmatmul.bf16.gmra.mxu3 %v3928_v41  ;;  %v503_v0 = vor.u32 %v502_v52, %v498_v45  ;;  %v592_v1 = vshll.u32 %v3933_v46, 16  ;;  %v596_v2 = vshrl.u32 %v3933_v46, 16  ;;  %v602_v3 = vshll.u32 %v3936_v47, 16  ;;  %v3979_v52 = vld [vmem:[%s3735_s30 + $0x1c] sm:$0xf] }
  0x3d   : > { %1633 = vmatpush.bf16.msrb.mxu3 %v3573_v27  ;;  %1846 = vmatpush.bf16.msrb.mxu0 %v3582_v40  ;;  %v3960_v7 = vpack.c.b16 %v746_v58, %v745_v51  ;;  %v499_v8 = vsel %vm3750_vm2, %v494_v60, %v498_v45  ;;  %v588_v9 = vrot.slane %v586_v63, 5  ;;  %v679_v13 = vshrl.u32 %v311_v55, 16  ;;  %v3563_v45 = vld [vmem:[%s4820_s1 + $0x88] sm:$0xff]  ;;  %v3987_v60 = vld [vmem:[%s3735_s30 + $0x20] sm:$0x1] }
  0x3e   : > { %1092 = vmatpush.bf16.msrb.mxu1 %v3549_v48  ;;  %v504_v20 = vrot.slane %v503_v0, 4  ;;  %v755_v22 = vunpack.c.l.b16 %v499_v8  ;;  %v594_v23 = vrot.slane %v592_v1, 5  ;;  %v598_v24 = vrot.slane %v596_v2, 4 }
  0x3f   : > { %868 = vmatmul.bf16.gmra.mxu0 %v3960_v7  ;;  %v589_v26 = vor.u32 %v588_v9, %v585_v61  ;;  %v604_v27 = vrot.slane %v602_v3, 5  ;;  %v681_v28 = vrot.slane %v679_v13, 4  ;;  %v682_v29 = vshll.u32 %v311_v55, 16  ;;  %v3990_v61 = vld [vmem:[%s3735_s30 + $0x54] sm:$0xf] }
  0x40   : > { %1442 = vmatpush.bf16.msrb.mxu2 %v3564_v56  ;;  %v509_v32 = vsel %vm3750_vm2, %v504_v20, %v508_v53  ;;  %v599_v33 = vor.u32 %v598_v24, %v594_v23  ;;  %v688_v35 = vshll.u32 %v312_v11, 16  ;;  %v692_v37 = vshrl.u32 %v312_v11, 16  ;;  %v3571_v11 = vld [vmem:[%s4820_s1 + $0xc8] sm:$0xff]  ;;  %v3580_v13 = vld [vmem:[%s4820_s1 + $0x110] sm:$0xff] }
  0x41   : > { %1634 = vmatpush.bf16.msrb.mxu3 %v3572_v57  ;;  %1847 = vmatpush.bf16.msrb.mxu0 %v3581_v6  ;;  %v756_v39 = vunpack.c.l.b16 %v509_v32  ;;  %v590_v40 = vrot.slane %v589_v26, 4  ;;  %v684_v43 = vrot.slane %v682_v29, 5  ;;  %v698_v44 = vshll.u32 %v313_v25, 16  ;;  %v3562_v25 = vld [vmem:[%s4820_s1 + $0x80] sm:$0xff]  ;;  %v4016_v32 = vld [vmem:[%s3735_s30 + $0x58] sm:$0xf] }
  0x42   : > { %1093 = vmatpush.bf16.msrb.mxu1 %v3548_v14  ;;  %v600_v48 = vrot.slane %v599_v33, 4  ;;  %v690_v50 = vrot.slane %v688_v35, 5  ;;  %v694_v51 = vrot.slane %v692_v37, 4  ;;  %v391_v53 = vshrl.u32 %v3971_v31, 16  ;;  %v3547_v14 = vld [vmem:[%s4820_s1 + $0x8] sm:$0xff] }
  0x43   : > { %v3982_v55 = vpack.c.b16 %v756_v39, %v755_v22  ;;  %v595_v56 = vsel %vm3750_vm2, %v590_v40, %v594_v23  ;;  %v685_v57 = vor.u32 %v684_v43, %v681_v28  ;;  %v700_v58 = vrot.slane %v698_v44, 5  ;;  %v4019_v33 = vld [vmem:[%s3735_s30 + $0x5c] sm:$0x1]  ;;  %v4024_v43 = vld [vmem:[%s3735_s30 + $0x84] sm:$0xf] }
  0x44   : > { %1443 = vmatpush.bf16.msrb.mxu2 %v3563_v45  ;;  %v605_v63 = vsel %vm3750_vm2, %v600_v48, %v604_v27  ;;  %v763_v0 = vunpack.c.l.b16 %v595_v56  ;;  %v695_v1 = vor.u32 %v694_v51, %v690_v50  ;;  %v393_v2 = vrot.slane %v391_v53, 4  ;;  %v3570_v44 = vld [vmem:[%s4820_s1 + $0xc0] sm:$0xff]  ;;  %v3579_v45 = vld [vmem:[%s4820_s1 + $0x108] sm:$0xff] }
  0x45   : > { %4863 = vst [vmem:[#allocation5_spill] sm:$0xff] %v3982_v55  ;;  %v764_v3 = vunpack.c.l.b16 %v605_v63  ;;  %v686_v6 = vrot.slane %v685_v57, 4  ;;  %v394_v8 = vshll.u32 %v3971_v31, 16  ;;  %v400_v9 = vshll.u32 %v3979_v52, 16  ;;  %1635 = vmatpush.bf16.msrb.mxu3 %v3571_v11  ;;  %1848 = vmatpush.bf16.msrb.mxu0 %v3580_v13  ;;  %v3546_v56 = vld [vmem:[%s4820_s1] sm:$0xff] }
  0x46   : > { %v696_v20 = vrot.slane %v695_v1, 4  ;;  %v404_v22 = vshrl.u32 %v3979_v52, 16  ;;  %v410_v23 = vshll.u32 %v3987_v60, 16  ;;  %v511_v24 = vshrl.u32 %v3990_v61, 16  ;;  %1094 = vmatpush.bf16.msrb.mxu1 %v3547_v14 }
  0x47   : > { %v4011_v26 = vpack.c.b16 %v764_v3, %v763_v0  ;;  %v691_v27 = vsel %vm3750_vm2, %v686_v6, %v690_v50  ;;  %v396_v28 = vrot.slane %v394_v8, 5  ;;  %v402_v29 = vrot.slane %v400_v9, 5  ;;  %v4044_v6 = vld [vmem:[%s3735_s30 + $0x88] sm:$0xf] }
  0x48   : > { %v701_v35 = vsel %vm3750_vm2, %v696_v20, %v700_v58  ;;  %v771_v37 = vunpack.c.l.b16 %v691_v27  ;;  %v406_v39 = vrot.slane %v404_v22, 4  ;;  %v412_v40 = vrot.slane %v410_v23, 5  ;;  %1444 = vmatpush.bf16.msrb.mxu2 %v3562_v25  ;;  %v3578_v20 = vld [vmem:[%s4820_s1 + $0x100] sm:$0xff] }
  0x49   : > { %v772_v48 = vunpack.c.l.b16 %v701_v35  ;;  %v397_v50 = vor.u32 %v396_v28, %v393_v2  ;;  %v513_v51 = vrot.slane %v511_v24, 4  ;;  %v514_v53 = vshll.u32 %v3990_v61, 16  ;;  %1636 = vmatpush.bf16.msrb.mxu3 %v3570_v44  ;;  %1849 = vmatpush.bf16.msrb.mxu0 %v3579_v45  ;;  %v4054_v24 = vld [vmem:[%s3735_s30 + $0x8c] sm:$0x1]  ;;  %v4058_v28 = vld [vmem:[%s3735_s30 + $0xb4] sm:$0xf] }
  0x4a   : > { %v407_v57 = vor.u32 %v406_v39, %v402_v29  ;;  %v520_v58 = vshll.u32 %v4016_v32, 16  ;;  %v524_v63 = vshrl.u32 %v4016_v32, 16  ;;  %v530_v0 = vshll.u32 %v4019_v33, 16  ;;  %4865 = vst [vmem:[#allocation7_spill] sm:$0xff] %v4058_v28  ;;  %1095 = vmatpush.bf16.msrb.mxu1 %v3546_v56 }
  0x4b   : > { %893 = vmatmul.bf16.gmra.mxu1 %v3982_v55  ;;  %913 = vmatmul.bf16.gmra.mxu2 %v4011_v26  ;;  %v4041_v1 = vpack.c.b16 %v772_v48, %v771_v37  ;;  %v398_v2 = vrot.slane %v397_v50, 4  ;;  %v516_v3 = vrot.slane %v514_v53, 5  ;;  %v607_v8 = vshrl.u32 %v4024_v43, 16 }
  0x4c   : > { %v408_v9 = vrot.slane %v407_v57, 4  ;;  %v522_v11 = vrot.slane %v520_v58, 5  ;;  %v526_v13 = vrot.slane %v524_v63, 4  ;;  %v532_v14 = vrot.slane %v530_v0, 5  ;;  %v4066_v58 = vld [vmem:[%s3735_s30 + $0xb8] sm:$0xf] }
  0x4d   : > { %4864 = vst [vmem:[#allocation6_spill] sm:$0xff] %v4041_v1  ;;  %933 = vmatmul.bf16.gmra.mxu3 %v4041_v1  ;;  %v403_v22 = vsel %vm3750_vm2, %v398_v2, %v402_v29  ;;  %v517_v23 = vor.u32 %v516_v3, %v513_v51  ;;  %v609_v25 = vrot.slane %v607_v8, 4  ;;  %v610_v27 = vshll.u32 %v4024_v43, 16  ;;  %1850 = vmatpush.bf16.msrb.mxu0 %v3578_v20  ;;  %v4074_v3 = vld [vmem:[%s3735_s30 + $0xbc] sm:$0x1] }
  0x4e   : > { %v413_v35 = vsel %vm3750_vm2, %v408_v9, %v412_v40  ;;  %v747_v37 = vunpack.c.l.b16 %v403_v22  ;;  %v527_v39 = vor.u32 %v526_v13, %v522_v11  ;;  %v616_v44 = vshll.u32 %v4044_v6, 16  ;;  %4866 = vst [vmem:[#allocation8_spill] sm:$0xff] %v4066_v58  ;;  %v4077_v8 = vld [vmem:[%s3735_s30 + $0x24] sm:$0xf]  ;;  %v3601_v9 = vld [vmem:[%s4820_s1 + $0x1b8] sm:$0xff] }
  0x4f   : > { %v748_v29 = vunpack.c.l.b16 %v413_v35  ;;  %v518_v45 = vrot.slane %v517_v23, 4  ;;  %v612_v48 = vrot.slane %v610_v27, 5  ;;  %v620_v50 = vshrl.u32 %v4044_v6, 16  ;;  %4867 = vst [vmem:[#allocation9_spill] sm:$0xff] %v4074_v3  ;;  %2233 = vmatpush.bf16.msra.mxu2 %v3601_v9 }
  0x50   : > { %v528_v51 = vrot.slane %v527_v39, 4  ;;  %v618_v53 = vrot.slane %v616_v44, 5  ;;  %v626_v57 = vshll.u32 %v4054_v24, 16  ;;  %v703_v56 = vshrl.u32 %v4058_v28, 16 }
  0x51   : > { %v4069_v40 = vpack.c.b16 %v748_v29, %v747_v37  ;;  %v523_v63 = vsel %vm3750_vm2, %v518_v45, %v522_v11  ;;  %v613_v0 = vor.u32 %v612_v48, %v609_v25  ;;  %v622_v2 = vrot.slane %v620_v50, 4  ;;  %v4090_v29 = vld [vmem:[%s3735_s30 + $0x28] sm:$0xf] }
  0x52   : > { %v533_v13 = vsel %vm3750_vm2, %v528_v51, %v532_v14  ;;  %v757_v20 = vunpack.c.l.b16 %v523_v63  ;;  %v628_v22 = vrot.slane %v626_v57, 5  ;;  %v705_v23 = vrot.slane %v703_v56, 4  ;;  %v3609_v57 = vld [vmem:[%s4820_s1 + $0x1f8] sm:$0xff] }
  0x53   : > { %873 = vmatmul.bf16.gmra.mxu0 %v4069_v40  ;;  %v758_v11 = vunpack.c.l.b16 %v533_v13  ;;  %v614_v25 = vrot.slane %v613_v0, 4  ;;  %v623_v27 = vor.u32 %v622_v2, %v618_v53  ;;  %v706_v35 = vshll.u32 %v4058_v28, 16  ;;  %v3593_v56 = vld [vmem:[%s4820_s1 + $0x178] sm:$0xff]  ;;  %2447 = vmatpush.bf16.msra.mxu3 %v3609_v57 }
  0x54   : > { %v712_v37 = vshll.u32 %v4066_v58, 16  ;;  %v716_v39 = vshrl.u32 %v4066_v58, 16  ;;  %v722_v44 = vshll.u32 %v4074_v3, 16  ;;  %v415_v14 = vshrl.u32 %v4077_v8, 16  ;;  %v3617_v63 = vld [vmem:[%s4820_s1 + $0x238] sm:$0xff]  ;;  %2041 = vmatpush.bf16.msra.mxu1 %v3593_v56 }
  0x55   : > { %v4093_v45 = vpack.c.b16 %v758_v11, %v757_v20  ;;  %v619_v48 = vsel %vm3750_vm2, %v614_v25, %v618_v53  ;;  %v624_v50 = vrot.slane %v623_v27, 4  ;;  %v708_v51 = vrot.slane %v706_v35, 5  ;;  %v4107_v20 = vld [vmem:[%s3735_s30 + $0x2c] sm:$0x1]  ;;  %2645 = vmatpush.bf16.msra.mxu0 %v3617_v63 }
  0x56   : > { %v765_v0 = vunpack.c.l.b16 %v619_v48  ;;  %v714_v2 = vrot.slane %v712_v37, 5  ;;  %v718_v9 = vrot.slane %v716_v39, 4  ;;  %v724_v13 = vrot.slane %v722_v44, 5 }
  0x57   : > { %4868 = vst [vmem:[#allocation10_spill] sm:$0xff] %v4093_v45  ;;  %v629_v53 = vsel %vm3750_vm2, %v624_v50, %v628_v22  ;;  %v709_v11 = vor.u32 %v708_v51, %v705_v23  ;;  %v417_v25 = vrot.slane %v415_v14, 4  ;;  %v418_v27 = vshll.u32 %v4077_v8, 16 }
  0x58   : > { %v766_v35 = vunpack.c.l.b16 %v629_v53  ;;  %v719_v3 = vor.u32 %v718_v9, %v714_v2  ;;  %v424_v28 = vshll.u32 %v4090_v29, 16  ;;  %v428_v48 = vshrl.u32 %v4090_v29, 16 }
  0x59   : > { %v710_v37 = vrot.slane %v709_v11, 4  ;;  %v420_v39 = vrot.slane %v418_v27, 5  ;;  %v434_v44 = vshll.u32 %v4107_v20, 16  ;;  %v1201_v11 = vrot.slane %v3779_v4, 5 }
  0x5a   : > { %v4115_v58 = vpack.c.b16 %v766_v35, %v765_v0  ;;  %v720_v22 = vrot.slane %v719_v3, 4  ;;  %v426_v23 = vrot.slane %v424_v28, 5  ;;  %v430_v14 = vrot.slane %v428_v48, 4 }
  0x5b   : > { %898 = vmatmul.bf16.gmra.mxu1 %v4093_v45  ;;  %v715_v50 = vsel %vm3750_vm2, %v710_v37, %v714_v2  ;;  %v421_v51 = vor.u32 %v420_v39, %v417_v25  ;;  %v436_v57 = vrot.slane %v434_v44, 5  ;;  %v4869_v0 = vmov 0 }
  0x5c   : > { %918 = vmatmul.bf16.gmra.mxu2 %v4115_v58  ;;  %v725_v56 = vsel %vm3750_vm2, %v720_v22, %v724_v13  ;;  %v773_v63 = vunpack.c.l.b16 %v715_v50  ;;  %v431_v9 = vor.u32 %v430_v14, %v426_v23  ;;  %v4870_v0 = vsel %vm4123_vm5, 4294967295, %v4869_v0 }
  0x5d   : > { %4871 = vst [vmem:[#allocation11_spill] sm:$0xff] %v4870_v0  ;;  %v3163_v28 = vrot.slane %v3763_v49, 9  ;;  %v774_v3 = vunpack.c.l.b16 %v725_v56  ;;  %v422_v53 = vrot.slane %v421_v51, 4  ;;  %v1198_v2 = vrot.slane %v3773_v62, 5 }
  0x5e   : > { %v432_v25 = vrot.slane %v431_v9, 4  ;;  %v3164_v27 = vrot.slane %v3846_v18, 9  ;;  %v1205_v35 = vrot.slane %v3858_v34, 5  ;;  %v1208_v13 = vrot.slane %v3869_v42, 5  ;;  %v3528_v9 = vld [vmem:[%s3735_s30] sm:$0xff] }
  0x5f   : > { %v4133_v48 = vpack.c.b16 %v774_v3, %v773_v63  ;;  %v427_v37 = vsel %vm3750_vm2, %v422_v53, %v426_v23  ;;  %v1199_v49 = vsel %vm4123_vm5, %v3163_v28, %v1198_v2  ;;  %v1200_v39 = vrot.slane %v1198_v2, 4  ;;  %v3529_v28 = vld [vmem:[%s3735_s30 + $0xc] sm:$0xff] }
  0x60   : > { %v437_v62 = vsel %vm3750_vm2, %v432_v25, %v436_v57  ;;  %v749_v4 = vunpack.c.l.b16 %v427_v37  ;;  %v1325_v44 = vunpack.c.l.b16 %v1199_v49  ;;  %v1206_v18 = vsel %vm4123_vm5, %v3164_v27, %v1205_v35  ;;  %v3600_v3 = vld [vmem:[%s4820_s1 + $0x1b0] sm:$0xff] }
  0x61   : > { %938 = vmatmul.bf16.gmra.mxu3 %v4133_v48  ;;  %v750_v34 = vunpack.c.l.b16 %v437_v62  ;;  %v1202_v42 = vsel %vm4123_vm5, %v1200_v39, %v1201_v11  ;;  %v1207_v22 = vrot.slane %v1205_v35, 4  ;;  %v1327_v14 = vunpack.c.l.b16 %v1206_v18  ;;  %2234 = vmatpush.bf16.msra.mxu2 %v3600_v3  ;;  %v3608_v53 = vld [vmem:[%s4820_s1 + $0x1f0] sm:$0xff] }
  0x62   : > { %v1326_v23 = vunpack.c.l.b16 %v1202_v42  ;;  %v3592_v2 = vld [vmem:[%s4820_s1 + $0x170] sm:$0xff]  ;;  %2448 = vmatpush.bf16.msra.mxu3 %v3608_v53  ;;  %v1212_v25 = vrot.slane %v3979_v52, 5  ;;  %v3165_v27 = vrot.slane %v3971_v31, 9  ;;  %v4187_v31 = vld [vmem:[%s3735_s30 + $0x24] sm:$0xff]  ;;  %v1222_v18 = vrot.slane %v4107_v20, 5 }
  0x63   : > { %v4146_v50 = vpack.c.b16 %v750_v34, %v749_v4  ;;  %v1209_v51 = vsel %vm4123_vm5, %v1207_v22, %v1208_v13  ;;  %v3616_v11 = vld [vmem:[%s4820_s1 + $0x230] sm:$0xff]  ;;  %2042 = vmatpush.bf16.msra.mxu1 %v3592_v2  ;;  %v1215_v13 = vrot.slane %v3987_v60, 5  ;;  %v1219_v4 = vrot.slane %v4090_v29, 5  ;;  %v3599_v42 = vld [vmem:[%s4820_s1 + $0x1a8] sm:$0xff]  ;;  %v3653_v2 = vld [vmem:[%s3735_s30 + $0x38] sm:$0x1] }
  0x64   : > { %v1357_v57 = vpack.c.b16 %v1326_v23, %v1325_v44  ;;  %v1328_v56 = vunpack.c.l.b16 %v1209_v51  ;;  %2646 = vmatpush.bf16.msra.mxu0 %v3616_v11  ;;  %v1214_v35 = vrot.slane %v1212_v25, 4  ;;  %v1213_v37 = vsel %vm4123_vm5, %v3165_v27, %v1212_v25  ;;  %v3607_v20 = vld [vmem:[%s4820_s1 + $0x1e8] sm:$0xff] }
  0x65   : > { %878 = vmatmul.bf16.gmra.mxu0 %v4146_v50  ;;  %v1329_v52 = vunpack.c.l.b16 %v1213_v37  ;;  %v3166_v60 = vrot.slane %v4077_v8, 9  ;;  %v1221_v44 = vrot.slane %v1219_v4, 4  ;;  %2235 = vmatpush.bf16.msra.mxu2 %v3599_v42  ;;  %v3591_v23 = vld [vmem:[%s4820_s1 + $0x168] sm:$0xff]  ;;  %v1229_v11 = vrot.slane %v3653_v2, 5 }
  0x66   : > { %v4151_v63 = vpack.c.b16 %v1328_v56, %v1327_v14  ;;  %v1216_v49 = vsel %vm4123_vm5, %v1214_v35, %v1215_v13  ;;  %v3615_v14 = vld [vmem:[%s4820_s1 + $0x228] sm:$0xff]  ;;  %2449 = vmatpush.bf16.msra.mxu3 %v3607_v20  ;;  %v1240_v2 = vrot.slane %v3899_v10, 5 }
  0x67   : > { %v1330_v39 = vunpack.c.l.b16 %v1216_v49  ;;  %v1220_v34 = vsel %vm4123_vm5, %v3166_v60, %v1219_v4  ;;  %v1223_v29 = vsel %vm4123_vm5, %v1221_v44, %v1222_v18  ;;  %2043 = vmatpush.bf16.msra.mxu1 %v3591_v23  ;;  %v4235_v4 = vld [vmem:[%s3735_s30 + $0x3c] sm:$0xff]  ;;  %v3168_v60 = vrot.slane %v3782_v5, 9 }
  0x68   : > { %v1331_v8 = vunpack.c.l.b16 %v1220_v34  ;;  %v1332_v22 = vunpack.c.l.b16 %v1223_v29  ;;  %2647 = vmatpush.bf16.msra.mxu0 %v3615_v14  ;;  %v1236_v18 = vrot.slane %v3799_v19, 5  ;;  %v3598_v5 = vld [vmem:[%s4820_s1 + $0x1a0] sm:$0xff] }
  0x69   : > { %v4181_v62 = vpack.c.b16 %v1330_v39, %v1329_v52  ;;  %v1233_v52 = vrot.slane %v3793_v15, 5  ;;  %2236 = vmatpush.bf16.msra.mxu2 %v3598_v5  ;;  %v3606_v23 = vld [vmem:[%s4820_s1 + $0x1e0] sm:$0xff] }
  0x6a   : > { %v4209_v51 = vpack.c.b16 %v1332_v22, %v1331_v8  ;;  %v3590_v14 = vld [vmem:[%s4820_s1 + $0x160] sm:$0xff]  ;;  %2450 = vmatpush.bf16.msra.mxu3 %v3606_v23  ;;  %v1247_v23 = vrot.slane %v4016_v32, 5 }
  0x6b   : > { %1096 = vmatmul.bf16.vlgmr.msrb.gmra.mxu1 %v3528_v9  ;;  %v4215_v9 = vld [vmem:[%s3735_s30 + $0x30] sm:$0xff]  ;;  %v1235_v44 = vrot.slane %v1233_v52, 4  ;;  %v1234_v15 = vsel %vm4123_vm5, %v3168_v60, %v1233_v52 }
  0x6c   : > { %1445 = vmatmul.bf16.vlgmr.msrb.gmra.mxu2 %v1357_v57  ;;  %v3651_v57 = vld [vmem:[%s3735_s30 + $0x34] sm:$0xf]  ;;  %v1335_v19 = vunpack.c.l.b16 %v1234_v15  ;;  %2044 = vmatpush.bf16.msra.mxu1 %v3590_v14 }
  0x6d   : > { %v1226_v56 = vrot.slane %v3651_v57, 5  ;;  %v1237_v8 = vsel %vm4123_vm5, %v1235_v44, %v1236_v18  ;;  %v4309_v14 = vld [vmem:[%s3735_s30 + $0x54] sm:$0xff] }
  0x6e   : > { %v1336_v20 = vunpack.c.l.b16 %v1237_v8  ;;  %4879 = vst [vmem:[#allocation19_spill] sm:$0xff] %v4309_v14 }
  0x6f   : > { %v1228_v53 = vrot.slane %v1226_v56, 4 }
  0x71   : > { %1637 = vmatmul.bf16.vlgmr.msrb.gmra.mxu3 %v3529_v28  ;;  %v1230_v27 = vsel %vm4123_vm5, %v1228_v53, %v1229_v11  ;;  %v3614_v53 = vld [vmem:[%s4820_s1 + $0x220] sm:$0xff] }
  0x72   : > { %v1334_v13 = vunpack.c.l.b16 %v1230_v27  ;;  %2648 = vmatpush.bf16.msra.mxu0 %v3614_v53  ;;  %v3169_v27 = vrot.slane %v3880_v54, 9  ;;  %v3170_v53 = vrot.slane %v3990_v61, 9 }
  0x74   : > { %v1241_v44 = vsel %vm4123_vm5, %v3169_v27, %v1240_v2  ;;  %v1250_v27 = vrot.slane %v4019_v33, 5  ;;  %v3597_v33 = vld [vmem:[%s4820_s1 + $0x198] sm:$0xff] }
  0x75   : > { %1851 = vmatmul.bf16.vlgmr.msrb.gmra.mxu0 %v3960_v7  ;;  %v4171_v7 = vld [vmem:[%s3735_s30 + $0x18] sm:$0xff]  ;;  %v1337_v15 = vunpack.c.l.b16 %v1241_v44  ;;  %2237 = vmatpush.bf16.msra.mxu2 %v3597_v33 }
  0x7b   : > { %1101 = vmatmul.bf16.gmra.mxu1 %v3529_v28  ;;  %v3652_v28 = vld [vmem:[%s3735_s30 + $0x30] sm:$0xf] }
  0x7c   : > { %1450 = vmatmul.bf16.gmra.mxu2 %v4151_v63  ;;  %v3167_v3 = vrot.slane %v3652_v28, 9 }
  0x7e   : > { %v1227_v25 = vsel %vm4123_vm5, %v3167_v3, %v1226_v56  ;;  %v4268_v3 = vpack.c.b16 %v1336_v20, %v1335_v19 }
  0x7f   : > { %v1333_v35 = vunpack.c.l.b16 %v1227_v25  ;;  %v4279_v25 = vld [vmem:[%s3735_s30 + $0x48] sm:$0xff] }
  0x80   : > { %4874 = vst [vmem:[#allocation14_spill] sm:$0xff] %v4268_v3 }
  0x81   : > { %1642 = vmatmul.bf16.gmra.mxu3 %v4171_v7  ;;  %v4227_v49 = vpack.c.b16 %v1334_v13, %v1333_v35  ;;  %4875 = vst [vmem:[#allocation15_spill] sm:$0xff] %v4279_v25  ;;  %v1242_v35 = vrot.slane %v1240_v2, 4  ;;  %v1243_v13 = vrot.slane %v3907_v17, 5  ;;  %v1249_v2 = vrot.slane %v1247_v23, 4 }
  0x83   : > { %v1244_v18 = vsel %vm4123_vm5, %v1242_v35, %v1243_v13  ;;  %v1251_v61 = vsel %vm4123_vm5, %v1249_v2, %v1250_v27 }
  0x84   : > { %v1338_v54 = vunpack.c.l.b16 %v1244_v18  ;;  %v1248_v18 = vsel %vm4123_vm5, %v3170_v53, %v1247_v23  ;;  %v3589_v23 = vld [vmem:[%s4820_s1 + $0x158] sm:$0xff] }
  0x85   : > { %1856 = vmatmul.bf16.gmra.mxu0 %v4069_v40  ;;  %2045 = vmatpush.bf16.msra.mxu1 %v3589_v23  ;;  %v3655_v23 = vld [vmem:[%s3735_s30 + $0x60] sm:$0xf] }
  0x86   : > { %v4303_v20 = vpack.c.b16 %v1338_v54, %v1337_v15  ;;  %v1339_v15 = vunpack.c.l.b16 %v1248_v18  ;;  %v1340_v54 = vunpack.c.l.b16 %v1251_v61  ;;  %v3654_v61 = vld [vmem:[%s3735_s30 + $0x64] sm:$0xf] }
  0x87   : > { %v1254_v33 = vrot.slane %v3654_v61, 5 }
  0x88   : > { %4878 = vst [vmem:[#allocation18_spill] sm:$0xff] %v4303_v20  ;;  %v4340_v27 = vpack.c.b16 %v1340_v54, %v1339_v15  ;;  %v3171_v15 = vrot.slane %v3655_v23, 9 }
  0x89   : > { %v1256_v54 = vrot.slane %v1254_v33, 4 }
  0x8a   : > { %4881 = vst [vmem:[#allocation21_spill] sm:$0xff] %v4340_v27 }
  0x8b   : > { %1106 = vmatmul.bf16.gmra.mxu1 %v4171_v7 }
  0x8c   : > { %1455 = vmatmul.bf16.gmra.mxu2 %v4181_v62 }
  0x91   : > { %1647 = vmatmul.bf16.gmra.mxu3 %v4187_v31 }
  0x95   : > { %1861 = vmatmul.bf16.gmra.mxu0 %v4146_v50 }
  0x9b   : > { %1111 = vmatmul.bf16.gmra.mxu1 %v4187_v31 }
  0x9c   : > { %1460 = vmatmul.bf16.gmra.mxu2 %v4209_v51 }
  0xa1   : > { %1652 = vmatmul.bf16.gmra.mxu3 %v4215_v9 }
  0xa5   : > { %1866 = vmatmul.bf16.gmra.mxu0 %v3768_v59 }
  0xa8   : > { %v4225_v37 = vpop.f32.mrf.mxu1 }
  0xab   : > { %v4230_v39 = vpop.f32.mrf.mxu0  ;;  %1116 = vmatmul.bf16.gmra.mxu1 %v4215_v9 }
  0xac   : > { %1465 = vmatmul.bf16.gmra.mxu2 %v4227_v49 }
  0xae   : > { %v4239_v34 = vpop.f32.mrf.mxu2 }
  0xaf   : > { %v4241_v29 = vpop.f32.mrf.mxu3 }
  0xb0   : > { %4872 = vst [vmem:[#allocation12_spill] sm:$0xff] %v4241_v29  ;;  %v4243_v42 = vpop.f32.mrf.mxu1 }
  0xb1   : > { %1657 = vmatmul.bf16.gmra.mxu3 %v4235_v4 }
  0xb3   : > { %v4253_v22 = vpop.f32.mrf.mxu0 }
  0xb5   : > { %1871 = vmatmul.bf16.gmra.mxu0 %v3864_v38 }
  0xb6   : > { %v4262_v57 = vpop.f32.mrf.mxu2 }
  0xb7   : > { %v4264_v56 = vpop.f32.mrf.mxu3 }
  0xb8   : > { %4873 = vst [vmem:[#allocation13_spill] sm:$0xff] %v4264_v56  ;;  %v4266_v28 = vpop.f32.mrf.mxu1 }
  0xbb   : > { %1121 = vmatmul.bf16.gmra.mxu1 %v4235_v4 }
  0xbc   : > { %v4275_v11 = vpop.f32.mrf.mxu0  ;;  %1470 = vmatmul.bf16.gmra.mxu2 %v4268_v3 }
  0xbe   : > { %v4283_v52 = vpop.f32.mrf.mxu2 }
  0xbf   : > { %v4285_v60 = vpop.f32.mrf.mxu3 }
  0xc0   : > { %4876 = vst [vmem:[#allocation16_spill] sm:$0xff] %v4285_v60  ;;  %v4287_v10 = vpop.f32.mrf.mxu1  ;;  %v3656_v60 = vld [vmem:[%s3735_s30 + $0x68] sm:$0x1] }
  0xc1   : > { %1662 = vmatmul.bf16.gmra.mxu3 %v4279_v25  ;;  %v1257_v56 = vrot.slane %v3656_v60, 5 }
  0xc4   : > { %v4295_v17 = vpop.f32.mrf.mxu0 }
  0xc5   : > { %1876 = vmatmul.bf16.gmra.mxu0 %v3982_v55 }
  0xc6   : > { %v4297_v8 = vpop.f32.mrf.mxu2 }
  0xc7   : > { %v4299_v5 = vpop.f32.mrf.mxu3 }
  0xc8   : > { %4877 = vst [vmem:[#allocation17_spill] sm:$0xff] %v4299_v5  ;;  %v4301_v19 = vpop.f32.mrf.mxu1 }
  0xcb   : > { %1126 = vmatmul.bf16.gmra.mxu1 %v4279_v25 }
  0xcc   : > { %1475 = vmatmul.bf16.gmra.mxu2 %v4303_v20 }
  0xce   : > { %v4313_v35 = vpop.f32.mrf.mxu2 }
  0xd0   : > { %v4315_v13 = vpop.f32.mrf.mxu0  ;;  %v4317_v44 = vpop.f32.mrf.mxu3 }
  0xd1   : > { %4880 = vst [vmem:[#allocation20_spill] sm:$0xff] %v4317_v44  ;;  %1667 = vmatmul.bf16.gmra.mxu3 %v4309_v14  ;;  %v4320_v32 = vpop.f32.mrf.mxu1  ;;  %v3605_v44 = vld [vmem:[%s4820_s1 + $0x1d8] sm:$0xff] }
  0xd2   : > { %2451 = vmatpush.bf16.msra.mxu3 %v3605_v44  ;;  %v4353_v44 = vld [vmem:[%s3735_s30 + $0x60] sm:$0xff] }
  0xd3   : > { %4883 = vst [vmem:[#allocation23_spill] sm:$0xff] %v4353_v44 }
  0xd5   : > { %1881 = vmatmul.bf16.gmra.mxu0 %v4093_v45  ;;  %v3613_v45 = vld [vmem:[%s4820_s1 + $0x218] sm:$0xff] }
  0xd6   : > { %v4336_v53 = vpop.f32.mrf.mxu2  ;;  %2649 = vmatpush.bf16.msra.mxu0 %v3613_v45  ;;  %v1258_v45 = vsel %vm4123_vm5, %v1256_v54, %v1257_v56 }
  0xd7   : > { %v1342_v60 = vunpack.c.l.b16 %v1258_v45  ;;  %v3658_v45 = vld [vmem:[%s3735_s30 + $0x6c] sm:$0xf] }
  0xd8   : > { %v4338_v2 = vpop.f32.mrf.mxu0  ;;  %v4345_v5 = vpop.f32.mrf.mxu3 }
  0xd9   : > { %v4342_v18 = vpop.f32.mrf.mxu1  ;;  %4882 = vst [vmem:[#allocation22_spill] sm:$0xff] %v4345_v5 }
  0xdb   : > { %1131 = vmatmul.bf16.gmra.mxu1 %v4309_v14  ;;  %v1255_v14 = vsel %vm4123_vm5, %v3171_v15, %v1254_v33  ;;  %v3657_v33 = vld [vmem:[%s3735_s30 + $0x70] sm:$0xf] }
  0xdc   : > { %1480 = vmatmul.bf16.gmra.mxu2 %v4340_v27  ;;  %v1341_v20 = vunpack.c.l.b16 %v1255_v14  ;;  %v1261_v15 = vrot.slane %v3657_v33, 5  ;;  %v4384_v14 = vld [vmem:[%s3735_s30 + $0x6c] sm:$0xff] }
  0xde   : > { %v4373_v29 = vpack.c.b16 %v1342_v60, %v1341_v20  ;;  %v3659_v20 = vld [vmem:[%s3735_s30 + $0x74] sm:$0x1] }
  0xdf   : > { %v4357_v61 = vpop.f32.mrf.mxu2  ;;  %v1264_v60 = vrot.slane %v3659_v20, 5 }
  0xe0   : > { %4884 = vst [vmem:[#allocation24_spill] sm:$0xff] %v4357_v61 }
  0xe1   : > { %1672 = vmatmul.bf16.gmra.mxu3 %v4353_v44  ;;  %v4360_v5 = vpop.f32.mrf.mxu1  ;;  %4887 = vst [vmem:[#allocation27_spill] sm:$0xff] %v4373_v29 }
  0xe2   : > { %v4366_v27 = vpop.f32.mrf.mxu0 }
  0xe4   : > { %v4368_v23 = vpop.f32.mrf.mxu3 }
  0xe5   : > { %4885 = vst [vmem:[#allocation25_spill] sm:$0xff] %v4368_v23  ;;  %1886 = vmatmul.bf16.gmra.mxu0 %v3795_v16  ;;  %v3172_v23 = vrot.slane %v3658_v45, 9  ;;  %v1263_v16 = vrot.slane %v1261_v15, 4  ;;  %v3596_v45 = vld [vmem:[%s4820_s1 + $0x190] sm:$0xff] }
  0xe6   : > { %2238 = vmatpush.bf16.msra.mxu2 %v3596_v45 }
  0xe7   : > { %v4371_v55 = vpop.f32.mrf.mxu2 }
  0xe8   : > { %4886 = vst [vmem:[#allocation26_spill] sm:$0xff] %v4371_v55 }
  0xe9   : > { %v1097_v25 = vpop.f32.mrf.mxu1 }
  0xea   : > { %v4376_v3 = vpop.f32.mrf.mxu0  ;;  %v1098_v56 = vadd.f32 %v1097_v25, %v4230_v39  ;;  %v1262_v39 = vsel %vm4123_vm5, %v3172_v23, %v1261_v15  ;;  %v1265_v25 = vsel %vm4123_vm5, %v1263_v16, %v1264_v60  ;;  %v3604_v23 = vld [vmem:[%s4820_s1 + $0x1d0] sm:$0xff] }
  0xeb   : > { %1136 = vmatmul.bf16.gmra.mxu1 %v4353_v44  ;;  %v1343_v20 = vunpack.c.l.b16 %v1262_v39  ;;  %v1344_v61 = vunpack.c.l.b16 %v1265_v25  ;;  %v3588_v16 = vld [vmem:[%s4820_s1 + $0x150] sm:$0xff]  ;;  %2452 = vmatpush.bf16.msra.mxu3 %v3604_v23 }
  0xec   : > { %v4380_v54 = vpop.f32.mrf.mxu3  ;;  %1485 = vmatmul.bf16.gmra.mxu2 %v4373_v29  ;;  %2046 = vmatpush.bf16.msra.mxu1 %v3588_v16  ;;  %v3612_v25 = vld [vmem:[%s4820_s1 + $0x210] sm:$0xff] }
  0xed   : > { %4888 = vst [vmem:[#allocation28_spill] sm:$0xff] %v4380_v54  ;;  %v4406_v60 = vpack.c.b16 %v1344_v61, %v1343_v20  ;;  %2650 = vmatpush.bf16.msra.mxu0 %v3612_v25  ;;  %v3173_v61 = vrot.slane %v3911_v21, 9 }
  0xef   : > { %v1446_v55 = vpop.f32.mrf.mxu2 }
  0xf0   : > { %v1526_v38 = vadd.f32 %v1446_v55, %v1098_v56 }
  0xf1   : > { %1677 = vmatmul.bf16.gmra.mxu3 %v4384_v14  ;;  %v1099_v33 = vpop.f32.mrf.mxu1 }
  0xf2   : > { %v1852_v54 = vpop.f32.mrf.mxu0  ;;  %v1100_v29 = vadd.f32 %v1099_v33, %v4253_v22 }
  0xf4   : > { %v1638_v44 = vpop.f32.mrf.mxu3 }
  0xf5   : > { %1891 = vmatmul.bf16.gmra.mxu0 %v3902_v12  ;;  %v1718_v55 = vadd.f32 %v1638_v44, %v1526_v38  ;;  %v1268_v38 = vrot.slane %v3933_v46, 5  ;;  %v1271_v46 = vrot.slane %v3936_v47, 5 }
  0xf7   : > { %v1448_v22 = vpop.f32.mrf.mxu2  ;;  %v4404_v15 = vadd.f32 %v1852_v54, %v1718_v55  ;;  %v1270_v20 = vrot.slane %v1268_v38, 4 }
  0xf8   : > { %v1527_v56 = vadd.f32 %v1448_v22, %v1100_v29  ;;  %v4416_v29 = vld [vmem:[%s3735_s30 + $0x78] sm:$0xff]  ;;  %v1269_v22 = vsel %vm4123_vm5, %v3173_v61, %v1268_v38  ;;  %v1275_v61 = vrot.slane %v4044_v6, 5 }
  0xf9   : > { %v1102_v33 = vpop.f32.mrf.mxu1 }
  0xfa   : > { %v1854_v44 = vpop.f32.mrf.mxu0  ;;  %v1103_v39 = vadd.f32 %v1102_v33, %v4275_v11 }
  0xfb   : > { %1141 = vmatmul.bf16.gmra.mxu1 %v4384_v14 }
  0xfc   : > { %v1640_v45 = vpop.f32.mrf.mxu3  ;;  %1490 = vmatmul.bf16.gmra.mxu2 %v4406_v60 }
  0xfd   : > { %v1719_v54 = vadd.f32 %v1640_v45, %v1527_v56  ;;  %v1272_v56 = vsel %vm4123_vm5, %v1270_v20, %v1271_v46  ;;  %v1345_v45 = vunpack.c.l.b16 %v1269_v22  ;;  %v4438_v22 = vld [vmem:[%s3735_s30 + $0x84] sm:$0xff] }
  0xfe   : > { %v1346_v47 = vunpack.c.l.b16 %v1272_v56  ;;  %v1277_v56 = vrot.slane %v1275_v61, 4 }
  0xff   : > { %v1451_v55 = vpop.f32.mrf.mxu2  ;;  %v4420_v11 = vadd.f32 %v1854_v44, %v1719_v54 }
 0x100   : > { %v1528_v23 = vadd.f32 %v1451_v55, %v1103_v39 }
 0x101   : > { %4889 = vst [vmem:[#allocation29_spill] sm:$0xff] %v4420_v11  ;;  %1682 = vmatmul.bf16.gmra.mxu3 %v4416_v29  ;;  %v1104_v16 = vpop.f32.mrf.mxu1  ;;  %v4431_v11 = vpack.c.b16 %v1346_v47, %v1345_v45 }
 0x102   : > { %v1857_v33 = vpop.f32.mrf.mxu0  ;;  %v1105_v25 = vadd.f32 %v1104_v16, %v4295_v17 }
 0x104   : > { %v1643_v21 = vpop.f32.mrf.mxu3 }
 0x105   : > { %1896 = vmatmul.bf16.gmra.mxu0 %v4011_v26  ;;  %v1720_v44 = vadd.f32 %v1643_v21, %v1528_v23  ;;  %v3174_v23 = vrot.slane %v4024_v43, 9  ;;  %v3595_v43 = vld [vmem:[%s4820_s1 + $0x188] sm:$0xff] }
 0x106   : > { %2239 = vmatpush.bf16.msra.mxu2 %v3595_v43  ;;  %v3661_v43 = vld [vmem:[%s3735_s30 + $0x90] sm:$0xf] }
 0x107   : > { %v1453_v39 = vpop.f32.mrf.mxu2  ;;  %v4429_v54 = vadd.f32 %v1857_v33, %v1720_v44  ;;  %v1278_v33 = vrot.slane %v4054_v24, 5  ;;  %v1276_v45 = vsel %vm4123_vm5, %v3174_v23, %v1275_v61  ;;  %v3603_v61 = vld [vmem:[%s4820_s1 + $0x1c8] sm:$0xff] }
 0x108   : > { %v1529_v55 = vadd.f32 %v1453_v39, %v1105_v25  ;;  %2453 = vmatpush.bf16.msra.mxu3 %v3603_v61 }
 0x109   : > { %v1107_v38 = vpop.f32.mrf.mxu1  ;;  %v1279_v47 = vsel %vm4123_vm5, %v1277_v56, %v1278_v33  ;;  %v3660_v33 = vld [vmem:[%s3735_s30 + $0x94] sm:$0xf] }
 0x10a   : > { %v1859_v20 = vpop.f32.mrf.mxu0  ;;  %v1108_v46 = vadd.f32 %v1107_v38, %v4315_v13  ;;  %v1348_v38 = vunpack.c.l.b16 %v1279_v47 }
 0x10b   : > { %1146 = vmatmul.bf16.gmra.mxu1 %v4416_v29 }
 0x10c   : > { %v1645_v17 = vpop.f32.mrf.mxu3  ;;  %1495 = vmatmul.bf16.gmra.mxu2 %v4431_v11 }
 0x10d   : > { %v1721_v16 = vadd.f32 %v1645_v17, %v1529_v55  ;;  %v1347_v55 = vunpack.c.l.b16 %v1276_v45  ;;  %v3611_v45 = vld [vmem:[%s4820_s1 + $0x208] sm:$0xff] }
 0x10e   : > { %2651 = vmatpush.bf16.msra.mxu0 %v3611_v45 }
 0x10f   : > { %v1456_v25 = vpop.f32.mrf.mxu2  ;;  %v4442_v21 = vadd.f32 %v1859_v20, %v1721_v16  ;;  %v4462_v23 = vpack.c.b16 %v1348_v38, %v1347_v55  ;;  %v3662_v38 = vld [vmem:[%s3735_s30 + $0x98] sm:$0x1] }
 0x110   : > { %v1530_v6 = vadd.f32 %v1456_v25, %v1108_v46  ;;  %v1282_v25 = vrot.slane %v3660_v33, 5 }
 0x111   : > { %1687 = vmatmul.bf16.gmra.mxu3 %v4438_v22  ;;  %v1109_v13 = vpop.f32.mrf.mxu1 }
 0x112   : > { %v1862_v44 = vpop.f32.mrf.mxu0  ;;  %v1110_v39 = vadd.f32 %v1109_v13, %v4338_v2  ;;  %v3587_v2 = vld [vmem:[%s4820_s1 + $0x148] sm:$0xff]  ;;  %v1284_v55 = vrot.slane %v1282_v25, 4 }
 0x113   : > { %2047 = vmatpush.bf16.msra.mxu1 %v3587_v2 }
 0x114   : > { %v1648_v24 = vpop.f32.mrf.mxu3 }
 0x115   : > { %1901 = vmatmul.bf16.gmra.mxu0 %v4115_v58  ;;  %v1722_v20 = vadd.f32 %v1648_v24, %v1530_v6  ;;  %v3175_v24 = vrot.slane %v3661_v43, 9 }
 0x117   : > { %v1458_v46 = vpop.f32.mrf.mxu2  ;;  %v4460_v17 = vadd.f32 %v1862_v44, %v1722_v20  ;;  %v1285_v20 = vrot.slane %v3662_v38, 5 }
 0x118   : > { %v1531_v16 = vadd.f32 %v1458_v46, %v1110_v39  ;;  %v4472_v39 = vld [vmem:[%s3735_s30 + $0x90] sm:$0xff] }
 0x119   : > { %v1112_v56 = vpop.f32.mrf.mxu1 }
 0x11a   : > { %v1864_v6 = vpop.f32.mrf.mxu0  ;;  %v1113_v13 = vadd.f32 %v1112_v56, %v4366_v27  ;;  %v1283_v56 = vsel %vm4123_vm5, %v3175_v24, %v1282_v25 }
 0x11b   : > { %1151 = vmatmul.bf16.gmra.mxu1 %v4438_v22  ;;  %v1349_v43 = vunpack.c.l.b16 %v1283_v56  ;;  %v4493_v56 = vld [vmem:[%s3735_s30 + $0x9c] sm:$0xff] }
 0x11c   : > { %v1650_v47 = vpop.f32.mrf.mxu3  ;;  %1500 = vmatmul.bf16.gmra.mxu2 %v4462_v23  ;;  %4893 = vst [vmem:[#allocation33_spill] sm:$0xff] %v4493_v56 }
 0x11d   : > { %v1723_v44 = vadd.f32 %v1650_v47, %v1531_v16  ;;  %v1286_v16 = vsel %vm4123_vm5, %v1284_v55, %v1285_v20  ;;  %v3663_v55 = vld [vmem:[%s3735_s30 + $0xa0] sm:$0xf] }
 0x11e   : > { %v1350_v38 = vunpack.c.l.b16 %v1286_v16  ;;  %v1289_v20 = vrot.slane %v3663_v55, 5 }
 0x11f   : > { %v1461_v61 = vpop.f32.mrf.mxu2  ;;  %v4476_v27 = vadd.f32 %v1864_v6, %v1723_v44 }
 0x120   : > { %v1532_v2 = vadd.f32 %v1461_v61, %v1113_v13  ;;  %v4487_v25 = vpack.c.b16 %v1350_v38, %v1349_v43 }
 0x121   : > { %4890 = vst [vmem:[#allocation30_spill] sm:$0xff] %v4476_v27  ;;  %1692 = vmatmul.bf16.gmra.mxu3 %v4472_v39  ;;  %v1114_v46 = vpop.f32.mrf.mxu1 }
 0x122   : > { %v1867_v33 = vpop.f32.mrf.mxu0  ;;  %v1115_v45 = vadd.f32 %v1114_v46, %v4376_v3  ;;  %4892 = vst [vmem:[#allocation32_spill] sm:$0xff] %v4487_v25 }
 0x124   : > { %v1653_v47 = vpop.f32.mrf.mxu3 }
 0x125   : > { %1906 = vmatmul.bf16.gmra.mxu0 %v3811_v36  ;;  %v1724_v6 = vadd.f32 %v1653_v47, %v1532_v2  ;;  %v3664_v2 = vld [vmem:[%s3735_s30 + $0x9c] sm:$0xf]  ;;  %v1291_v47 = vrot.slane %v1289_v20, 4 }
 0x126   : > { %v3176_v16 = vrot.slane %v3664_v2, 9  ;;  %v3594_v2 = vld [vmem:[%s4820_s1 + $0x180] sm:$0xff] }
 0x127   : > { %v1463_v13 = vpop.f32.mrf.mxu2  ;;  %v4485_v44 = vadd.f32 %v1867_v33, %v1724_v6  ;;  %v3665_v33 = vld [vmem:[%s3735_s30 + $0xa4] sm:$0x1]  ;;  %2240 = vmatpush.bf16.msra.mxu2 %v3594_v2 }
 0x128   : > { %v1533_v61 = vadd.f32 %v1463_v13, %v1115_v45  ;;  %v1292_v6 = vrot.slane %v3665_v33, 5 }
 0x129   : > { %4891 = vst [vmem:[#allocation31_spill] sm:$0xff] %v4485_v44  ;;  %v1117_v24 = vpop.f32.mrf.mxu1  ;;  %v1290_v44 = vsel %vm4123_vm5, %v3176_v16, %v1289_v20  ;;  %v3602_v20 = vld [vmem:[%s4820_s1 + $0x1c0] sm:$0xff] }
 0x12a   : > { %v1869_v27 = vpop.f32.mrf.mxu0  ;;  %v1118_v45 = vadd.f32 %v1117_v24, %v4225_v37  ;;  %v1351_v37 = vunpack.c.l.b16 %v1290_v44  ;;  %2454 = vmatpush.bf16.msra.mxu3 %v3602_v20  ;;  %v3668_v20 = vld [vmem:[%s3735_s30 + $0xb0] sm:$0x1] }
 0x12b   : > { %1156 = vmatmul.bf16.gmra.mxu1 %v4472_v39 }
 0x12c   : > { %v1655_v3 = vpop.f32.mrf.mxu3  ;;  %1505 = vmatmul.bf16.gmra.mxu2 %v4487_v25  ;;  %v4565_v25 = vld [vmem:[%s3735_s30 + $0xc8] sm:$0x1] }
 0x12d   : > { %v1725_v46 = vadd.f32 %v1655_v3, %v1533_v61  ;;  %v1293_v61 = vsel %vm4123_vm5, %v1291_v47, %v1292_v6 }
 0x12f   : > { %v1466_v43 = vpop.f32.mrf.mxu2  ;;  %v4498_v38 = vadd.f32 %v1869_v27, %v1725_v46  ;;  %v1352_v27 = vunpack.c.l.b16 %v1293_v61  ;;  %v3586_v46 = vld [vmem:[%s4820_s1 + $0x140] sm:$0xff] }
 0x130   : > { %v1534_v13 = vadd.f32 %v1466_v43, %v1118_v45  ;;  %2048 = vmatpush.bf16.msra.mxu1 %v3586_v46  ;;  %v1299_v46 = vrot.slane %v3668_v20, 5 }
 0x131   : > { %4894 = vst [vmem:[#allocation34_spill] sm:$0xff] %v4498_v38  ;;  %1697 = vmatmul.bf16.gmra.mxu3 %v4493_v56  ;;  %v1119_v55 = vpop.f32.mrf.mxu1  ;;  %v4518_v45 = vpack.c.b16 %v1352_v27, %v1351_v37 }
 0x132   : > { %v1872_v3 = vpop.f32.mrf.mxu0  ;;  %v1120_v16 = vadd.f32 %v1119_v55, %v4243_v42 }
 0x133   : > { %4896 = vst [vmem:[#allocation36_spill] sm:$0xff] %v4518_v45 }
 0x134   : > { %v1658_v33 = vpop.f32.mrf.mxu3 }
 0x135   : > { %1911 = vmatmul.bf16.gmra.mxu0 %v3928_v41  ;;  %v1726_v24 = vadd.f32 %v1658_v33, %v1534_v13  ;;  %v3666_v13 = vld [vmem:[%s3735_s30 + $0xac] sm:$0xf]  ;;  %v3610_v33 = vld [vmem:[%s4820_s1 + $0x200] sm:$0xff] }
 0x136   : > { %v1296_v61 = vrot.slane %v3666_v13, 5  ;;  %2652 = vmatpush.bf16.msra.mxu0 %v3610_v33 }
 0x137   : > { %v1468_v47 = vpop.f32.mrf.mxu2  ;;  %v4516_v44 = vadd.f32 %v1872_v3, %v1726_v24  ;;  %v4527_v3 = vld [vmem:[%s3735_s30 + $0xa8] sm:$0xff] }
 0x138   : > { %v1535_v6 = vadd.f32 %v1468_v47, %v1120_v16  ;;  %4897 = vst [vmem:[#allocation37_spill] sm:$0xff] %v4527_v3  ;;  %v3667_v24 = vld [vmem:[%s3735_s30 + $0xa8] sm:$0xf]  ;;  %v1298_v27 = vrot.slane %v1296_v61, 4 }
 0x139   : > { %4895 = vst [vmem:[#allocation35_spill] sm:$0xff] %v4516_v44  ;;  %v1122_v43 = vpop.f32.mrf.mxu1  ;;  %v3177_v37 = vrot.slane %v3667_v24, 9 }
 0x13a   : > { %v1874_v2 = vpop.f32.mrf.mxu0  ;;  %v1123_v16 = vadd.f32 %v1122_v43, %v4266_v28  ;;  %v1300_v33 = vsel %vm4123_vm5, %v1298_v27, %v1299_v46  ;;  %v4541_v43 = vld [vmem:[%s3735_s30 + $0xc0] sm:$0xf] }
 0x13b   : > { %1161 = vmatmul.bf16.gmra.mxu1 %v4493_v56  ;;  %v1354_v20 = vunpack.c.l.b16 %v1300_v33  ;;  %4899 = vst [vmem:[#allocation39_spill] sm:$0xff] %v4541_v43  ;;  %v1751_v27 = vshrl.u32 %v4541_v43, 16 }
 0x13c   : > { %v1660_v42 = vpop.f32.mrf.mxu3  ;;  %1510 = vmatmul.bf16.gmra.mxu2 %v4518_v45 }
 0x13d   : > { %v1727_v55 = vadd.f32 %v1660_v42, %v1535_v6  ;;  %v1297_v6 = vsel %vm4123_vm5, %v3177_v37, %v1296_v61 }
 0x13e   : > { %v1353_v45 = vunpack.c.l.b16 %v1297_v6  ;;  %v4903_v6 = vld [vmem:[#allocation8_spill] sm:$0xff] }
 0x13f   : > { %v1471_v47 = vpop.f32.mrf.mxu2  ;;  %v4532_v44 = vadd.f32 %v1874_v2, %v1727_v55  ;;  %v1303_v33 = vrot.slane %v4903_v6, 5  ;;  %v4905_v6 = vld [vmem:[#allocation9_spill] sm:$0xff] }
 0x140   : > { %v1536_v13 = vadd.f32 %v1471_v47, %v1123_v16  ;;  %v4545_v16 = vld [vmem:[%s3735_s30 + $0xc4] sm:$0xf]  ;;  %v4549_v37 = vpack.c.b16 %v1354_v20, %v1353_v45  ;;  %v1753_v45 = vrot.slane %v1751_v27, 4  ;;  %v4559_v20 = vld [vmem:[%s3735_s30 + $0xb4] sm:$0xff] }
 0x141   : > { %4898 = vst [vmem:[#allocation38_spill] sm:$0xff] %v4532_v44  ;;  %1702 = vmatmul.bf16.gmra.mxu3 %v4527_v3  ;;  %v1124_v38 = vpop.f32.mrf.mxu1 }
 0x142   : > { %v1877_v42 = vpop.f32.mrf.mxu0  ;;  %v1125_v2 = vadd.f32 %v1124_v38, %v4287_v10  ;;  %4900 = vst [vmem:[#allocation40_spill] sm:$0xff] %v4545_v16  ;;  %v1764_v10 = vshrl.u32 %v4545_v16, 16 }
 0x143   : > { %4902 = vst [vmem:[#allocation42_spill] sm:$0xff] %v4549_v37 }
 0x144   : > { %v1663_v24 = vpop.f32.mrf.mxu3  ;;  %v1766_v56 = vrot.slane %v1764_v10, 4 }
 0x145   : > { %1916 = vmatmul.bf16.gmra.mxu0 %v4041_v1  ;;  %v1728_v28 = vadd.f32 %v1663_v24, %v1536_v13  ;;  %v1754_v13 = vshll.u32 %v4541_v43, 16  ;;  %v1760_v24 = vshll.u32 %v4545_v16, 16 }
 0x147   : > { %v1473_v55 = vpop.f32.mrf.mxu2  ;;  %v4547_v47 = vadd.f32 %v1877_v42, %v1728_v28  ;;  %v4904_v28 = vld [vmem:[#allocation7_spill] sm:$0xff]  ;;  %v1756_v1 = vrot.slane %v1754_v13, 5  ;;  %v1762_v41 = vrot.slane %v1760_v24, 5  ;;  %v1770_v13 = vshll.u32 %v4565_v25, 16 }
 0x148   : > { %v1537_v61 = vadd.f32 %v1473_v55, %v1125_v2  ;;  %v3178_v2 = vrot.slane %v4904_v28, 9  ;;  %v1305_v55 = vrot.slane %v1303_v33, 4 }
 0x149   : > { %4901 = vst [vmem:[#allocation41_spill] sm:$0xff] %v4547_v47  ;;  %v1127_v46 = vpop.f32.mrf.mxu1  ;;  %v1306_v47 = vrot.slane %v4905_v6, 5 }
 0x14a   : > { %v1879_v44 = vpop.f32.mrf.mxu0  ;;  %v1128_v43 = vadd.f32 %v1127_v46, %v4301_v19  ;;  %v1304_v27 = vsel %vm4123_vm5, %v3178_v2, %v1303_v33  ;;  %v1757_v19 = vor.u32 %v1756_v1, %v1753_v45  ;;  %v1767_v46 = vor.u32 %v1766_v56, %v1762_v41 }
 0x14b   : > { %1166 = vmatmul.bf16.gmra.mxu1 %v4527_v3  ;;  %v1355_v10 = vunpack.c.l.b16 %v1304_v27  ;;  %v1772_v33 = vrot.slane %v1770_v13, 5  ;;  %v4588_v27 = vld [vmem:[%s3735_s30 + $0xc0] sm:$0xff] }
 0x14c   : > { %v1665_v38 = vpop.f32.mrf.mxu3  ;;  %1515 = vmatmul.bf16.gmra.mxu2 %v4549_v37 }
 0x14d   : > { %v1729_v42 = vadd.f32 %v1665_v38, %v1537_v61  ;;  %v1307_v38 = vsel %vm4123_vm5, %v1305_v55, %v1306_v47 }
 0x14e   : > { %v1356_v6 = vunpack.c.l.b16 %v1307_v38 }
 0x14f   : > { %v1476_v16 = vpop.f32.mrf.mxu2  ;;  %v4567_v3 = vadd.f32 %v1879_v44, %v1729_v42  ;;  %v1768_v42 = vrot.slane %v1767_v46, 4 }
 0x150   : > { %v1538_v37 = vadd.f32 %v1476_v16, %v1128_v43  ;;  %v1758_v16 = vrot.slane %v1757_v19, 4  ;;  %v4579_v1 = vpack.c.b16 %v1356_v6, %v1355_v10 }
 0x151   : > { %1707 = vmatmul.bf16.gmra.mxu3 %v4559_v20  ;;  %v1129_v61 = vpop.f32.mrf.mxu1 }
 0x152   : > { %v1882_v28 = vpop.f32.mrf.mxu0  ;;  %v1130_v43 = vadd.f32 %v1129_v61, %v4320_v32  ;;  %v1763_v55 = vsel %vm3750_vm2, %v1758_v16, %v1762_v41 }
 0x153   : > { %v1791_v38 = vunpack.c.l.b16 %v1763_v55 }
 0x154   : > { %v1668_v24 = vpop.f32.mrf.mxu3 }
 0x155   : > { %1921 = vmatmul.bf16.gmra.mxu0 %v4133_v48  ;;  %v1730_v44 = vadd.f32 %v1668_v24, %v1538_v37  ;;  %v1773_v37 = vsel %vm3750_vm2, %v1768_v42, %v1772_v33 }
 0x157   : > { %v1478_v2 = vpop.f32.mrf.mxu2  ;;  %v4577_v0 = vadd.f32 %v1882_v28, %v1730_v44  ;;  %v1792_v28 = vunpack.c.l.b16 %v1773_v37 }
 0x158   : > { %v1539_v47 = vadd.f32 %v1478_v2, %v1130_v43 }
 0x159   : > { %v1132_v56 = vpop.f32.mrf.mxu1  ;;  %v4594_v41 = vpack.c.b16 %v1792_v28, %v1791_v38 }
 0x15a   : > { %v1884_v45 = vpop.f32.mrf.mxu0  ;;  %v1133_v19 = vadd.f32 %v1132_v56, %v4342_v18 }
 0x15b   : > { %1171 = vmatmul.bf16.gmra.mxu1 %v4559_v20 }
 0x15c   : > { %v1670_v32 = vpop.f32.mrf.mxu3  ;;  %1520 = vmatmul.bf16.gmra.mxu2 %v4579_v1 }
 0x15d   : > { %v1731_v61 = vadd.f32 %v1670_v32, %v1539_v47 }
 0x15f   : > { %v1481_v46 = vpop.f32.mrf.mxu2  ;;  %v4591_v13 = vadd.f32 %v1884_v45, %v1731_v61 }
 0x160   : > { %v1540_v24 = vadd.f32 %v1481_v46, %v1133_v19 }
 0x161   : > { %1712 = vmatmul.bf16.gmra.mxu3 %v4588_v27  ;;  %v1134_v10 = vpop.f32.mrf.mxu1 }
 0x162   : > { %v1887_v6 = vpop.f32.mrf.mxu0  ;;  %v1135_v16 = vadd.f32 %v1134_v10, %v4360_v5 }
 0x164   : > { %v1673_v44 = vpop.f32.mrf.mxu3 }
 0x165   : > { %1926 = vmatmul.bf16.gmra.mxu0 %v4594_v41  ;;  %v1732_v43 = vadd.f32 %v1673_v44, %v1540_v24 }
 0x167   : > { %v1483_v42 = vpop.f32.mrf.mxu2  ;;  %v4598_v33 = vadd.f32 %v1887_v6, %v1732_v43 }
 0x168   : > { %v1541_v18 = vadd.f32 %v1483_v42, %v1135_v16 }
 0x169   : > { %v1137_v2 = vpop.f32.mrf.mxu1 }
 0x16a   : > { %v1889_v47 = vpop.f32.mrf.mxu0  ;;  %v1138_v55 = vadd.f32 %v1137_v2, %v4239_v34 }
 0x16b   : > { %2049 = vmatmul.bf16.vlgmr.msra.gmra.mxu1 %v4151_v63 }
 0x16c   : > { %v1675_v56 = vpop.f32.mrf.mxu3  ;;  %2241 = vmatmul.bf16.vlgmr.msra.gmra.mxu2 %v4171_v7 }
 0x16d   : > { %v1733_v45 = vadd.f32 %v1675_v56, %v1541_v18 }
 0x16f   : > { %v1486_v37 = vpop.f32.mrf.mxu2  ;;  %v4603_v32 = vadd.f32 %v1889_v47, %v1733_v45 }
 0x170   : > { %v1542_v61 = vadd.f32 %v1486_v37, %v1138_v55 }
 0x171   : > { %2455 = vmatmul.bf16.vlgmr.msra.gmra.mxu3 %v4069_v40  ;;  %v1139_v5 = vpop.f32.mrf.mxu1 }
 0x172   : > { %v1892_v38 = vpop.f32.mrf.mxu0  ;;  %v1140_v63 = vadd.f32 %v1139_v5, %v4262_v57 }
 0x174   : > { %v1678_v28 = vpop.f32.mrf.mxu3 }
 0x175   : > { %2653 = vmatmul.bf16.vlgmr.msra.gmra.mxu0 %v4181_v62  ;;  %v1734_v19 = vadd.f32 %v1678_v28, %v1542_v61 }
 0x177   : > { %v1488_v46 = vpop.f32.mrf.mxu2  ;;  %v4608_v24 = vadd.f32 %v1892_v38, %v1734_v19 }
 0x178   : > { %v1543_v7 = vadd.f32 %v1488_v46, %v1140_v63 }
 0x179   : > { %v1142_v10 = vpop.f32.mrf.mxu1 }
 0x17a   : > { %v1894_v34 = vpop.f32.mrf.mxu0  ;;  %v1143_v44 = vadd.f32 %v1142_v10, %v4283_v52 }
 0x17b   : > { %2054 = vmatmul.bf16.gmra.mxu1 %v4181_v62 }
 0x17c   : > { %v1680_v6 = vpop.f32.mrf.mxu3  ;;  %2246 = vmatmul.bf16.gmra.mxu2 %v4187_v31 }
 0x17d   : > { %v1735_v40 = vadd.f32 %v1680_v6, %v1543_v7 }
 0x17f   : > { %v1491_v43 = vpop.f32.mrf.mxu2  ;;  %v4613_v16 = vadd.f32 %v1894_v34, %v1735_v40  ;;  %v4906_v40 = vld [vmem:[#allocation24_spill] sm:$0xff] }
 0x180   : > { %v1544_v42 = vadd.f32 %v1491_v43, %v1143_v44 }
 0x181   : > { %2460 = vmatmul.bf16.gmra.mxu3 %v4146_v50  ;;  %v1144_v57 = vpop.f32.mrf.mxu1 }
 0x182   : > { %v1897_v18 = vpop.f32.mrf.mxu0  ;;  %v1145_v62 = vadd.f32 %v1144_v57, %v4297_v8 }
 0x184   : > { %v1683_v2 = vpop.f32.mrf.mxu3 }
 0x185   : > { %2658 = vmatmul.bf16.gmra.mxu0 %v4209_v51  ;;  %v1736_v47 = vadd.f32 %v1683_v2, %v1544_v42 }
 0x187   : > { %v1493_v56 = vpop.f32.mrf.mxu2  ;;  %v4618_v45 = vadd.f32 %v1897_v18, %v1736_v47  ;;  %v4907_v18 = vld [vmem:[#allocation3_spill] sm:$0xff] }
 0x188   : > { %v1545_v31 = vadd.f32 %v1493_v56, %v1145_v62  ;;  %v4908_v62 = vld [vmem:[#allocation14_spill] sm:$0xff] }
 0x189   : > { %v1147_v55 = vpop.f32.mrf.mxu1 }
 0x18a   : > { %v1899_v52 = vpop.f32.mrf.mxu0  ;;  %v1148_v61 = vadd.f32 %v1147_v55, %v4313_v35 }
 0x18b   : > { %2059 = vmatmul.bf16.gmra.mxu1 %v4209_v51 }
 0x18c   : > { %v1685_v37 = vpop.f32.mrf.mxu3  ;;  %2251 = vmatmul.bf16.gmra.mxu2 %v4215_v9 }
 0x18d   : > { %v1737_v50 = vadd.f32 %v1685_v37, %v1545_v31  ;;  %v4909_v31 = vld [vmem:[#allocation26_spill] sm:$0xff] }
 0x18f   : > { %v1496_v5 = vpop.f32.mrf.mxu2  ;;  %v4623_v38 = vadd.f32 %v1899_v52, %v1737_v50 }
 0x190   : > { %v1546_v28 = vadd.f32 %v1496_v5, %v1148_v61  ;;  %v4910_v5 = vld [vmem:[#allocation15_spill] sm:$0xff] }
 0x191   : > { %2465 = vmatmul.bf16.gmra.mxu3 %v3768_v59  ;;  %v1149_v8 = vpop.f32.mrf.mxu1 }
 0x192   : > { %v1902_v19 = vpop.f32.mrf.mxu0  ;;  %v1150_v51 = vadd.f32 %v1149_v8, %v4336_v53  ;;  %v4911_v8 = vld [vmem:[#allocation12_spill] sm:$0xff] }
 0x194   : > { %v1688_v63 = vpop.f32.mrf.mxu3 }
 0x195   : > { %2663 = vmatmul.bf16.gmra.mxu0 %v4227_v49  ;;  %v1738_v46 = vadd.f32 %v1688_v63, %v1546_v28 }
 0x197   : > { %v1498_v7 = vpop.f32.mrf.mxu2  ;;  %v4628_v10 = vadd.f32 %v1902_v19, %v1738_v46 }
 0x198   : > { %v1547_v9 = vadd.f32 %v1498_v7, %v1150_v51  ;;  %v4912_v7 = vld [vmem:[#allocation5_spill] sm:$0xff] }
 0x199   : > { %v1152_v34 = vpop.f32.mrf.mxu1 }
 0x19a   : > { %v1904_v35 = vpop.f32.mrf.mxu0  ;;  %v1153_v44 = vadd.f32 %v1152_v34, %v4906_v40  ;;  %v4914_v40 = vld [vmem:[#allocation13_spill] sm:$0xff] }
 0x19b   : > { %2064 = vmatmul.bf16.gmra.mxu1 %v4227_v49 }
 0x19c   : > { %v1690_v6 = vpop.f32.mrf.mxu3  ;;  %2256 = vmatmul.bf16.gmra.mxu2 %v4235_v4 }
 0x19d   : > { %v1739_v59 = vadd.f32 %v1690_v6, %v1547_v9  ;;  %v4913_v6 = vld [vmem:[#allocation18_spill] sm:$0xff] }
 0x19f   : > { %v1501_v43 = vpop.f32.mrf.mxu2  ;;  %v4633_v42 = vadd.f32 %v1904_v35, %v1739_v59 }
 0x1a0   : > { %v1548_v57 = vadd.f32 %v1501_v43, %v1153_v44 }
 0x1a1   : > { %2470 = vmatmul.bf16.gmra.mxu3 %v4907_v18  ;;  %v1154_v53 = vpop.f32.mrf.mxu1 }
 0x1a2   : > { %v1907_v2 = vpop.f32.mrf.mxu0  ;;  %v1155_v49 = vadd.f32 %v1154_v53, %v4909_v31  ;;  %v4916_v31 = vld [vmem:[#allocation16_spill] sm:$0xff] }
 0x1a4   : > { %v1693_v47 = vpop.f32.mrf.mxu3 }
 0x1a5   : > { %2668 = vmatmul.bf16.gmra.mxu0 %v4908_v62  ;;  %v1740_v56 = vadd.f32 %v1693_v47, %v1548_v57 }
 0x1a7   : > { %v1503_v55 = vpop.f32.mrf.mxu2  ;;  %v4638_v52 = vadd.f32 %v1907_v2, %v1740_v56 }
 0x1a8   : > { %v1549_v4 = vadd.f32 %v1503_v55, %v1155_v49 }
 0x1a9   : > { %v1157_v37 = vpop.f32.mrf.mxu1 }
 0x1aa   : > { %v1909_v50 = vpop.f32.mrf.mxu0  ;;  %v1158_v19 = vadd.f32 %v1157_v37, %v4911_v8  ;;  %v4918_v8 = vld [vmem:[#allocation21_spill] sm:$0xff] }
 0x1ab   : > { %2069 = vmatmul.bf16.gmra.mxu1 %v4908_v62  ;;  %v4915_v62 = vld [vmem:[#allocation19_spill] sm:$0xff] }
 0x1ac   : > { %v1695_v61 = vpop.f32.mrf.mxu3  ;;  %2261 = vmatmul.bf16.gmra.mxu2 %v4910_v5 }
 0x1ad   : > { %v1741_v28 = vadd.f32 %v1695_v61, %v1549_v4 }
 0x1af   : > { %v1506_v63 = vpop.f32.mrf.mxu2  ;;  %v4643_v46 = vadd.f32 %v1909_v50, %v1741_v28  ;;  %v4917_v50 = vld [vmem:[#allocation10_spill] sm:$0xff] }
 0x1b0   : > { %v1550_v51 = vadd.f32 %v1506_v63, %v1158_v19  ;;  %v4919_v63 = vld [vmem:[#allocation17_spill] sm:$0xff] }
 0x1b1   : > { %2475 = vmatmul.bf16.gmra.mxu3 %v4912_v7  ;;  %v1159_v9 = vpop.f32.mrf.mxu1 }
 0x1b2   : > { %v1912_v34 = vpop.f32.mrf.mxu0  ;;  %v1160_v44 = vadd.f32 %v1159_v9, %v4914_v40  ;;  %v4920_v40 = vld [vmem:[#allocation23_spill] sm:$0xff] }
 0x1b4   : > { %v1698_v35 = vpop.f32.mrf.mxu3 }
 0x1b5   : > { %2673 = vmatmul.bf16.gmra.mxu0 %v4913_v6  ;;  %v1742_v59 = vadd.f32 %v1698_v35, %v1550_v51 }
 0x1b7   : > { %v1508_v43 = vpop.f32.mrf.mxu2  ;;  %v4648_v57 = vadd.f32 %v1912_v34, %v1742_v59 }
 0x1b8   : > { %v1551_v18 = vadd.f32 %v1508_v43, %v1160_v44  ;;  %v4921_v43 = vld [vmem:[#allocation20_spill] sm:$0xff] }
 0x1b9   : > { %v1162_v53 = vpop.f32.mrf.mxu1 }
 0x1ba   : > { %v1914_v2 = vpop.f32.mrf.mxu0  ;;  %v1163_v49 = vadd.f32 %v1162_v53, %v4916_v31 }
 0x1bb   : > { %2074 = vmatmul.bf16.gmra.mxu1 %v4913_v6 }
 0x1bc   : > { %v1700_v47 = vpop.f32.mrf.mxu3  ;;  %2266 = vmatmul.bf16.gmra.mxu2 %v4915_v62  ;;  %v4922_v62 = vld [vmem:[#allocation2_spill] sm:$0xff] }
 0x1bd   : > { %v1743_v56 = vadd.f32 %v1700_v47, %v1551_v18 }
 0x1bf   : > { %v1511_v55 = vpop.f32.mrf.mxu2  ;;  %v4653_v4 = vadd.f32 %v1914_v2, %v1743_v56 }
 0x1c0   : > { %v1552_v37 = vadd.f32 %v1511_v55, %v1163_v49  ;;  %v4923_v55 = vld [vmem:[#allocation27_spill] sm:$0xff] }
 0x1c1   : > { %2480 = vmatmul.bf16.gmra.mxu3 %v4917_v50  ;;  %v1164_v61 = vpop.f32.mrf.mxu1  ;;  %v4924_v50 = vld [vmem:[#allocation22_spill] sm:$0xff] }
 0x1c2   : > { %v1917_v5 = vpop.f32.mrf.mxu0  ;;  %v1165_v51 = vadd.f32 %v1164_v61, %v4919_v63 }
 0x1c4   : > { %v1703_v28 = vpop.f32.mrf.mxu3 }
 0x1c5   : > { %2678 = vmatmul.bf16.gmra.mxu0 %v4918_v8  ;;  %v1744_v19 = vadd.f32 %v1703_v28, %v1552_v37 }
 0x1c7   : > { %v1513_v7 = vpop.f32.mrf.mxu2  ;;  %v4658_v9 = vadd.f32 %v1917_v5, %v1744_v19 }
 0x1c8   : > { %v1553_v34 = vadd.f32 %v1513_v7, %v1165_v51 }
 0x1c9   : > { %v1167_v35 = vpop.f32.mrf.mxu1 }
 0x1ca   : > { %v1919_v6 = vpop.f32.mrf.mxu0  ;;  %v1168_v18 = vadd.f32 %v1167_v35, %v4921_v43 }
 0x1cb   : > { %2079 = vmatmul.bf16.gmra.mxu1 %v4918_v8 }
 0x1cc   : > { %v1705_v59 = vpop.f32.mrf.mxu3  ;;  %2271 = vmatmul.bf16.gmra.mxu2 %v4920_v40 }
 0x1cd   : > { %v1745_v44 = vadd.f32 %v1705_v59, %v1553_v34  ;;  %v4925_v34 = vld [vmem:[#allocation25_spill] sm:$0xff] }
 0x1cf   : > { %v1516_v53 = vpop.f32.mrf.mxu2  ;;  %v4663_v2 = vadd.f32 %v1919_v6, %v1745_v44 }
 0x1d0   : > { %v1554_v47 = vadd.f32 %v1516_v53, %v1168_v18 }
 0x1d1   : > { %2485 = vmatmul.bf16.gmra.mxu3 %v4922_v62  ;;  %v1169_v56 = vpop.f32.mrf.mxu1 }
 0x1d2   : > { %v1922_v31 = vpop.f32.mrf.mxu0  ;;  %v1170_v61 = vadd.f32 %v1169_v56, %v4924_v50 }
 0x1d4   : > { %v1708_v49 = vpop.f32.mrf.mxu3 }
 0x1d5   : > { %2683 = vmatmul.bf16.gmra.mxu0 %v4923_v55  ;;  %v1746_v37 = vadd.f32 %v1708_v49, %v1554_v47  ;;  %v4926_v47 = vld [vmem:[#allocation28_spill] sm:$0xff] }
 0x1d7   : > { %v1518_v5 = vpop.f32.mrf.mxu2  ;;  %v4668_v28 = vadd.f32 %v1922_v31, %v1746_v37 }
 0x1d8   : > { %v1555_v8 = vadd.f32 %v1518_v5, %v1170_v61 }
 0x1d9   : > { %v1172_v19 = vpop.f32.mrf.mxu1 }
 0x1da   : > { %v1924_v63 = vpop.f32.mrf.mxu0  ;;  %v1173_v35 = vadd.f32 %v1172_v19, %v4925_v34 }
 0x1db   : > { %2084 = vmatmul.bf16.gmra.mxu1 %v4923_v55 }
 0x1dc   : > { %v1710_v51 = vpop.f32.mrf.mxu3  ;;  %2276 = vmatmul.bf16.gmra.mxu2 %v4384_v14 }
 0x1dd   : > { %v1747_v7 = vadd.f32 %v1710_v51, %v1555_v8 }
 0x1df   : > { %v1521_v6 = vpop.f32.mrf.mxu2  ;;  %v4673_v59 = vadd.f32 %v1924_v63, %v1747_v7 }
 0x1e0   : > { %v1556_v40 = vadd.f32 %v1521_v6, %v1173_v35 }
 0x1e1   : > { %2490 = vmatmul.bf16.gmra.mxu3 %v3902_v12  ;;  %v1174_v44 = vpop.f32.mrf.mxu1 }
 0x1e2   : > { %v1927_v43 = vpop.f32.mrf.mxu0  ;;  %v1175_v62 = vadd.f32 %v1174_v44, %v4926_v47 }
 0x1e4   : > { %v1713_v18 = vpop.f32.mrf.mxu3 }
 0x1e5   : > { %2688 = vmatmul.bf16.gmra.mxu0 %v4406_v60  ;;  %v1748_v53 = vadd.f32 %v1713_v18, %v1556_v40 }
 0x1e7   : > { %v1523_v56 = vpop.f32.mrf.mxu2  ;;  %v4678_v14 = vadd.f32 %v1927_v43, %v1748_v53 }
 0x1e8   : > { %v1557_v31 = vadd.f32 %v1523_v56, %v1175_v62 }
 0x1e9   : > { %v2050_v49 = vpop.f32.mrf.mxu1 }
 0x1ea   : > { %v1929_v55 = vpop.f32.mrf.mxu0  ;;  %v2130_v50 = vadd.f32 %v2050_v49, %v4404_v15 }
 0x1eb   : > { %2089 = vmatmul.bf16.gmra.mxu1 %v4406_v60  ;;  %v4927_v60 = vld [vmem:[#allocation29_spill] sm:$0xff] }
 0x1ec   : > { %v1715_v37 = vpop.f32.mrf.mxu3  ;;  %2281 = vmatmul.bf16.gmra.mxu2 %v4416_v29 }
 0x1ed   : > { %v1749_v12 = vadd.f32 %v1715_v37, %v1557_v31 }
 0x1ef   : > { %v2242_v61 = vpop.f32.mrf.mxu2  ;;  %v4683_v5 = vadd.f32 %v1929_v55, %v1749_v12 }
 0x1f0   : > { %v2322_v8 = vadd.f32 %v2242_v61, %v2130_v50 }
 0x1f1   : > { %2495 = vmatmul.bf16.gmra.mxu3 %v4011_v26  ;;  %v2052_v19 = vpop.f32.mrf.mxu1 }
 0x1f2   : > { %v2654_v63 = vpop.f32.mrf.mxu0  ;;  %v2131_v29 = vadd.f32 %v2052_v19, %v4927_v60 }
 0x1f4   : > { %v2456_v51 = vpop.f32.mrf.mxu3 }
 0x1f5   : > { %2693 = vmatmul.bf16.gmra.mxu0 %v4431_v11  ;;  %v2536_v7 = vadd.f32 %v2456_v51, %v2322_v8 }
 0x1f7   : > { %v2734_v15 = vadd.f32 %v2654_v63, %v2536_v7  ;;  %v2244_v34 = vpop.f32.mrf.mxu2 }
 0x1f8   : > { %v2323_v26 = vadd.f32 %v2244_v34, %v2131_v29 }
 0x1f9   : > { %2766 = vst [vmem:[%s4691_s10] sm:$0xff] %v2734_v15  ;;  %v2055_v35 = vpop.f32.mrf.mxu1  ;;  %v2836_v47 = vmul.f32 %v2734_v15, %v2734_v15 }
 0x1fa   : > { %v2656_v6 = vpop.f32.mrf.mxu0  ;;  %v2132_v18 = vadd.f32 %v2055_v35, %v4429_v54 }
 0x1fb   : > { %2094 = vmatmul.bf16.gmra.mxu1 %v4431_v11 }
 0x1fc   : > { %v2458_v40 = vpop.f32.mrf.mxu3  ;;  %2286 = vmatmul.bf16.gmra.mxu2 %v4438_v22 }
 0x1fd   : > { %v2537_v44 = vadd.f32 %v2458_v40, %v2323_v26 }
 0x1ff   : > { %v2735_v43 = vadd.f32 %v2656_v6, %v2537_v44  ;;  %v2247_v53 = vpop.f32.mrf.mxu2 }
 0x200   : > { %v2324_v31 = vadd.f32 %v2247_v53, %v2132_v18  ;;  %v4929_v53 = vld [vmem:[#allocation30_spill] sm:$0xff] }
 0x201   : > { %2767 = vst [vmem:[%s4691_s10 + $0x8] sm:$0xff] %v2735_v43  ;;  %v2798_v62 = vadd.f32 %v2735_v43, %v2734_v15  ;;  %v2837_v56 = vmul.f32 %v2735_v43, %v2735_v43  ;;  %2500 = vmatmul.bf16.gmra.mxu3 %v4115_v58  ;;  %v2057_v49 = vpop.f32.mrf.mxu1 }
 0x202   : > { %v2659_v55 = vpop.f32.mrf.mxu0  ;;  %v2133_v50 = vadd.f32 %v2057_v49, %v4442_v21 }
 0x203   : > { %v2868_v37 = vadd.f32 %v2837_v56, %v2836_v47 }
 0x204   : > { %v2461_v11 = vpop.f32.mrf.mxu3 }
 0x205   : > { %2698 = vmatmul.bf16.gmra.mxu0 %v4462_v23  ;;  %v2538_v22 = vadd.f32 %v2461_v11, %v2324_v31  ;;  %v4930_v11 = vld [vmem:[#allocation33_spill] sm:$0xff] }
 0x207   : > { %v2736_v12 = vadd.f32 %v2659_v55, %v2538_v22  ;;  %v2249_v54 = vpop.f32.mrf.mxu2 }
 0x208   : > { %v2325_v19 = vadd.f32 %v2249_v54, %v2133_v50  ;;  %v4931_v50 = vld [vmem:[#allocation31_spill] sm:$0xff] }
 0x209   : > { %2768 = vst [vmem:[%s4691_s10 + $0x10] sm:$0xff] %v2736_v12  ;;  %v2799_v61 = vadd.f32 %v2798_v62, %v2736_v12  ;;  %v2838_v8 = vmul.f32 %v2736_v12, %v2736_v12  ;;  %v2060_v63 = vpop.f32.mrf.mxu1 }
 0x20a   : > { %v2661_v51 = vpop.f32.mrf.mxu0  ;;  %v2134_v29 = vadd.f32 %v2060_v63, %v4460_v17  ;;  %v4932_v63 = vld [vmem:[#allocation4_spill] sm:$0xff] }
 0x20b   : > { %v2869_v58 = vadd.f32 %v2868_v37, %v2838_v8  ;;  %2099 = vmatmul.bf16.gmra.mxu1 %v4462_v23  ;;  %v4928_v23 = vld [vmem:[#allocation32_spill] sm:$0xff] }
 0x20c   : > { %v2463_v7 = vpop.f32.mrf.mxu3  ;;  %2291 = vmatmul.bf16.gmra.mxu2 %v4472_v39 }
 0x20d   : > { %v2539_v15 = vadd.f32 %v2463_v7, %v2325_v19 }
 0x20f   : > { %v2737_v60 = vadd.f32 %v2661_v51, %v2539_v15  ;;  %v2252_v21 = vpop.f32.mrf.mxu2 }
 0x210   : > { %v2326_v35 = vadd.f32 %v2252_v21, %v2134_v29  ;;  %v4933_v29 = vld [vmem:[#allocation36_spill] sm:$0xff] }
 0x211   : > { %2769 = vst [vmem:[%s4691_s10 + $0x18] sm:$0xff] %v2737_v60  ;;  %v2800_v34 = vadd.f32 %v2799_v61, %v2737_v60  ;;  %v2839_v26 = vmul.f32 %v2737_v60, %v2737_v60  ;;  %2505 = vmatmul.bf16.gmra.mxu3 %v3811_v36  ;;  %v2062_v6 = vpop.f32.mrf.mxu1 }
 0x212   : > { %v2664_v40 = vpop.f32.mrf.mxu0  ;;  %v2135_v47 = vadd.f32 %v2062_v6, %v4929_v53 }
 0x213   : > { %v2870_v44 = vadd.f32 %v2869_v58, %v2839_v26  ;;  %v4934_v26 = vld [vmem:[#allocation34_spill] sm:$0xff] }
 0x214   : > { %v2466_v43 = vpop.f32.mrf.mxu3 }
 0x215   : > { %2703 = vmatmul.bf16.gmra.mxu0 %v4928_v23  ;;  %v2540_v18 = vadd.f32 %v2466_v43, %v2326_v35 }
 0x217   : > { %v2738_v39 = vadd.f32 %v2664_v40, %v2540_v18  ;;  %v2254_v17 = vpop.f32.mrf.mxu2 }
 0x218   : > { %v2327_v31 = vadd.f32 %v2254_v17, %v2135_v47  ;;  %v4935_v47 = vld [vmem:[#allocation37_spill] sm:$0xff] }
 0x219   : > { %2770 = vst [vmem:[%s4691_s10 + $0x20] sm:$0xff] %v2738_v39  ;;  %v2801_v62 = vadd.f32 %v2800_v34, %v2738_v39  ;;  %v2840_v56 = vmul.f32 %v2738_v39, %v2738_v39  ;;  %v2065_v49 = vpop.f32.mrf.mxu1 }
 0x21a   : > { %v2666_v55 = vpop.f32.mrf.mxu0  ;;  %v2136_v54 = vadd.f32 %v2065_v49, %v4931_v50 }
 0x21b   : > { %v2871_v36 = vadd.f32 %v2870_v44, %v2840_v56  ;;  %2104 = vmatmul.bf16.gmra.mxu1 %v4928_v23  ;;  %v4936_v56 = vld [vmem:[#allocation35_spill] sm:$0xff] }
 0x21c   : > { %v2468_v37 = vpop.f32.mrf.mxu3  ;;  %2296 = vmatmul.bf16.gmra.mxu2 %v4930_v11 }
 0x21d   : > { %v2541_v22 = vadd.f32 %v2468_v37, %v2327_v31  ;;  %v4937_v37 = vld [vmem:[#allocation6_spill] sm:$0xff] }
 0x21f   : > { %v2739_v12 = vadd.f32 %v2666_v55, %v2541_v22  ;;  %v2257_v61 = vpop.f32.mrf.mxu2 }
 0x220   : > { %v2328_v51 = vadd.f32 %v2257_v61, %v2136_v54  ;;  %v4938_v61 = vld [vmem:[#allocation42_spill] sm:$0xff] }
 0x221   : > { %2771 = vst [vmem:[%s4691_s10 + $0x28] sm:$0xff] %v2739_v12  ;;  %v2802_v8 = vadd.f32 %v2801_v62, %v2739_v12  ;;  %v2841_v19 = vmul.f32 %v2739_v12, %v2739_v12  ;;  %2510 = vmatmul.bf16.gmra.mxu3 %v4932_v63  ;;  %v2067_v58 = vpop.f32.mrf.mxu1  ;;  %v4939_v63 = vld [vmem:[#allocation38_spill] sm:$0xff] }
 0x222   : > { %v2669_v7 = vpop.f32.mrf.mxu0  ;;  %v2137_v35 = vadd.f32 %v2067_v58, %v4934_v26 }
 0x223   : > { %v2872_v15 = vadd.f32 %v2871_v36, %v2841_v19 }
 0x224   : > { %v2471_v60 = vpop.f32.mrf.mxu3 }
 0x225   : > { %2708 = vmatmul.bf16.gmra.mxu0 %v4933_v29  ;;  %v2542_v21 = vadd.f32 %v2471_v60, %v2328_v51 }
 0x227   : > { %v2740_v34 = vadd.f32 %v2669_v7, %v2542_v21  ;;  %v2259_v6 = vpop.f32.mrf.mxu2 }
 0x228   : > { %v2329_v43 = vadd.f32 %v2259_v6, %v2137_v35 }
 0x229   : > { %2772 = vst [vmem:[%s4691_s10 + $0x30] sm:$0xff] %v2740_v34  ;;  %v2803_v40 = vadd.f32 %v2802_v8, %v2740_v34  ;;  %v2842_v44 = vmul.f32 %v2740_v34, %v2740_v34  ;;  %v2070_v23 = vpop.f32.mrf.mxu1 }
 0x22a   : > { %v2671_v18 = vpop.f32.mrf.mxu0  ;;  %v2138_v31 = vadd.f32 %v2070_v23, %v4936_v56  ;;  %v4941_v23 = vld [vmem:[#allocation40_spill] sm:$0xff] }
 0x22b   : > { %v2873_v39 = vadd.f32 %v2872_v15, %v2842_v44  ;;  %2109 = vmatmul.bf16.gmra.mxu1 %v4933_v29  ;;  %v4737_v56 = vld [vmem:[%s3735_s30 + $0xd0] sm:$0xf] }
 0x22c   : > { %v2473_v53 = vpop.f32.mrf.mxu3  ;;  %2301 = vmatmul.bf16.gmra.mxu2 %v4935_v47 }
 0x22d   : > { %v2543_v17 = vadd.f32 %v2473_v53, %v2329_v43 }
 0x22f   : > { %v2741_v62 = vadd.f32 %v2671_v18, %v2543_v17  ;;  %v2262_v49 = vpop.f32.mrf.mxu2  ;;  %v1967_v18 = vrot.slane %v4941_v23, 5 }
 0x230   : > { %v2330_v11 = vadd.f32 %v2262_v49, %v2138_v31  ;;  %v4942_v49 = vld [vmem:[#allocation39_spill] sm:$0xff] }
 0x231   : > { %2773 = vst [vmem:[%s4691_s10 + $0x38] sm:$0xff] %v2741_v62  ;;  %v2804_v55 = vadd.f32 %v2803_v40, %v2741_v62  ;;  %v2843_v36 = vmul.f32 %v2741_v62, %v2741_v62  ;;  %2515 = vmatmul.bf16.gmra.mxu3 %v4937_v37  ;;  %v2072_v22 = vpop.f32.mrf.mxu1  ;;  %v4940_v40 = vld [vmem:[#allocation41_spill] sm:$0xff]  ;;  %v4734_v62 = vld [vmem:[%s3735_s30 + $0xcc] sm:$0xf] }
 0x232   : > { %v2674_v12 = vpop.f32.mrf.mxu0  ;;  %v2139_v51 = vadd.f32 %v2072_v22, %v4939_v63  ;;  %v2355_v22 = vshrl.u32 %v4734_v62, 16 }
 0x233   : > { %v2874_v50 = vadd.f32 %v2873_v39, %v2843_v36  ;;  %v1969_v36 = vrot.slane %v1967_v18, 4 }
 0x234   : > { %v2476_v54 = vpop.f32.mrf.mxu3 }
 0x235   : > { %2713 = vmatmul.bf16.gmra.mxu0 %v4938_v61  ;;  %v2544_v8 = vadd.f32 %v2476_v54, %v2330_v11  ;;  %v1970_v11 = vrot.slane %v4565_v25, 5  ;;  %v2368_v54 = vshrl.u32 %v4737_v56, 16 }
 0x237   : > { %v2742_v19 = vadd.f32 %v2674_v12, %v2544_v8  ;;  %v2264_v58 = vpop.f32.mrf.mxu2  ;;  %v2358_v12 = vshll.u32 %v4734_v62, 16  ;;  %v1971_v25 = vsel %vm4123_vm5, %v1969_v36, %v1970_v11 }
 0x238   : > { %v2331_v60 = vadd.f32 %v2264_v58, %v2139_v51  ;;  %v2357_v58 = vrot.slane %v2355_v22, 4 }
 0x239   : > { %2774 = vst [vmem:[%s4691_s10 + $0x40] sm:$0xff] %v2742_v19  ;;  %v2805_v7 = vadd.f32 %v2804_v55, %v2742_v19  ;;  %v2844_v15 = vmul.f32 %v2742_v19, %v2742_v19  ;;  %v2075_v29 = vpop.f32.mrf.mxu1  ;;  %v3327_v55 = vrot.slane %v4942_v49, 9 }
 0x23a   : > { %v2676_v21 = vpop.f32.mrf.mxu0  ;;  %v2140_v44 = vadd.f32 %v2075_v29, %v4940_v40 }
 0x23b   : > { %v2875_v34 = vadd.f32 %v2874_v50, %v2844_v15  ;;  %2114 = vmatmul.bf16.gmra.mxu1 %v4938_v61  ;;  %v1968_v51 = vsel %vm4123_vm5, %v3327_v55, %v1967_v18 }
 0x23c   : > { %v2478_v26 = vpop.f32.mrf.mxu3  ;;  %2306 = vmatmul.bf16.gmra.mxu2 %v4559_v20 }
 0x23d   : > { %v2545_v35 = vadd.f32 %v2478_v26, %v2331_v60  ;;  %v322_v26 = vld [vmem:[%s3735_s30 + $0xd4] sm:$0x1] }
 0x23e   : > { %v2374_v18 = vshll.u32 %v322_v26, 16 }
 0x23f   : > { %v2743_v6 = vadd.f32 %v2676_v21, %v2545_v35  ;;  %v2267_v43 = vpop.f32.mrf.mxu2  ;;  %v2370_v35 = vrot.slane %v2368_v54, 4  ;;  %v3476_v54 = vrot.slane %v4734_v62, 9 }
 0x240   : > { %v2332_v47 = vadd.f32 %v2267_v43, %v2140_v44  ;;  %v1989_v44 = vunpack.c.l.b16 %v1968_v51  ;;  %v1990_v43 = vunpack.c.l.b16 %v1971_v25  ;;  %v2376_v36 = vrot.slane %v2374_v18, 5 }
 0x241   : > { %2775 = vst [vmem:[%s4691_s10 + $0x48] sm:$0xff] %v2743_v6  ;;  %v2806_v39 = vadd.f32 %v2805_v7, %v2743_v6  ;;  %v2845_v53 = vmul.f32 %v2743_v6, %v2743_v6  ;;  %2520 = vmatmul.bf16.gmra.mxu3 %v4133_v48  ;;  %v2077_v17 = vpop.f32.mrf.mxu1  ;;  %v2364_v48 = vshll.u32 %v4737_v56, 16  ;;  %v2360_v7 = vrot.slane %v2358_v12, 5 }
 0x242   : > { %v2679_v31 = vpop.f32.mrf.mxu0  ;;  %v2141_v8 = vadd.f32 %v2077_v17, %v4567_v3  ;;  %v1991_v49 = vpack.c.b16 %v1990_v43, %v1989_v44 }
 0x243   : > { %v2876_v20 = vadd.f32 %v2875_v34, %v2845_v53  ;;  %v2366_v15 = vrot.slane %v2364_v48, 5  ;;  %v2361_v23 = vor.u32 %v2360_v7, %v2357_v58  ;;  %v3545_v58 = vld [vmem:[%s3735_s30 + $0xcc] sm:$0xff] }
 0x244   : > { %v2481_v37 = vpop.f32.mrf.mxu3 }
 0x245   : > { %2718 = vmatmul.bf16.gmra.mxu0 %v4579_v1  ;;  %v2546_v50 = vadd.f32 %v2481_v37, %v2332_v47  ;;  %v2371_v47 = vor.u32 %v2370_v35, %v2366_v15  ;;  %v2362_v55 = vrot.slane %v2361_v23, 4 }
 0x247   : > { %v2744_v61 = vadd.f32 %v2679_v31, %v2546_v50  ;;  %v2269_v19 = vpop.f32.mrf.mxu2  ;;  %v2372_v22 = vrot.slane %v2371_v47, 4 }
 0x248   : > { %v2333_v21 = vadd.f32 %v2269_v19, %v2141_v8 }
 0x249   : > { %2776 = vst [vmem:[%s4691_s10 + $0x50] sm:$0xff] %v2744_v61  ;;  %v2807_v60 = vadd.f32 %v2806_v39, %v2744_v61  ;;  %v2846_v29 = vmul.f32 %v2744_v61, %v2744_v61  ;;  %v2080_v34 = vpop.f32.mrf.mxu1  ;;  %v2377_v61 = vsel %vm3750_vm2, %v2372_v22, %v2376_v36 }
 0x24a   : > { %v2681_v6 = vpop.f32.mrf.mxu0  ;;  %v2142_v17 = vadd.f32 %v2080_v34, %v4577_v0  ;;  %v2367_v0 = vsel %vm3750_vm2, %v2362_v55, %v2366_v15 }
 0x24b   : > { %v2877_v40 = vadd.f32 %v2876_v20, %v2846_v29  ;;  %2119 = vmatmul.bf16.gmra.mxu1 %v4579_v1  ;;  %v2571_v20 = vrot.slane %v4737_v56, 5  ;;  %v2395_v7 = vunpack.c.l.b16 %v2367_v0 }
 0x24c   : > { %v2483_v3 = vpop.f32.mrf.mxu3  ;;  %2311 = vmatmul.bf16.gmra.mxu2 %v4588_v27 }
 0x24d   : > { %v2547_v53 = vadd.f32 %v2483_v3, %v2333_v21  ;;  %v2573_v8 = vrot.slane %v2571_v20, 4  ;;  %v2572_v29 = vsel %vm4123_vm5, %v3476_v54, %v2571_v20 }
 0x24f   : > { %v2745_v39 = vadd.f32 %v2681_v6, %v2547_v53  ;;  %v2272_v31 = vpop.f32.mrf.mxu2  ;;  %v2593_v6 = vunpack.c.l.b16 %v2572_v29 }
 0x250   : > { %v2334_v27 = vadd.f32 %v2272_v31, %v2142_v17 }
 0x251   : > { %2777 = vst [vmem:[%s4691_s10 + $0x58] sm:$0xff] %v2745_v39  ;;  %v2808_v1 = vadd.f32 %v2807_v60, %v2745_v39  ;;  %v2847_v37 = vmul.f32 %v2745_v39, %v2745_v39  ;;  %2525 = vmatmul.bf16.gmra.mxu3 %v4594_v41  ;;  %v2082_v11 = vpop.f32.mrf.mxu1  ;;  %v2574_v41 = vrot.slane %v322_v26, 5  ;;  %v2396_v60 = vunpack.c.l.b16 %v2377_v61 }
 0x252   : > { %v2684_v12 = vpop.f32.mrf.mxu0  ;;  %v2143_v51 = vadd.f32 %v2082_v11, %v4591_v13 }
 0x253   : > { %v2878_v48 = vadd.f32 %v2877_v40, %v2847_v37  ;;  %v2575_v30 = vsel %vm4123_vm5, %v2573_v8, %v2574_v41  ;;  %v2397_v44 = vpack.c.b16 %v2396_v60, %v2395_v7 }
 0x254   : > { %v2486_v50 = vpop.f32.mrf.mxu3  ;;  %v2594_v40 = vunpack.c.l.b16 %v2575_v30 }
 0x255   : > { %2723 = vmatmul.bf16.gmra.mxu0 %v1991_v49  ;;  %v2548_v56 = vadd.f32 %v2486_v50, %v2334_v27 }
 0x256   : > { %v2595_v53 = vpack.c.b16 %v2594_v40, %v2593_v6 }
 0x257   : > { %v2746_v19 = vadd.f32 %v2684_v12, %v2548_v56  ;;  %v2274_v25 = vpop.f32.mrf.mxu2 }
 0x258   : > { %v2335_v21 = vadd.f32 %v2274_v25, %v2143_v51 }
 0x259   : > { %2778 = vst [vmem:[%s4691_s10 + $0x60] sm:$0xff] %v2746_v19  ;;  %v2809_v15 = vadd.f32 %v2808_v1, %v2746_v19  ;;  %v2848_v62 = vmul.f32 %v2746_v19, %v2746_v19  ;;  %v2085_v34 = vpop.f32.mrf.mxu1 }
 0x25a   : > { %v2686_v26 = vpop.f32.mrf.mxu0  ;;  %v2144_v23 = vadd.f32 %v2085_v34, %v4598_v33 }
 0x25b   : > { %v2879_v35 = vadd.f32 %v2878_v48, %v2848_v62  ;;  %2124 = vmatmul.bf16.gmra.mxu1 %v1991_v49 }
 0x25c   : > { %v2488_v13 = vpop.f32.mrf.mxu3  ;;  %2316 = vmatmul.bf16.gmra.mxu2 %v3545_v58 }
 0x25d   : > { %v2549_v3 = vadd.f32 %v2488_v13, %v2335_v21 }
 0x25f   : > { %v2747_v43 = vadd.f32 %v2686_v26, %v2549_v3  ;;  %v2277_v18 = vpop.f32.mrf.mxu2 }
 0x260   : > { %v2336_v63 = vadd.f32 %v2277_v18, %v2144_v23 }
 0x261   : > { %2779 = vst [vmem:[%s4691_s10 + $0x68] sm:$0xff] %v2747_v43  ;;  %v2810_v47 = vadd.f32 %v2809_v15, %v2747_v43  ;;  %v2849_v39 = vmul.f32 %v2747_v43, %v2747_v43  ;;  %2530 = vmatmul.bf16.gmra.mxu3 %v2397_v44  ;;  %v2087_v17 = vpop.f32.mrf.mxu1 }
 0x262   : > { %v2689_v31 = vpop.f32.mrf.mxu0  ;;  %v2145_v1 = vadd.f32 %v2087_v17, %v4603_v32 }
 0x263   : > { %v2880_v49 = vadd.f32 %v2879_v35, %v2849_v39 }
 0x264   : > { %v2491_v55 = vpop.f32.mrf.mxu3 }
 0x265   : > { %2728 = vmatmul.bf16.gmra.mxu0 %v2595_v53  ;;  %v2550_v36 = vadd.f32 %v2491_v55, %v2336_v63 }
 0x267   : > { %v2748_v20 = vadd.f32 %v2689_v31, %v2550_v36  ;;  %v2279_v37 = vpop.f32.mrf.mxu2 }
 0x268   : > { %v2337_v11 = vadd.f32 %v2279_v37, %v2145_v1 }
 0x269   : > { %2780 = vst [vmem:[%s4691_s10 + $0x70] sm:$0xff] %v2748_v20  ;;  %v2811_v33 = vadd.f32 %v2810_v47, %v2748_v20  ;;  %v2850_v27 = vmul.f32 %v2748_v20, %v2748_v20  ;;  %v2090_v22 = vpop.f32.mrf.mxu1 }
 0x26a   : > { %v2691_v12 = vpop.f32.mrf.mxu0  ;;  %v2146_v56 = vadd.f32 %v2090_v22, %v4608_v24 }
 0x26b   : > { %v2881_v48 = vadd.f32 %v2880_v49, %v2850_v27 }
 0x26c   : > { %v2493_v50 = vpop.f32.mrf.mxu3 }
 0x26d   : > { %v2551_v0 = vadd.f32 %v2493_v50, %v2337_v11 }
 0x26f   : > { %v2749_v54 = vadd.f32 %v2691_v12, %v2551_v0  ;;  %v2282_v61 = vpop.f32.mrf.mxu2 }
 0x270   : > { %v2338_v19 = vadd.f32 %v2282_v61, %v2146_v56 }
 0x271   : > { %2781 = vst [vmem:[%s4691_s10 + $0x78] sm:$0xff] %v2749_v54  ;;  %v2812_v8 = vadd.f32 %v2811_v33, %v2749_v54  ;;  %v2851_v41 = vmul.f32 %v2749_v54, %v2749_v54  ;;  %v2092_v32 = vpop.f32.mrf.mxu1 }
 0x272   : > { %v2694_v51 = vpop.f32.mrf.mxu0  ;;  %v2147_v29 = vadd.f32 %v2092_v32, %v4613_v16 }
 0x273   : > { %v2882_v25 = vadd.f32 %v2881_v48, %v2851_v41 }
 0x274   : > { %v2496_v58 = vpop.f32.mrf.mxu3 }
 0x275   : > { %v2552_v7 = vadd.f32 %v2496_v58, %v2338_v19 }
 0x277   : > { %v2750_v60 = vadd.f32 %v2694_v51, %v2552_v7  ;;  %v2284_v15 = vpop.f32.mrf.mxu2 }
 0x278   : > { %v2339_v34 = vadd.f32 %v2284_v15, %v2147_v29 }
 0x279   : > { %2782 = vst [vmem:[%s4691_s10 + $0x80] sm:$0xff] %v2750_v60  ;;  %v2813_v62 = vadd.f32 %v2812_v8, %v2750_v60  ;;  %v2852_v21 = vmul.f32 %v2750_v60, %v2750_v60  ;;  %v2095_v24 = vpop.f32.mrf.mxu1 }
 0x27a   : > { %v2696_v30 = vpop.f32.mrf.mxu0  ;;  %v2148_v40 = vadd.f32 %v2095_v24, %v4618_v45 }
 0x27b   : > { %v2883_v26 = vadd.f32 %v2882_v25, %v2852_v21 }
 0x27c   : > { %v2498_v35 = vpop.f32.mrf.mxu3 }
 0x27d   : > { %v2553_v13 = vadd.f32 %v2498_v35, %v2339_v34 }
 0x27f   : > { %v2751_v6 = vadd.f32 %v2696_v30, %v2553_v13  ;;  %v2287_v3 = vpop.f32.mrf.mxu2 }
 0x280   : > { %v2340_v23 = vadd.f32 %v2287_v3, %v2148_v40 }
 0x281   : > { %2783 = vst [vmem:[%s4691_s10 + $0x88] sm:$0xff] %v2751_v6  ;;  %v2814_v44 = vadd.f32 %v2813_v62, %v2751_v6  ;;  %v2853_v43 = vmul.f32 %v2751_v6, %v2751_v6  ;;  %v2097_v16 = vpop.f32.mrf.mxu1 }
 0x282   : > { %v2699_v18 = vpop.f32.mrf.mxu0  ;;  %v2149_v17 = vadd.f32 %v2097_v16, %v4623_v38 }
 0x283   : > { %v2884_v53 = vadd.f32 %v2883_v26, %v2853_v43 }
 0x284   : > { %v2501_v47 = vpop.f32.mrf.mxu3 }
 0x285   : > { %v2554_v39 = vadd.f32 %v2501_v47, %v2340_v23 }
 0x287   : > { %v2752_v63 = vadd.f32 %v2699_v18, %v2554_v39  ;;  %v2289_v31 = vpop.f32.mrf.mxu2 }
 0x288   : > { %v2341_v36 = vadd.f32 %v2289_v31, %v2149_v17 }
 0x289   : > { %2784 = vst [vmem:[%s4691_s10 + $0x90] sm:$0xff] %v2752_v63  ;;  %v2815_v49 = vadd.f32 %v2814_v44, %v2752_v63  ;;  %v2854_v55 = vmul.f32 %v2752_v63, %v2752_v63  ;;  %v2100_v45 = vpop.f32.mrf.mxu1 }
 0x28a   : > { %v2701_v20 = vpop.f32.mrf.mxu0  ;;  %v2150_v11 = vadd.f32 %v2100_v45, %v4628_v10 }
 0x28b   : > { %v2885_v1 = vadd.f32 %v2884_v53, %v2854_v55 }
 0x28c   : > { %v2503_v37 = vpop.f32.mrf.mxu3 }
 0x28d   : > { %v2555_v33 = vadd.f32 %v2503_v37, %v2341_v36 }
 0x28f   : > { %v2753_v27 = vadd.f32 %v2701_v20, %v2555_v33  ;;  %v2292_v22 = vpop.f32.mrf.mxu2 }
 0x290   : > { %v2342_v50 = vadd.f32 %v2292_v22, %v2150_v11 }
 0x291   : > { %2785 = vst [vmem:[%s4691_s10 + $0x98] sm:$0xff] %v2753_v27  ;;  %v2816_v12 = vadd.f32 %v2815_v49, %v2753_v27  ;;  %v2855_v48 = vmul.f32 %v2753_v27, %v2753_v27  ;;  %v2102_v38 = vpop.f32.mrf.mxu1 }
 0x292   : > { %v2704_v0 = vpop.f32.mrf.mxu0  ;;  %v2151_v41 = vadd.f32 %v2102_v38, %v4633_v42 }
 0x293   : > { %v2886_v54 = vadd.f32 %v2885_v1, %v2855_v48 }
 0x294   : > { %v2506_v56 = vpop.f32.mrf.mxu3 }
 0x295   : > { %v2556_v61 = vadd.f32 %v2506_v56, %v2342_v50 }
 0x297   : > { %v2754_v8 = vadd.f32 %v2704_v0, %v2556_v61  ;;  %v2294_v19 = vpop.f32.mrf.mxu2 }
 0x298   : > { %v2343_v25 = vadd.f32 %v2294_v19, %v2151_v41 }
 0x299   : > { %2786 = vst [vmem:[%s4691_s10 + $0xa0] sm:$0xff] %v2754_v8  ;;  %v2817_v32 = vadd.f32 %v2816_v12, %v2754_v8  ;;  %v2856_v51 = vmul.f32 %v2754_v8, %v2754_v8  ;;  %v2105_v10 = vpop.f32.mrf.mxu1 }
 0x29a   : > { %v2706_v58 = vpop.f32.mrf.mxu0  ;;  %v2152_v62 = vadd.f32 %v2105_v10, %v4638_v52 }
 0x29b   : > { %v2887_v7 = vadd.f32 %v2886_v54, %v2856_v51 }
 0x29c   : > { %v2508_v60 = vpop.f32.mrf.mxu3 }
 0x29d   : > { %v2557_v29 = vadd.f32 %v2508_v60, %v2343_v25 }
 0x29f   : > { %v2755_v15 = vadd.f32 %v2706_v58, %v2557_v29  ;;  %v2297_v21 = vpop.f32.mrf.mxu2 }
 0x2a0   : > { %v2344_v30 = vadd.f32 %v2297_v21, %v2152_v62 }
 0x2a1   : > { %2787 = vst [vmem:[%s4691_s10 + $0xa8] sm:$0xff] %v2755_v15  ;;  %v2818_v34 = vadd.f32 %v2817_v32, %v2755_v15  ;;  %v2857_v24 = vmul.f32 %v2755_v15, %v2755_v15  ;;  %v2107_v42 = vpop.f32.mrf.mxu1 }
 0x2a2   : > { %v2709_v26 = vpop.f32.mrf.mxu0  ;;  %v2153_v3 = vadd.f32 %v2107_v42, %v4643_v46 }
 0x2a3   : > { %v2888_v35 = vadd.f32 %v2887_v7, %v2857_v24 }
 0x2a4   : > { %v2511_v13 = vpop.f32.mrf.mxu3 }
 0x2a5   : > { %v2558_v6 = vadd.f32 %v2511_v13, %v2344_v30 }
 0x2a7   : > { %v2756_v40 = vadd.f32 %v2709_v26, %v2558_v6  ;;  %v2299_v44 = vpop.f32.mrf.mxu2 }
 0x2a8   : > { %v2345_v16 = vadd.f32 %v2299_v44, %v2153_v3 }
 0x2a9   : > { %2788 = vst [vmem:[%s4691_s10 + $0xb0] sm:$0xff] %v2756_v40  ;;  %v2819_v43 = vadd.f32 %v2818_v34, %v2756_v40  ;;  %v2858_v23 = vmul.f32 %v2756_v40, %v2756_v40  ;;  %v2110_v52 = vpop.f32.mrf.mxu1 }
 0x2aa   : > { %v2711_v18 = vpop.f32.mrf.mxu0  ;;  %v2154_v17 = vadd.f32 %v2110_v52, %v4648_v57 }
 0x2ab   : > { %v2889_v53 = vadd.f32 %v2888_v35, %v2858_v23 }
 0x2ac   : > { %v2513_v47 = vpop.f32.mrf.mxu3 }
 0x2ad   : > { %v2559_v39 = vadd.f32 %v2513_v47, %v2345_v16 }
 0x2af   : > { %v2757_v63 = vadd.f32 %v2711_v18, %v2559_v39  ;;  %v2302_v31 = vpop.f32.mrf.mxu2 }
 0x2b0   : > { %v2346_v36 = vadd.f32 %v2302_v31, %v2154_v17 }
 0x2b1   : > { %2789 = vst [vmem:[%s4691_s10 + $0xb8] sm:$0xff] %v2757_v63  ;;  %v2820_v49 = vadd.f32 %v2819_v43, %v2757_v63  ;;  %v2859_v55 = vmul.f32 %v2757_v63, %v2757_v63  ;;  %v2112_v46 = vpop.f32.mrf.mxu1 }
 0x2b2   : > { %v2714_v45 = vpop.f32.mrf.mxu0  ;;  %v2155_v27 = vadd.f32 %v2112_v46, %v4653_v4 }
 0x2b3   : > { %v2890_v20 = vadd.f32 %v2889_v53, %v2859_v55 }
 0x2b4   : > { %v2516_v1 = vpop.f32.mrf.mxu3 }
 0x2b5   : > { %v2560_v37 = vadd.f32 %v2516_v1, %v2346_v36 }
 0x2b7   : > { %v2758_v33 = vadd.f32 %v2714_v45, %v2560_v37  ;;  %v2304_v11 = vpop.f32.mrf.mxu2 }
 0x2b8   : > { %v2347_v48 = vadd.f32 %v2304_v11, %v2155_v27 }
 0x2b9   : > { %2790 = vst [vmem:[%s4691_s10 + $0xc0] sm:$0xff] %v2758_v33  ;;  %v2821_v22 = vadd.f32 %v2820_v49, %v2758_v33  ;;  %v2860_v12 = vmul.f32 %v2758_v33, %v2758_v33  ;;  %v2115_v57 = vpop.f32.mrf.mxu1 }
 0x2ba   : > { %v2716_v50 = vpop.f32.mrf.mxu0  ;;  %v2156_v61 = vadd.f32 %v2115_v57, %v4658_v9 }
 0x2bb   : > { %v2891_v38 = vadd.f32 %v2890_v20, %v2860_v12 }
 0x2bc   : > { %v2518_v0 = vpop.f32.mrf.mxu3 }
 0x2bd   : > { %v2561_v54 = vadd.f32 %v2518_v0, %v2347_v48 }
 0x2bf   : > { %v2759_v56 = vadd.f32 %v2716_v50, %v2561_v54  ;;  %v2307_v8 = vpop.f32.mrf.mxu2 }
 0x2c0   : > { %v2348_v32 = vadd.f32 %v2307_v8, %v2156_v61 }
 0x2c1   : > { %2791 = vst [vmem:[%s4691_s10 + $0xc8] sm:$0xff] %v2759_v56  ;;  %v2822_v41 = vadd.f32 %v2821_v22, %v2759_v56  ;;  %v2861_v19 = vmul.f32 %v2759_v56, %v2759_v56  ;;  %v2117_v4 = vpop.f32.mrf.mxu1 }
 0x2c2   : > { %v2719_v51 = vpop.f32.mrf.mxu0  ;;  %v2157_v60 = vadd.f32 %v2117_v4, %v4663_v2 }
 0x2c3   : > { %v2892_v25 = vadd.f32 %v2891_v38, %v2861_v19 }
 0x2c4   : > { %v2521_v10 = vpop.f32.mrf.mxu3 }
 0x2c5   : > { %v2562_v58 = vadd.f32 %v2521_v10, %v2348_v32 }
 0x2c7   : > { %v2760_v7 = vadd.f32 %v2719_v51, %v2562_v58  ;;  %v2309_v29 = vpop.f32.mrf.mxu2 }
 0x2c8   : > { %v2349_v21 = vadd.f32 %v2309_v29, %v2157_v60 }
 0x2c9   : > { %2792 = vst [vmem:[%s4691_s10 + $0xd0] sm:$0xff] %v2760_v7  ;;  %v2823_v15 = vadd.f32 %v2822_v41, %v2760_v7  ;;  %v2862_v62 = vmul.f32 %v2760_v7, %v2760_v7  ;;  %v2120_v9 = vpop.f32.mrf.mxu1 }
 0x2ca   : > { %v2721_v34 = vpop.f32.mrf.mxu0  ;;  %v2158_v35 = vadd.f32 %v2120_v9, %v4668_v28 }
 0x2cb   : > { %v2893_v24 = vadd.f32 %v2892_v25, %v2862_v62 }
 0x2cc   : > { %v2523_v30 = vpop.f32.mrf.mxu3 }
 0x2cd   : > { %v2563_v42 = vadd.f32 %v2523_v30, %v2349_v21 }
 0x2cf   : > { %v2761_v26 = vadd.f32 %v2721_v34, %v2563_v42  ;;  %v2312_v13 = vpop.f32.mrf.mxu2 }
 0x2d0   : > { %v2350_v3 = vadd.f32 %v2312_v13, %v2158_v35 }
 0x2d1   : > { %2793 = vst [vmem:[%s4691_s10 + $0xd8] sm:$0xff] %v2761_v26  ;;  %v2824_v6 = vadd.f32 %v2823_v15, %v2761_v26  ;;  %v2863_v40 = vmul.f32 %v2761_v26, %v2761_v26  ;;  %v2122_v2 = vpop.f32.mrf.mxu1 }
 0x2d2   : > { %v2724_v44 = vpop.f32.mrf.mxu0  ;;  %v2159_v18 = vadd.f32 %v2122_v2, %v4673_v59 }
 0x2d3   : > { %v2894_v43 = vadd.f32 %v2893_v24, %v2863_v40 }
 0x2d4   : > { %v2526_v23 = vpop.f32.mrf.mxu3 }
 0x2d5   : > { %v2564_v16 = vadd.f32 %v2526_v23, %v2350_v3 }
 0x2d7   : > { %v2762_v52 = vadd.f32 %v2724_v44, %v2564_v16  ;;  %v2314_v53 = vpop.f32.mrf.mxu2 }
 0x2d8   : > { %v2351_v63 = vadd.f32 %v2314_v53, %v2159_v18 }
 0x2d9   : > { %2794 = vst [vmem:[%s4691_s10 + $0xe0] sm:$0xff] %v2762_v52  ;;  %v2825_v47 = vadd.f32 %v2824_v6, %v2762_v52  ;;  %v2864_v39 = vmul.f32 %v2762_v52, %v2762_v52  ;;  %v2125_v28 = vpop.f32.mrf.mxu1 }
 0x2da   : > { %v2726_v17 = vpop.f32.mrf.mxu0  ;;  %v2160_v46 = vadd.f32 %v2125_v28, %v4678_v14 }
 0x2db   : > { %v2895_v31 = vadd.f32 %v2894_v43, %v2864_v39 }
 0x2dc   : > { %v2528_v49 = vpop.f32.mrf.mxu3 }
 0x2dd   : > { %v2565_v55 = vadd.f32 %v2528_v49, %v2351_v63 }
 0x2df   : > { %v2763_v36 = vadd.f32 %v2726_v17, %v2565_v55  ;;  %v2317_v45 = vpop.f32.mrf.mxu2 }
 0x2e0   : > { %v2352_v37 = vadd.f32 %v2317_v45, %v2160_v46 }
 0x2e1   : > { %2795 = vst [vmem:[%s4691_s10 + $0xe8] sm:$0xff] %v2763_v36  ;;  %v2826_v20 = vadd.f32 %v2825_v47, %v2763_v36  ;;  %v2865_v1 = vmul.f32 %v2763_v36, %v2763_v36  ;;  %v2127_v33 = vpop.f32.mrf.mxu1 }
 0x2e2   : > { %v2729_v27 = vpop.f32.mrf.mxu0  ;;  %v2161_v48 = vadd.f32 %v2127_v33, %v4683_v5 }
 0x2e3   : > { %v2896_v59 = vadd.f32 %v2895_v31, %v2865_v1 }
 0x2e4   : > { %v2531_v11 = vpop.f32.mrf.mxu3 }
 0x2e5   : > { %v2566_v22 = vadd.f32 %v2531_v11, %v2352_v37 }
 0x2e7   : > { %v2764_v12 = vadd.f32 %v2729_v27, %v2566_v22  ;;  %v2319_v57 = vpop.f32.mrf.mxu2 }
 0x2e8   : > { %v2353_v0 = vadd.f32 %v2319_v57, %v2161_v48 }
 0x2e9   : > { %2796 = vst [vmem:[%s4691_s10 + $0xf0] sm:$0xff] %v2764_v12  ;;  %v2827_v50 = vadd.f32 %v2826_v20, %v2764_v12  ;;  %v2866_v38 = vmul.f32 %v2764_v12, %v2764_v12 }
 0x2ea   : > { %v2731_v61 = vpop.f32.mrf.mxu0 }
 0x2eb   : > { %v2897_v14 = vadd.f32 %v2896_v59, %v2866_v38 }
 0x2ec   : > { %v2533_v54 = vpop.f32.mrf.mxu3 }
 0x2ed   : > { %v2567_v56 = vadd.f32 %v2533_v54, %v2353_v0 }
 0x2ef   : > { %v2765_v8 = vadd.f32 %v2731_v61, %v2567_v56 }
 0x2f1   : > { %2797 = vst [vmem:[%s4691_s10 + $0xf8] sm:$0xff] %v2765_v8  ;;  %v2828_v41 = vadd.f32 %v2827_v50, %v2765_v8  ;;  %v2867_v19 = vmul.f32 %v2765_v8, %v2765_v8 }
 0x2f3   : > { %v2829_v32 = vrot.slane %v2828_v41, 4  ;;  %v2898_v4 = vadd.f32 %v2897_v14, %v2867_v19 }
 0x2f5   : > { %v2830_v51 = vadd.f32 %v2829_v32, %v2828_v41  ;;  %v2899_v25 = vrot.slane %v2898_v4, 4 }
 0x2f7   : > { %v2831_v5 = vrot.slane %v2830_v51, 2  ;;  %v2900_v10 = vadd.f32 %v2899_v25, %v2898_v4 }
 0x2f9   : > { %v2832_v58 = vadd.f32 %v2831_v5, %v2830_v51  ;;  %v2901_v7 = vrot.slane %v2900_v10, 2 }
 0x2fb   : > { %v2833_v60 = vrot.slane %v2832_v58, 1  ;;  %v2902_v29 = vadd.f32 %v2901_v7, %v2900_v10 }
 0x2fd   : > { %v2834_v15 = vadd.f32 %v2833_v60, %v2832_v58  ;;  %v2903_v62 = vrot.slane %v2902_v29, 1 }
 0x2ff   : > { %2835 = vst [vmem:[%s265_s12] sm:$0x1] %v2834_v15  ;;  %v2904_v21 = vadd.f32 %v2903_v62, %v2902_v29 }
 0x301   : > { %2905 = vst [vmem:[%s268_s15] sm:$0x1] %v2904_v21 }
 0x302 PF: > { %s17_s21 = sadd.s32 1, %s3675_s21  }
 0x303   : > { %p14_p4 = scmp.ge.s32.totalorder %s17_s21, 4  }
 0x305   :  { %16 = sbr.rel (!%p14_p4) target bundleno = 1 (0x1), region = 98 }

</bundles_post_ra>
